<compile_context>
chip_gen: v7x
topology: tpu7x:2x2x1
jax: 0.10.0
libtpu: 0.0.40
codegen_flags: <defaults>
</compile_context>

<pallas_src>
import jax
import jax.numpy as jnp
import numpy as np
from jax import lax
from jax.experimental import pallas as pl
from jax.experimental.pallas import tpu as pltpu


def unet_transition_down(x_nchw, w_oihw, bias, kernel_size):
    """Pallas TPU implementation of UNet_TransitionDown.forward (float32)."""
    pad = max((kernel_size - 1) // 2, 1)
    N, Cin, H, W = x_nchw.shape
    Cout = w_oihw.shape[0]
    KH = KW = kernel_size
    Hp, Wp = H + 2 * pad, W + 2 * pad
    Ho, Wo = Hp - (KH - 1), Wp - (KW - 1)
    assert Ho % 2 == 0 and Wo % 2 == 0, "conv output must be even for the 2x2/2 pool"
    Hh, Wh = Ho // 2, Wo // 2
    K = KH * KW * Cin

    x = x_nchw.astype(jnp.float32)  # NCHW, untouched (no activation transposes)
    # One-time tiny weight re-layout: (Cout,Cin,KH,KW) -> (Cout, KH*KW*Cin), row order (kh,kw,c).
    w2 = jnp.transpose(w_oihw.astype(jnp.float32), (0, 2, 3, 1)).reshape(Cout, K)
    b2 = bias.astype(jnp.float32).reshape(Cout, 1)

    def kernel(x_ref, w_ref, b_ref, o_ref, xp_ref):
        # x_ref : (1, Cin, H, W)    one NCHW image
        # w_ref : (Cout, K)         conv weights, K = KH*KW*Cin
        # b_ref : (Cout, 1)         bias, broadcast along lanes
        # o_ref : (1, Cout, Hh*Wh)  pooled output, flat spatial on lanes
        # xp_ref: (Cin, Hp, Wp)     VMEM tile holding the zero-padded image

        # Padding folded into the kernel: zero the tile, copy the interior.
        xp_ref[...] = jnp.zeros_like(xp_ref)
        xp_ref[:, pad:pad + H, pad:pad + W] = x_ref[0]

        # im2col: stack the KH*KW shifted windows along the contraction axis.
        slabs = []
        for kh in range(KH):
            for kw in range(KW):
                win = xp_ref[:, kh:kh + Ho, kw:kw + Wo]          # (Cin, Ho, Wo)
                slabs.append(win.reshape(Cin, Ho * Wo))
        patches = jnp.concatenate(slabs, axis=0)                 # (K, Ho*Wo)

        # Conv (+ bias) + ReLU, single MXU matmul; Cout on sublanes, spatial on lanes.
        y = jnp.dot(w_ref[...], patches,
                    preferred_element_type=jnp.float32)          # (Cout, Ho*Wo)
        y = jnp.maximum(y + b_ref[...], 0.0)

        # 2x2 stride-2 max pool, fully in registers.
        # Rows: view as (Cout, Hh, 2*Wo); the two contiguous lane halves are conv rows 2i, 2i+1.
        y = y.reshape(Cout, Hh, 2 * Wo)
        y = jnp.maximum(y[:, :, :Wo], y[:, :, Wo:])              # (Cout, Hh, Wo)
        # Cols: adjacent lane pairs.
        y = jnp.max(y.reshape(Cout, Hh, Wh, 2), axis=3)          # (Cout, Hh, Wh)

        o_ref[0] = y.reshape(Cout, Hh * Wh)

    flops = 2 * N * Ho * Wo * K * Cout
    bytes_accessed = 4 * (N * Cin * H * W + Cout * K + Cout + N * Cout * Hh * Wh)

    out_flat = pl.pallas_call(
        kernel,
        out_shape=jax.ShapeDtypeStruct((N, Cout, Hh * Wh), jnp.float32),
        grid=(N,),
        in_specs=[
            pl.BlockSpec((1, Cin, H, W), lambda n: (n, 0, 0, 0)),
            pl.BlockSpec((Cout, K), lambda n: (0, 0)),
            pl.BlockSpec((Cout, 1), lambda n: (0, 0)),
        ],
        out_specs=pl.BlockSpec((1, Cout, Hh * Wh), lambda n: (n, 0, 0)),
        scratch_shapes=[pltpu.VMEM((Cin, Hp, Wp), jnp.float32)],
        compiler_params=pltpu.CompilerParams(dimension_semantics=("parallel",)),
        cost_estimate=pl.CostEstimate(flops=flops, transcendentals=0,
                                      bytes_accessed=bytes_accessed),
    )(x, w2, b2)

    return out_flat.reshape(N, Cout, Hh, Wh)  # NCHW; contiguous reshape, no transpose


def _reference(x_nchw, w_oihw, bias, kernel_size):
    """Plain-JAX reference (conv -> ReLU -> 2x2 maxpool), NCHW, float32."""
    pad = max((kernel_size - 1) // 2, 1)
    y = lax.conv_general_dilated(
        x_nchw.astype(jnp.float32), w_oihw.astype(jnp.float32),
        window_strides=(1, 1), padding=[(pad, pad), (pad, pad)],
        dimension_numbers=("NCHW", "OIHW", "NCHW"))
    y = y + bias.astype(jnp.float32)[None, :, None, None]
    y = jnp.maximum(y, 0.0)
    n, c, hh, ww = y.shape
    y = y.reshape(n, c, hh // 2, 2, ww // 2, 2)
    return jnp.max(y, axis=(3, 5))


if __name__ == "__main__":
    # Module config: In_Channel=4, kernel_size=3 -> Conv2d(4, 8, 3, stride=1, pad=1)
    In_Channel = 4
    kernel_size = 3
    N, H, W = 2, 16, 16
    Cout = 2 * In_Channel

    key = jax.random.PRNGKey(0)
    kx, kw, kb = jax.random.split(key, 3)

    x = jax.random.normal(kx, (N, In_Channel, H, W), dtype=jnp.float32)

    # PyTorch Conv2d-style uniform(-1/sqrt(fan_in), 1/sqrt(fan_in)) init.
    fan_in = In_Channel * kernel_size * kernel_size
    bound = 1.0 / np.sqrt(fan_in)
    w_oihw = jax.random.uniform(kw, (Cout, In_Channel, kernel_size, kernel_size),
                                minval=-bound, maxval=bound, dtype=jnp.float32)
    bias = jax.random.uniform(kb, (Cout,), minval=-bound, maxval=bound,
                              dtype=jnp.float32)

    out = jax.block_until_ready(unet_transition_down(x, w_oihw, bias, kernel_size))
    ref = jax.block_until_ready(_reference(x, w_oihw, bias, kernel_size))

    assert out.shape == (N, Cout, H // 2, W // 2), out.shape
    np.testing.assert_allclose(np.asarray(out), np.asarray(ref), rtol=1e-4, atol=1e-4)

    print("KERNEL_OK")
</pallas_src>

<mosaic_0001>
module attributes {stable_mosaic.version = 11 : i64} {
  func.func @kernel(%arg0: i32, %arg1: memref<1x4x16x16xf32, #tpu.memory_space<vmem>>, %arg2: memref<8x36xf32, #tpu.memory_space<vmem>>, %arg3: memref<8x1xf32, #tpu.memory_space<vmem>>, %arg4: memref<1x8x64xf32, #tpu.memory_space<vmem>>, %arg5: memref<4x18x18xf32, #tpu.memory_space<vmem>>) attributes {dimension_semantics = [#tpu.dimension_semantics<parallel>], iteration_bounds = array<i64: 2>, scalar_prefetch = 0 : i64, scratch_operands = 1 : i64, tpu.core_type = #tpu.core_type<tc>, window_params = [{transform_indices = @transform_0, window_bounds = array<i64: 1, 4, 16, 16>}, {pipeline_mode = #tpu.pipeline_mode<synchronous>, transform_indices = @transform_1, window_bounds = array<i64: 8, 36>}, {pipeline_mode = #tpu.pipeline_mode<synchronous>, transform_indices = @transform_2, window_bounds = array<i64: 8, 1>}, {transform_indices = @transform_3, window_bounds = array<i64: 1, 8, 64>}]} {
    %cst = arith.constant 0.000000e+00 : f32
    %0 = vector.broadcast %cst : f32 to vector<4x18x18xf32>
    %c0 = arith.constant 0 : index
    %c0_0 = arith.constant 0 : index
    %c0_1 = arith.constant 0 : index
    %1 = vector.load %arg5[%c0, %c0_0, %c0_1] : memref<4x18x18xf32, #tpu.memory_space<vmem>>, vector<4x18x18xf32>
    tpu.vector_store %arg5[%c0, %c0_0, %c0_1], %0 {strides = array<i32>} : memref<4x18x18xf32, #tpu.memory_space<vmem>>, vector<4x18x18xf32>,
    %c0_2 = arith.constant 0 : index
    %c0_3 = arith.constant 0 : index
    %c0_4 = arith.constant 0 : index
    %c0_5 = arith.constant 0 : index
    %2 = vector.load %arg1[%c0_2, %c0_3, %c0_4, %c0_5] : memref<1x4x16x16xf32, #tpu.memory_space<vmem>>, vector<1x4x16x16xf32>
    %3 = vector.shape_cast %2 : vector<1x4x16x16xf32> to vector<4x16x16xf32>
    %c0_6 = arith.constant 0 : index
    %c1 = arith.constant 1 : index
    %c1_7 = arith.constant 1 : index
    %4 = vector.load %arg5[%c0_6, %c1, %c1_7] : memref<4x18x18xf32, #tpu.memory_space<vmem>>, vector<4x16x16xf32>
    tpu.vector_store %arg5[%c0_6, %c1, %c1_7], %3 {strides = array<i32>} : memref<4x18x18xf32, #tpu.memory_space<vmem>>, vector<4x16x16xf32>,
    %c0_8 = arith.constant 0 : index
    %c0_9 = arith.constant 0 : index
    %c0_10 = arith.constant 0 : index
    %5 = vector.load %arg5[%c0_8, %c0_9, %c0_10] : memref<4x18x18xf32, #tpu.memory_space<vmem>>, vector<4x16x16xf32>
    %6 = vector.shape_cast %5 : vector<4x16x16xf32> to vector<4x256xf32>
    %c0_11 = arith.constant 0 : index
    %c0_12 = arith.constant 0 : index
    %c1_13 = arith.constant 1 : index
    %7 = vector.load %arg5[%c0_11, %c0_12, %c1_13] : memref<4x18x18xf32, #tpu.memory_space<vmem>>, vector<4x16x16xf32>
    %8 = vector.shape_cast %7 : vector<4x16x16xf32> to vector<4x256xf32>
    %c0_14 = arith.constant 0 : index
    %c0_15 = arith.constant 0 : index
    %c2 = arith.constant 2 : index
    %9 = vector.load %arg5[%c0_14, %c0_15, %c2] : memref<4x18x18xf32, #tpu.memory_space<vmem>>, vector<4x16x16xf32>
    %10 = vector.shape_cast %9 : vector<4x16x16xf32> to vector<4x256xf32>
    %c0_16 = arith.constant 0 : index
    %c1_17 = arith.constant 1 : index
    %c0_18 = arith.constant 0 : index
    %11 = vector.load %arg5[%c0_16, %c1_17, %c0_18] : memref<4x18x18xf32, #tpu.memory_space<vmem>>, vector<4x16x16xf32>
    %12 = vector.shape_cast %11 : vector<4x16x16xf32> to vector<4x256xf32>
    %c0_19 = arith.constant 0 : index
    %c1_20 = arith.constant 1 : index
    %c1_21 = arith.constant 1 : index
    %13 = vector.load %arg5[%c0_19, %c1_20, %c1_21] : memref<4x18x18xf32, #tpu.memory_space<vmem>>, vector<4x16x16xf32>
    %14 = vector.shape_cast %13 : vector<4x16x16xf32> to vector<4x256xf32>
    %c0_22 = arith.constant 0 : index
    %c1_23 = arith.constant 1 : index
    %c2_24 = arith.constant 2 : index
    %15 = vector.load %arg5[%c0_22, %c1_23, %c2_24] : memref<4x18x18xf32, #tpu.memory_space<vmem>>, vector<4x16x16xf32>
    %16 = vector.shape_cast %15 : vector<4x16x16xf32> to vector<4x256xf32>
    %c0_25 = arith.constant 0 : index
    %c2_26 = arith.constant 2 : index
    %c0_27 = arith.constant 0 : index
    %17 = vector.load %arg5[%c0_25, %c2_26, %c0_27] : memref<4x18x18xf32, #tpu.memory_space<vmem>>, vector<4x16x16xf32>
    %18 = vector.shape_cast %17 : vector<4x16x16xf32> to vector<4x256xf32>
    %c0_28 = arith.constant 0 : index
    %c2_29 = arith.constant 2 : index
    %c1_30 = arith.constant 1 : index
    %19 = vector.load %arg5[%c0_28, %c2_29, %c1_30] : memref<4x18x18xf32, #tpu.memory_space<vmem>>, vector<4x16x16xf32>
    %20 = vector.shape_cast %19 : vector<4x16x16xf32> to vector<4x256xf32>
    %c0_31 = arith.constant 0 : index
    %c2_32 = arith.constant 2 : index
    %c2_33 = arith.constant 2 : index
    %21 = vector.load %arg5[%c0_31, %c2_32, %c2_33] : memref<4x18x18xf32, #tpu.memory_space<vmem>>, vector<4x16x16xf32>
    %22 = vector.shape_cast %21 : vector<4x16x16xf32> to vector<4x256xf32>
    %23 = tpu.concatenate %6, %8, %10, %12, %14, %16, %18, %20, %22 in 0 : vector<4x256xf32>, vector<4x256xf32>, vector<4x256xf32>, vector<4x256xf32>, vector<4x256xf32>, vector<4x256xf32>, vector<4x256xf32>, vector<4x256xf32>, vector<4x256xf32> -> vector<36x256xf32>
    %c0_34 = arith.constant 0 : index
    %c0_35 = arith.constant 0 : index
    %24 = vector.load %arg2[%c0_34, %c0_35] : memref<8x36xf32, #tpu.memory_space<vmem>>, vector<8x36xf32>
    %cst_36 = arith.constant dense<0.000000e+00> : vector<8x256xf32>
    %25 = tpu.matmul %24, %23, %cst_36 {dimension_numbers = #tpu.dot_dimension_numbers<[1], [0], [0], [1], [0, 0, 1, 1], [], []>} : vector<8x36xf32>, vector<36x256xf32>, vector<8x256xf32> -> vector<8x256xf32>
    %c0_37 = arith.constant 0 : index
    %c0_38 = arith.constant 0 : index
    %26 = vector.load %arg3[%c0_37, %c0_38] : memref<8x1xf32, #tpu.memory_space<vmem>>, vector<8x1xf32>
    %27 = vector.broadcast %26 : vector<8x1xf32> to vector<8x256xf32>
    %28 = arith.addf %25, %27 : vector<8x256xf32>
    %cst_39 = arith.constant 0.000000e+00 : f32
    %29 = vector.broadcast %cst_39 : f32 to vector<8x256xf32>
    %30 = arith.maximumf %28, %29 : vector<8x256xf32>
    %31 = vector.shape_cast %30 : vector<8x256xf32> to vector<8x8x32xf32>
    %32 = vector.extract_strided_slice %31 {offsets = [0, 0, 0], sizes = [8, 8, 16], strides = [1, 1, 1]} : vector<8x8x32xf32> to vector<8x8x16xf32>
    %33 = vector.extract_strided_slice %31 {offsets = [0, 0, 16], sizes = [8, 8, 16], strides = [1, 1, 1]} : vector<8x8x32xf32> to vector<8x8x16xf32>
    %34 = arith.maximumf %32, %33 : vector<8x8x16xf32>
    %35 = vector.shape_cast %34 : vector<8x8x16xf32> to vector<8x8x8x2xf32>
    %cst_40 = arith.constant dense<0xFF800000> : vector<8x8x8xf32>
    %36 = vector.multi_reduction <maximumf>, %35, %cst_40 [3] : vector<8x8x8x2xf32> to vector<8x8x8xf32>
    %37 = vector.shape_cast %36 : vector<8x8x8xf32> to vector<8x64xf32>
    %c0_41 = arith.constant 0 : index
    %c0_42 = arith.constant 0 : index
    %c0_43 = arith.constant 0 : index
    %38 = vector.load %arg4[%c0_41, %c0_42, %c0_43] : memref<1x8x64xf32, #tpu.memory_space<vmem>>, vector<1x8x64xf32>
    %39 = vector.shape_cast %38 : vector<1x8x64xf32> to vector<8x64xf32>
    %40 = vector.shape_cast %37 : vector<8x64xf32> to vector<1x8x64xf32>
    tpu.vector_store %arg4[%c0_41, %c0_42, %c0_43], %40 {strides = array<i32>} : memref<1x8x64xf32, #tpu.memory_space<vmem>>, vector<1x8x64xf32>,
    return
  }
  func.func @transform_0(%arg0: i32) -> (i32, i32, i32, i32) {
    %c0_i32 = arith.constant 0 : i32
    %c0_i32_0 = arith.constant 0 : i32
    %c0_i32_1 = arith.constant 0 : i32
    %c0_i32_2 = arith.constant 0 : i32
    return %arg0, %c0_i32, %c0_i32_0, %c0_i32_1 : i32, i32, i32, i32
  }
  func.func @transform_1(%arg0: i32) -> (i32, i32) {
    %c0_i32 = arith.constant 0 : i32
    %c0_i32_0 = arith.constant 0 : i32
    %c0_i32_1 = arith.constant 0 : i32
    return %c0_i32, %c0_i32_0 : i32, i32
  }
  func.func @transform_2(%arg0: i32) -> (i32, i32) {
    %c0_i32 = arith.constant 0 : i32
    %c0_i32_0 = arith.constant 0 : i32
    %c0_i32_1 = arith.constant 0 : i32
    return %c0_i32, %c0_i32_0 : i32, i32
  }
  func.func @transform_3(%arg0: i32) -> (i32, i32, i32) {
    %c0_i32 = arith.constant 0 : i32
    %c0_i32_0 = arith.constant 0 : i32
    %c0_i32_1 = arith.constant 0 : i32
    return %arg0, %c0_i32, %c0_i32_0 : i32, i32, i32
  }
}

</mosaic_0001>

<bundles_post_ra>
// kernel: tpu_custom_call.1
= control target key start
LH: loop header
LB: loop body
LE: loop exit
PB: predicated region body
PF: predicated region fallthrough
CT: control target
= control target key end

     0   :  { %8 = vsyncpa [#allocation4], 0  ;;  %s8244_s0 = inlined_call_operand.hbm [shape: f32[2,4,16,16], index: 0, kind: input, shape index: {}]   ;;  %s8245_s1 = inlined_call_operand.vmem [shape: f32[8,36], index: 1, kind: input, shape index: {}]   ;;  %s8246_s2 = inlined_call_operand.vmem [shape: f32[8,1], index: 2, kind: input, shape index: {}]   ;;  %s8247_s3 = inlined_call_operand.hbm [shape: f32[2,8,64], index: 3, kind: output, shape index: {}]  }
   0x1   :  { %10 = vsyncpa [#allocation4 + $0x1], 0 }
   0x2   :  { %11 = vsyncpa [#allocation5], 0 }
   0x3   :  { %13 = vsyncpa [#allocation5 + $0x1], 0  ;;  %s5282_s12 = smov 0   ;;  %s5284_s13 = smov 0  }
   0x4   :  { %s5286_s14 = smov 0   ;;  %s5288_s15 = smov 0  }
   0x5 LB: > { %s5303_s16 = sadd.s32 4294967295, %s5232_s15   ;;  %s4734_s17 = sadd.s32 4294967294, %s5232_s15   ;;  %s5232_s15 = sphi %s5288_s15, %s8610_s15   ;;  %s5228_s14 = sphi %s5286_s14, %s8609_s14   ;;  %s5224_s13 = sphi %s5284_s13, %s8608_s13   ;;  %s5220_s12 = sphi %s5282_s12, %s8607_s12  }
   0x6   : > { %s5307_s18 = sadd.s32 1, %s5232_s15   ;;  %s26_s19 = sadd.s32 1, %s5228_s14 }
   0x7   : > { %s23_s20 = ssub.s32 %s5232_s15, %s5307_s18  ;;  %p33_p0 = scmp.ne.s32.totalorder %s5228_s14, %s5224_s13 }
   0x8   : > { %p24_p1 = scmp.eq.s32.totalorder %s23_s20, 0  ;;  %p34_p2 = scmp.eq.s32.totalorder %s5232_s15, 0 }
   0x9   : > { %p39_p3 = scmp.ne.s32.totalorder %s5224_s13, %s5220_s12  ;;  %p40_p4 = scmp.eq.s32.totalorder %s5303_s16, 0 }
   0xa   : > { %s5319_s21 = scalar_select %p24_p1, %s5228_s14, %s26_s19  }
   0xb   : > { %p5321_p5 = por %p34_p2, %p33_p0  ;;  %p5325_p6 = por %p40_p4, %p39_p3 }
   0xc   : > { %p105_p7 = scmp.eq.s32.totalorder %s5303_s16, 1  ;;  %p111_p8 = scmp.eq.s32.totalorder %s4734_s17, 1 }
   0xd   : > { %p4771_p10 = scmp.lt.s32.totalorder %s5232_s15, 2  ;;  %s137_s26 = sand.u32 1, %s5228_s14  }
   0xe   : > { %p5332_p11 = por %p105_p7, %p33_p0  ;;  %p5336_p12 = por %p111_p8, %p39_p3 }
   0xf   : > { %s4750_s27 = sshll.u32 %s5232_s15, 10  ;;  %s4737_s28 = sshll.u32 %s137_s26, 6 }
  0x10   : > { %s8337_s24 = scalar_select %p5332_p11, 1, 0 }
  0x11   : > { %s8338_s25 = scalar_select %p5336_p12, 1, 0 }
  0x12   : > { %s5345_s4 = scalar_lea.hbm %s8244_s0, %s4750_s27  ;;  %s141_s5 = scalar_lea.vmem [#allocation3], %s4737_s28 }
  0x13   : > { %s148_s6 = sshll.u32 %s141_s5, 4  ;;  %p5349_p13 = pnand %p4771_p10, %p5321_p5  ;;  %s5353_s6 = int_to_ptr.vmem [resolvable:$true] %s148_s6 }
  0x14   : > { %s5355_s8 = scalar_lea.sflag [#allocation4], %s137_s26  ;;  %s5136_s9 = scalar_lea.hbm %s5345_s4, 1024 }
  0x15   : > { %p5137_p0 = scmp.ne.s32.totalorder %s5345_s4, %s5136_s9  ;;  %p5138_p1 = pneg %p5349_p13 }
  0x16   : > { %s5141_s17 = scalar_lea.hbm %s8244_s0, 2048  ;;  %p5142_p4 = scmp.lt.u32.totalorder %s5345_s4, %s8244_s0 }
  0x17   : > { %p5139_p2 = pnand %p5138_p1, %p5137_p0  ;;  %p5143_p5 = scmp.lt.u32.totalorder %s5141_s17, %s5136_s9 }
  0x18   : > { %p5145_p8 = scmp.lt.u32.totalorder %s5136_s9, %s5345_s4 }
  0x19   : > { %p5140_p3 = pneg %p5139_p2  ;;  %p5144_p7 = por %p5143_p5, %p5142_p4 }
  0x1b   : > { %p5146_p10 = por %p5145_p8, %p5144_p7 }
  0x1d   : > { %p5147_p9 = pnand %p5146_p10, %p5140_p3 }
  0x1f   : > { %5150 = shalt.err (!%p5147_p9)
}
  0x20   : > { %s5151_s22 = scalar_lea.vmem %s5353_s6, 1024  ;;  %s5234_s26 = smov [#allocation3]  }
  0x21   : > { %p5152_p0 = scmp.ne.s32.totalorder %s5353_s6, %s5151_s22  ;;  %s5156_s27 = sshll.u32 %s5234_s26, 4  ;;  %s5157_s27 = int_to_ptr.vmem [resolvable:$false] %s5156_s27 }
  0x22   : > { %s5158_s28 = scalar_lea.vmem %s5157_s27, 2048  ;;  %p5159_p11 = scmp.lt.s32.totalorder %s5353_s6, %s5157_s27 }
  0x23   : > { %p5154_p2 = pnand %p5152_p0, %p5138_p1  ;;  %p5160_p4 = scmp.lt.s32.totalorder %s5158_s28, %s5151_s22 }
  0x25   : > { %p5155_p12 = pneg %p5154_p2  ;;  %p5161_p5 = por %p5160_p4, %p5159_p11 }
  0x27   : > { %p5162_p7 = pnand %p5161_p5, %p5155_p12 }
  0x29   : > { %5165 = shalt.err (!%p5162_p7)
}
  0x2a   : > { %s5235_s29 = smov 128   ;;  %s5236_s30 = smov 8  }
  0x2b   : > { %4766 = dma.hbm_to_vmem [thread:$0]  (!%p5349_p13), %s5345_s4, 1024, %s5353_s6, %s5355_s8, %s5235_s29, %s5235_s29, %s5236_s30  }
  0x2c   : > { %p4740_p9 = scmp.ge.s32.totalorder %s5232_s15, 1  ;;  %p156_p1 = scmp.lt.s32.totalorder %s5232_s15, 3 }
  0x2e   : > { %p157_p3 = pnand %p4740_p9, %p156_p1 }
  0x30   : > { %160 = sbr.rel (%p157_p3) target bundleno = 1748 (0x6d4), region = 32 }
  0x37   : > { %s5386_s5 = sand.u32 1, %s5224_s13  }
  0x38   : > { %s4741_s9 = sshll.u32 %s5386_s5, 6  ;;  %s163_s10 = scalar_lea.sflag [#allocation4], %s5386_s5 }
  0x39   : > { %s5390_s11 = scalar_lea.vmem [#allocation3], %s4741_s9 }
  0x3a   : > { %5211 = dma.done.wait (%p5325_p6), %s163_s10, 1024  }
  0x3b   : > { %5213 = vsyncadd (%p5325_p6), %s163_s10, 4294966272  ;;  %vm189_vm0 = vcmask 146432   ;;  %vm192_vm1 = vcmask 140288   ;;  %v8250_v0 = vmov 0.0   ;;  %v205_v1 = vld [vmem:[%s5390_s11 + $0x10] sm:$0xff]  ;;  %v203_v2 = vld [vmem:[%s5390_s11] sm:$0xff]  ;;  %v8249_v17 = vlaneseq }
  0x3c   : > { %194 = vst.msk [vmem:[#allocation2 + $0x18] sm:$0xff] %vm189_vm0, %v8250_v0  ;;  %195 = vst.msk [vmem:[#allocation2 + $0x20] sm:$0xff] %vm189_vm0, %v8250_v0  ;;  %2419 = vmatprep.mubr.f32.mxu0 %v8250_v0  ;;  %s5238_s23 = smov 1   ;;  %v206_v3 = vld [vmem:[%s5390_s11 + $0x18] sm:$0xff]  ;;  %v204_v4 = vld [vmem:[%s5390_s11 + $0x8] sm:$0xff]  ;;  %vm243_vm2 = vcmask 138248  }
  0x3d   : > { %190 = vst.msk [vmem:[#allocation2] sm:$0xff] %vm189_vm0, %v8250_v0  ;;  %191 = vst.msk [vmem:[#allocation2 + $0x8] sm:$0xff] %vm189_vm0, %v8250_v0  ;;  %223 = vrot.lane.b32.xlu1 %v205_v1, %s5238_s23  ;;  %219 = vrot.lane.b32.xlu0 %v203_v2, %s5238_s23  ;;  %v208_v5 = vld [vmem:[%s5390_s11 + $0x28] sm:$0xff]  ;;  %v207_v6 = vld [vmem:[%s5390_s11 + $0x20] sm:$0xff]  ;;  %v5239_v15 = vmov 1983009808  }
  0x3e   : > { %197 = vst.msk [vmem:[#allocation2 + $0x30] sm:$0xff] %vm189_vm0, %v8250_v0  ;;  %198 = vst.msk [vmem:[#allocation2 + $0x38] sm:$0xff] %vm189_vm0, %v8250_v0  ;;  %v210_v7 = vld [vmem:[%s5390_s11 + $0x38] sm:$0xff]  ;;  %v209_v8 = vld [vmem:[%s5390_s11 + $0x30] sm:$0xff]  ;;  %v263_v16 = vunpack.c.l.s4 %v5239_v15  ;;  %s5240_s4 = smov 127   ;;  %v5434_v23 = vshrl.u32 %v8249_v17, 7 }
  0x3f   : > { %200 = vst.msk [vmem:[#allocation2 + $0x48] sm:$0xff] %vm189_vm0, %v8250_v0  ;;  %201 = vst.msk [vmem:[#allocation2 + $0x50] sm:$0xff] %vm189_vm0, %v8250_v0  ;;  %s5241_s6 = smov 126   ;;  %s5243_s7 = smov 32   ;;  %vm452_vm3 = vcmask 130048   ;;  %vm454_vm4 = vcmask 261120  }
  0x40   : > { %196 = vst.msk [vmem:[#allocation2 + $0x28] sm:$0x3] %vm192_vm1, %v8250_v0  ;;  %193 = vst.msk [vmem:[#allocation2 + $0x10] sm:$0x3] %vm192_vm1, %v8250_v0  ;;  %v264_v22 = vunpack.c.0.s8 %v263_v16  ;;  %s5244_s8 = smov 64   ;;  %s5245_s17 = smov 96  }
  0x41   : > { %199 = vst.msk [vmem:[#allocation2 + $0x40] sm:$0x3] %vm192_vm1, %v8250_v0  ;;  %202 = vst.msk [vmem:[#allocation2 + $0x58] sm:$0x3] %vm192_vm1, %v8250_v0  ;;  %225 = vrot.lane.b32.xlu1 %v206_v3, %s5238_s23  ;;  %221 = vrot.lane.b32.xlu0 %v204_v4, %s5238_s23  ;;  %s5246_s19 = smov 16   ;;  %s5247_s20 = smov 48  }
  0x42   : > { %8340 = vst [vmem:[#allocation9_spill] sm:$0xff] %v5434_v23  ;;  %v5463_v36 = vsub.s32 %v264_v22, %v5434_v23  ;;  %s5248_s22 = smov 80   ;;  %s5249_s26 = smov 112   ;;  %vm456_vm5 = vcmask 392192   ;;  %vm460_vm6 = vcmask 654336   ;;  %vm458_vm7 = vcmask 523264  }
  0x43   : > { %vm462_vm8 = vcmask 785408   ;;  %vm464_vm9 = vcmask 916480   ;;  %vm2329_vm10 = vcmask 1043456   ;;  %vm2345_vm11 = vcmask 293888   ;;  %s5251_s9 = smov 124   ;;  %s5252_s10 = smov 122  }
  0x44   : > { %8341 = vst [vmem:[#allocation10_spill] sm:$0xff] %v5463_v36  ;;  %s5253_s11 = smov 120   ;;  %vm3888_vm12 = vcmask 15360   ;;  %vm4403_vm13 = vcmask 1041409   ;;  %vm4405_vm14 = vcmask 1042434   ;;  %vm4407_vm15 = vcmask 1043459  }
  0x45   : > { %229 = vrot.lane.b32.xlu1 %v208_v5, %s5238_s23  ;;  %227 = vrot.lane.b32.xlu0 %v207_v6, %s5238_s23  ;;  %vm4409_vm0 = vcmask 1044484   ;;  %vm4411_vm1 = vcmask 1045509   ;;  %p8604_p11 = scmp.ne.s32.totalorder %s8337_s24, 0 }
  0x49   : > { %233 = vrot.lane.b32.xlu1 %v210_v7, %s5238_s23  ;;  %231 = vrot.lane.b32.xlu0 %v209_v8, %s5238_s23  ;;  %s5254_s23 = smov 118  }
  0xaf   : > { %v224_v9 = vpop.permute.xlu1 %223  ;;  %v220_v10 = vpop.permute.xlu0 %219 }
  0xb0   : > { %246 = vst.msk [vmem:[#allocation2 + $0x19] sm:$0xff] %vm243_vm2, %v224_v9  ;;  %244 = vst.msk [vmem:[#allocation2 + $0x1] sm:$0xff] %vm243_vm2, %v220_v10 }
  0xb3   : > { %v226_v11 = vpop.permute.xlu1 %225  ;;  %v222_v12 = vpop.permute.xlu0 %221 }
  0xb4   : > { %247 = vst.msk [vmem:[#allocation2 + $0x21] sm:$0xff] %vm243_vm2, %v226_v11  ;;  %245 = vst.msk [vmem:[#allocation2 + $0x9] sm:$0xff] %vm243_vm2, %v222_v12 }
  0xb7   : > { %v230_v13 = vpop.permute.xlu1 %229  ;;  %v228_v14 = vpop.permute.xlu0 %227  ;;  %v5436_v24 = vld [vmem:[#allocation2] sm:$0xff]  ;;  %v5465_v37 = vld [vmem:[#allocation2 + $0x18] sm:$0xff] }
  0xb8   : > { %249 = vst.msk [vmem:[#allocation2 + $0x39] sm:$0xff] %vm243_vm2, %v230_v13  ;;  %248 = vst.msk [vmem:[#allocation2 + $0x31] sm:$0xff] %vm243_vm2, %v228_v14  ;;  %v5531_v1 = vld [vmem:[#allocation2 + $0x1] sm:$0xff]  ;;  %v5542_v4 = vld [vmem:[#allocation2 + $0x19] sm:$0xff] }
  0xbb   : > { %v234_v18 = vpop.permute.xlu1 %233  ;;  %v232_v19 = vpop.permute.xlu0 %231  ;;  %v5423_v20 = vld [vmem:[#allocation2 + $0x20] sm:$0xff]  ;;  %v5425_v21 = vld [vmem:[#allocation2 + $0x8] sm:$0xff] }
  0xbc   : > { %251 = vst.msk [vmem:[#allocation2 + $0x51] sm:$0xff] %vm243_vm2, %v234_v18  ;;  %250 = vst.msk [vmem:[#allocation2 + $0x49] sm:$0xff] %vm243_vm2, %v232_v19  ;;  %487 = vrot.lane.b32.xlu1 %v5423_v20, %s5240_s4  ;;  %483 = vrot.lane.b32.xlu0 %v5425_v21, %s5240_s4  ;;  %v5454_v32 = vld [vmem:[#allocation2 + $0x9] sm:$0xff]  ;;  %v5487_v46 = vld [vmem:[#allocation2 + $0x21] sm:$0xff]  ;;  %vm4413_vm2 = vcmask 1046534  }
  0xbd   : > { %v5467_v38 = vld [vmem:[#allocation2 + $0xa] sm:$0xff]  ;;  %v5489_v47 = vld [vmem:[#allocation2 + $0x22] sm:$0xff]  ;;  %v5556_v11 = vld [vmem:[#allocation2 + $0x1a] sm:$0xff] }
  0xbe   : > { %v5548_v7 = vld [vmem:[#allocation2 + $0x2] sm:$0xff] }
  0xbf   : > { %v5438_v25 = vld [vmem:[#allocation2 + $0x38] sm:$0xff]  ;;  %v5440_v26 = vld [vmem:[#allocation2 + $0x30] sm:$0xff] }
  0xc0   : > { %v5442_v27 = vld [vmem:[#allocation2 + $0x39] sm:$0xff]  ;;  %491 = vrot.lane.b32.xlu0 %v5438_v25, %s5240_s4  ;;  %v328_v28 = vcombine.low %v5425_v21, %v5438_v25  ;;  %v329_v29 = vcombine.high %v5425_v21, %v5438_v25  ;;  %v260_v30 = vcombine.low %v5436_v24, %v5440_v26  ;;  %v261_v31 = vcombine.high %v5436_v24, %v5440_v26  ;;  %v5501_v53 = vld [vmem:[#allocation2 + $0x31] sm:$0xff] }
  0xc1   : > { %v5456_v33 = vld [vmem:[#allocation2 + $0x3a] sm:$0xff]  ;;  %v1017_v34 = vcombine.low %v5454_v32, %v5442_v27  ;;  %v1018_v35 = vcombine.high %v5454_v32, %v5442_v27  ;;  %v5517_v59 = vld [vmem:[#allocation2 + $0x32] sm:$0xff]  ;;  %v949_v5 = vcombine.low %v5531_v1, %v5501_v53  ;;  %v950_v6 = vcombine.high %v5531_v1, %v5501_v53 }
  0xc2   : > { %v1699_v42 = vcombine.low %v5467_v38, %v5456_v33  ;;  %v5504_v54 = vrot.slane %v328_v28, %v5463_v36  ;;  %v5507_v55 = vrot.slane %v260_v30, %v5463_v36  ;;  %v5510_v56 = vrot.slane %v261_v31, %v5463_v36 }
  0xc3   : > { %v5469_v39 = vld [vmem:[#allocation2 + $0x50] sm:$0xff]  ;;  %v5471_v40 = vld [vmem:[#allocation2 + $0x48] sm:$0xff]  ;;  %v5513_v57 = vrot.slane %v1017_v34, %v5463_v36  ;;  %v1631_v12 = vcombine.low %v5548_v7, %v5517_v59  ;;  %v5567_v15 = vrot.slane %v1018_v35, %v5463_v36  ;;  %v5575_v19 = vrot.slane %v949_v5, %v5463_v36 }
  0xc4   : > { %v5473_v41 = vld [vmem:[#allocation2 + $0x51] sm:$0xff]  ;;  %495 = vrot.lane.b32.xlu1 %v5469_v39, %s5240_s4  ;;  %v344_v43 = vcombine.low %v5423_v20, %v5469_v39  ;;  %v345_v44 = vcombine.high %v5423_v20, %v5469_v39  ;;  %481 = vrot.lane.b32.xlu0 %v5436_v24, %s5240_s4  ;;  %v276_v45 = vcombine.low %v5465_v37, %v5471_v40  ;;  %v5515_v58 = vld [vmem:[#allocation2 + $0x49] sm:$0xff] }
  0xc5   : > { %v5491_v48 = vld [vmem:[#allocation2 + $0x52] sm:$0xff]  ;;  %v277_v49 = vcombine.high %v5465_v37, %v5471_v40  ;;  %v1033_v50 = vcombine.low %v5487_v46, %v5473_v41  ;;  %v1034_v51 = vcombine.high %v5487_v46, %v5473_v41  ;;  %8342 = vst [vmem:[#allocation11_spill] sm:$0xff] %v5504_v54  ;;  %v5526_v62 = vrot.slane %v1699_v42, %v5463_v36  ;;  %v5533_v2 = vld [vmem:[#allocation2 + $0x4a] sm:$0xff] }
  0xc6   : > { %v1715_v52 = vcombine.low %v5489_v47, %v5491_v48  ;;  %v5520_v60 = vrot.slane %v344_v43, %v5463_v36  ;;  %v965_v9 = vcombine.low %v5542_v4, %v5515_v58  ;;  %v966_v10 = vcombine.high %v5542_v4, %v5515_v58 }
  0xc7   : > { %v5523_v61 = vrot.slane %v1033_v50, %v5463_v36  ;;  %8344 = vst [vmem:[#allocation13_spill] sm:$0xff] %v5526_v62  ;;  %v5540_v3 = vrot.slane %v1034_v51, %v5463_v36  ;;  %v5561_v13 = vrot.slane %v276_v45, %v5463_v36  ;;  %v5564_v14 = vrot.slane %v277_v49, %v5463_v36 }
  0xc8   : > { %8343 = vst [vmem:[#allocation12_spill] sm:$0xff] %v5520_v60  ;;  %v5529_v63 = vrot.slane %v1715_v52, %v5463_v36  ;;  %485 = vrot.lane.b32.xlu1 %v5465_v37, %s5240_s4  ;;  %489 = vrot.lane.b32.xlu0 %v5440_v26, %s5240_s4  ;;  %v1647_v16 = vcombine.low %v5556_v11, %v5533_v2 }
  0xc9   : > { %v5572_v18 = vrot.slane %v345_v44, %v5463_v36  ;;  %v5578_v22 = vrot.slane %v965_v9, %v5463_v36  ;;  %v5581_v28 = vrot.slane %v966_v10, %v5463_v36  ;;  %v5588_v30 = vrot.slane %v1631_v12, %v5463_v36 }
  0xca   : > { %8345 = vst [vmem:[#allocation14_spill] sm:$0xff] %v5529_v63  ;;  %v5591_v31 = vrot.slane %v1647_v16, %v5463_v36  ;;  %v1050_v34 = vcombine.high %v5513_v57, %v5523_v61  ;;  %v5596_v35 = vrot.slane %v950_v6, %v5463_v36  ;;  %v361_v43 = vcombine.high %v5504_v54, %v5520_v60 }
  0xcb   : > { %8346 = vst [vmem:[#allocation15_spill] sm:$0xff] %v5588_v30  ;;  %v982_v42 = vcombine.high %v5575_v19, %v5578_v22  ;;  %v5614_v51 = vrot.slane %v329_v29, %v5463_v36 }
  0xcc   : > { %493 = vrot.lane.b32.xlu1 %v5471_v40, %s5240_s4  ;;  %713 = vrot.lane.b32.xlu0 %v5425_v21, %s5241_s6  ;;  %8347 = vst [vmem:[#allocation16_spill] sm:$0xff] %v5591_v31 }
  0xd0   : > { %717 = vrot.lane.b32.xlu1 %v5423_v20, %s5241_s6  ;;  %721 = vrot.lane.b32.xlu0 %v5438_v25, %s5241_s6 }
  0xd4   : > { %725 = vrot.lane.b32.xlu1 %v5469_v39, %s5241_s6  ;;  %711 = vrot.lane.b32.xlu0 %v5436_v24, %s5241_s6 }
  0xd8   : > { %715 = vrot.lane.b32.xlu1 %v5465_v37, %s5241_s6  ;;  %719 = vrot.lane.b32.xlu0 %v5440_v26, %s5241_s6 }
  0xdc   : > { %723 = vrot.lane.b32.xlu1 %v5471_v40, %s5241_s6  ;;  %1395 = vrot.lane.b32.xlu0 %v5454_v32, %s5241_s6 }
  0xe0   : > { %1399 = vrot.lane.b32.xlu1 %v5487_v46, %s5241_s6  ;;  %1403 = vrot.lane.b32.xlu0 %v5442_v27, %s5241_s6 }
  0xe4   : > { %1407 = vrot.lane.b32.xlu1 %v5473_v41, %s5241_s6  ;;  %1847 = vrot.lane.b32.xlu0 %v5467_v38, %s5240_s4 }
  0xe8   : > { %1851 = vrot.lane.b32.xlu1 %v5489_v47, %s5240_s4  ;;  %1855 = vrot.lane.b32.xlu0 %v5456_v33, %s5240_s4 }
  0xec   : > { %1859 = vrot.lane.b32.xlu1 %v5491_v48, %s5240_s4  ;;  %1393 = vrot.lane.b32.xlu0 %v5531_v1, %s5241_s6 }
  0xf0   : > { %1397 = vrot.lane.b32.xlu1 %v5542_v4, %s5241_s6  ;;  %1401 = vrot.lane.b32.xlu0 %v5501_v53, %s5241_s6 }
  0xf4   : > { %1405 = vrot.lane.b32.xlu1 %v5515_v58, %s5241_s6  ;;  %1845 = vrot.lane.b32.xlu0 %v5548_v7, %s5240_s4 }
  0xf8   : > { %1849 = vrot.lane.b32.xlu1 %v5556_v11, %s5240_s4  ;;  %1853 = vrot.lane.b32.xlu0 %v5517_v59, %s5240_s4 }
  0xfc   : > { %1857 = vrot.lane.b32.xlu1 %v5533_v2, %s5240_s4  ;;  %1165 = vrot.lane.b32.xlu0 %v5454_v32, %s5240_s4 }
 0x100   : > { %1169 = vrot.lane.b32.xlu1 %v5487_v46, %s5240_s4  ;;  %1173 = vrot.lane.b32.xlu0 %v5442_v27, %s5240_s4  ;;  %v5242_v27 = vmov 1934713408  }
 0x101   : > { %v295_v32 = vunpack.c.l.s4 %v5242_v27 }
 0x104   : > { %1177 = vrot.lane.b32.xlu1 %v5473_v41, %s5240_s4  ;;  %1163 = vrot.lane.b32.xlu0 %v5531_v1, %s5240_s4  ;;  %v296_v41 = vunpack.c.0.s8 %v295_v32 }
 0x106   : > { %v5721_v12 = vsub.s32 %v296_v41, %v5434_v23 }
 0x108   : > { %1167 = vrot.lane.b32.xlu1 %v5542_v4, %s5240_s4  ;;  %1171 = vrot.lane.b32.xlu0 %v5501_v53, %s5240_s4  ;;  %8348 = vst [vmem:[#allocation17_spill] sm:$0xff] %v5721_v12 }
 0x10c   : > { %1175 = vrot.lane.b32.xlu1 %v5515_v58, %s5240_s4  ;;  %2077 = vrot.lane.b32.xlu0 %v5467_v38, %s5241_s6  ;;  %s5255_s4 = smov 116  }
 0x110   : > { %2081 = vrot.lane.b32.xlu1 %v5489_v47, %s5241_s6  ;;  %2085 = vrot.lane.b32.xlu0 %v5456_v33, %s5241_s6 }
 0x114   : > { %2089 = vrot.lane.b32.xlu1 %v5491_v48, %s5241_s6  ;;  %2075 = vrot.lane.b32.xlu0 %v5548_v7, %s5241_s6 }
 0x118   : > { %2079 = vrot.lane.b32.xlu1 %v5556_v11, %s5241_s6  ;;  %2083 = vrot.lane.b32.xlu0 %v5517_v59, %s5241_s6 }
 0x11c   : > { %2087 = vrot.lane.b32.xlu1 %v5533_v2, %s5241_s6 }
 0x12e   : > { %v484_v26 = vpop.permute.xlu0 %483  ;;  %v488_v37 = vpop.permute.xlu1 %487 }
 0x132   : > { %v492_v39 = vpop.permute.xlu0 %491 }
 0x133   : > { %v573_v40 = vcombine.low %v484_v26, %v492_v39  ;;  %v574_v29 = vcombine.high %v484_v26, %v492_v39 }
 0x135   : > { %v5715_v1 = vrot.slane %v573_v40, %v5463_v36  ;;  %v5734_v40 = vrot.slane %v1050_v34, %v5721_v12  ;;  %v5764_v26 = vrot.slane %v574_v29, %v5463_v36 }
 0x136   : > { %v496_v46 = vpop.permute.xlu1 %495  ;;  %v482_v53 = vpop.permute.xlu0 %481 }
 0x137   : > { %v589_v58 = vcombine.low %v488_v37, %v496_v46  ;;  %8350 = vst [vmem:[#allocation19_spill] sm:$0xff] %v5734_v40 }
 0x139   : > { %v5718_v4 = vrot.slane %v589_v58, %v5463_v36 }
 0x13a   : > { %v486_v16 = vpop.permute.xlu1 %485  ;;  %v490_v17 = vpop.permute.xlu0 %489 }
 0x13b   : > { %v606_v32 = vcombine.high %v5715_v1, %v5718_v4  ;;  %v505_v45 = vcombine.low %v482_v53, %v490_v17  ;;  %v506_v49 = vcombine.high %v482_v53, %v490_v17 }
 0x13d   : > { %v5728_v8 = vrot.slane %v606_v32, %v5721_v12  ;;  %v5739_v25 = vrot.slane %v505_v45, %v5463_v36  ;;  %v590_v32 = vcombine.high %v488_v37, %v496_v46 }
 0x13e   : > { %v494_v41 = vpop.permute.xlu1 %493  ;;  %v714_v58 = vpop.permute.xlu0 %713 }
 0x13f   : > { %8349 = vst [vmem:[#allocation18_spill] sm:$0xff] %v5728_v8  ;;  %v521_v24 = vcombine.low %v486_v16, %v494_v41  ;;  %v4831_v10 = vpack.i.bf16 %v5734_v40, %v5728_v8 }
 0x141   : > { %v5742_v20 = vrot.slane %v521_v24, %v5463_v36  ;;  %4832 = vrot.lane.b32.xlu0 %v4831_v10, %s5243_s7  ;;  %v5756_v24 = vrot.slane %v982_v42, %v5721_v12  ;;  %v5759_v10 = vrot.slane %v590_v32, %v5463_v36  ;;  %v522_v32 = vcombine.high %v486_v16, %v494_v41 }
 0x142   : > { %v718_v27 = vpop.permute.xlu1 %717  ;;  %v722_v0 = vpop.permute.xlu0 %721 }
 0x143   : > { %v538_v9 = vcombine.high %v5739_v25, %v5742_v20  ;;  %v803_v21 = vcombine.low %v714_v58, %v722_v0  ;;  %v621_v42 = vcombine.low %v5764_v26, %v5759_v10  ;;  %v536_v16 = vrot.slane %v522_v32, %v5463_v36 }
 0x145   : > { %v5750_v45 = vrot.slane %v538_v9, %v5721_v12  ;;  %v5767_v9 = vrot.slane %v803_v21, %v5463_v36  ;;  %v5790_v50 = vrot.slane %v621_v42, %v5721_v12 }
 0x146   : > { %v726_v37 = vpop.permute.xlu1 %725  ;;  %v712_v46 = vpop.permute.xlu0 %711 }
 0x147   : > { %v819_v34 = vcombine.low %v718_v27, %v726_v37  ;;  %v4836_v6 = vpack.i.bf16 %v5756_v24, %v5750_v45  ;;  %8351 = vst [vmem:[#allocation20_spill] sm:$0xff] %v5767_v9  ;;  %8355 = vst [vmem:[#allocation24_spill] sm:$0xff] %v5790_v50  ;;  %v820_v40 = vcombine.high %v718_v27, %v726_v37 }
 0x149   : > { %v5770_v39 = vrot.slane %v819_v34, %v5463_v36  ;;  %4837 = vrot.lane.b32.xlu0 %v4836_v6, %s5243_s7  ;;  %v5783_v6 = vrot.slane %v361_v43, %v5721_v12  ;;  %v804_v43 = vcombine.high %v714_v58, %v722_v0 }
 0x14a   : > { %v716_v5 = vpop.permute.xlu1 %715  ;;  %v720_v52 = vpop.permute.xlu0 %719 }
 0x14b   : > { %8352 = vst [vmem:[#allocation21_spill] sm:$0xff] %v5770_v39  ;;  %v836_v29 = vcombine.high %v5767_v9, %v5770_v39  ;;  %v735_v21 = vcombine.low %v712_v46, %v720_v52  ;;  %v736_v44 = vcombine.high %v712_v46, %v720_v52  ;;  %8353 = vst [vmem:[#allocation22_spill] sm:$0xff] %v5783_v6 }
 0x14c   : > { %v520_v46 = vrot.slane %v506_v49, %v5463_v36 }
 0x14d   : > { %v5786_v34 = vrot.slane %v836_v29, %v5721_v12  ;;  %v8356_v29 = vcombine.low %v5567_v15, %v5540_v3  ;;  %v5802_v32 = vrot.slane %v735_v21, %v5463_v36  ;;  %v5805_v42 = vrot.slane %v736_v44, %v5463_v36 }
 0x14e   : > { %v724_v41 = vpop.permute.xlu1 %723  ;;  %v1396_v23 = vpop.permute.xlu0 %1395  ;;  %v553_v0 = vcombine.low %v520_v46, %v536_v16  ;;  %v554_v49 = vcombine.high %v520_v46, %v536_v16  ;;  %v834_v21 = vrot.slane %v820_v40, %v5463_v36  ;;  %v8358_v16 = vcombine.low %v5510_v56, %v5564_v14 }
 0x14f   : > { %8354 = vst [vmem:[#allocation23_spill] sm:$0xff] %v5786_v34  ;;  %v751_v17 = vcombine.low %v716_v5, %v724_v41  ;;  %v752_v53 = vcombine.high %v716_v5, %v724_v41  ;;  %v4841_v52 = vpack.i.bf16 %v5786_v34, %v5783_v6  ;;  %v5799_v8 = vrot.slane %v8356_v29, %v5721_v12 }
 0x151   : > { %8357 = vst [vmem:[#allocation25_spill] sm:$0xff] %v5799_v8  ;;  %v5808_v5 = vrot.slane %v751_v17, %v5463_v36  ;;  %v766_v27 = vrot.slane %v752_v53, %v5463_v36  ;;  %4842 = vrot.lane.b32.xlu1 %v4841_v52, %s5243_s7  ;;  %v4846_v41 = vpack.i.bf16 %v5799_v8, %v5790_v50 }
 0x152   : > { %v1400_v58 = vpop.permute.xlu1 %1399  ;;  %v1404_v37 = vpop.permute.xlu0 %1403  ;;  %v818_v53 = vrot.slane %v804_v43, %v5463_v36  ;;  %v5826_v52 = vrot.slane %v8358_v16, %v5721_v12  ;;  %v8361_v43 = vcombine.high %v5507_v55, %v5561_v13  ;;  %v5844_v16 = vrot.slane %v553_v0, %v5721_v12 }
 0x153   : > { %v768_v17 = vcombine.high %v5802_v32, %v5808_v5  ;;  %v783_v29 = vcombine.low %v5805_v42, %v766_v27  ;;  %v1485_v54 = vcombine.low %v1396_v23, %v1404_v37  ;;  %v1486_v39 = vcombine.high %v1396_v23, %v1404_v37 }
 0x154   : > { %8359 = vst [vmem:[#allocation26_spill] sm:$0xff] %v5826_v52  ;;  %v5838_v50 = vrot.slane %v8361_v43, %v5721_v12  ;;  %8364 = vst [vmem:[#allocation30_spill] sm:$0xff] %v5844_v16  ;;  %v852_v6 = vcombine.high %v818_v53, %v834_v21  ;;  %v851_v60 = vcombine.low %v818_v53, %v834_v21 }
 0x155   : > { %4847 = vrot.lane.b32.xlu1 %v4846_v41, %s5244_s8  ;;  %v5829_v40 = vrot.slane %v783_v29, %v5721_v12  ;;  %v5832_v46 = vrot.slane %v768_v17, %v5721_v12  ;;  %v5841_v41 = vrot.slane %v554_v49, %v5721_v12  ;;  %v8365_v49 = vcombine.high %v5596_v35, %v5581_v28 }
 0x156   : > { %v1408_v44 = vpop.permute.xlu1 %1407  ;;  %v1848_v8 = vpop.permute.xlu0 %1847  ;;  %8362 = vst [vmem:[#allocation28_spill] sm:$0xff] %v5838_v50  ;;  %v8367_v37 = vcombine.low %v5596_v35, %v5581_v28  ;;  %v622_v53 = vcombine.high %v5764_v26, %v5759_v10  ;;  %v5883_v35 = vrot.slane %v851_v60, %v5721_v12 }
 0x157   : > { %8360 = vst [vmem:[#allocation27_spill] sm:$0xff] %v5832_v46  ;;  %8363 = vst [vmem:[#allocation29_spill] sm:$0xff] %v5841_v41  ;;  %v1501_v29 = vcombine.low %v1400_v58, %v1408_v44  ;;  %v1502_v34 = vcombine.high %v1400_v58, %v1408_v44  ;;  %v4876_v17 = vpack.i.bf16 %v5829_v40, %v5826_v52 }
 0x158   : > { %v4851_v9 = vpack.i.bf16 %v5832_v46, %v5838_v50  ;;  %v5855_v0 = vrot.slane %v8365_v49, %v5721_v12  ;;  %v5866_v44 = vrot.slane %v8367_v37, %v5721_v12  ;;  %v1500_v49 = vrot.slane %v1486_v39, %v5463_v36 }
 0x159   : > { %4877 = vrot.lane.b32.xlu1 %v4876_v17, %s5244_s8  ;;  %v5858_v43 = vrot.slane %v1501_v29, %v5463_v36  ;;  %v1516_v58 = vrot.slane %v1502_v34, %v5463_v36  ;;  %v784_v17 = vcombine.high %v5805_v42, %v766_v27  ;;  %v5874_v34 = vrot.slane %v852_v6, %v5721_v12 }
 0x15a   : > { %8366 = vst [vmem:[#allocation31_spill] sm:$0xff] %v5855_v0  ;;  %4852 = vrot.lane.b32.xlu0 %v4851_v9, %s5243_s7  ;;  %v1852_v21 = vpop.permute.xlu1 %1851  ;;  %v1856_v23 = vpop.permute.xlu0 %1855  ;;  %8368 = vst [vmem:[#allocation32_spill] sm:$0xff] %v5866_v44  ;;  %v4881_v29 = vpack.i.bf16 %v5855_v0, %v5841_v41  ;;  %v5877_v9 = vrot.slane %v1485_v54, %v5463_v36  ;;  %v4856_v28 = vpack.i.bf16 %v5866_v44, %v5844_v16 }
 0x15b   : > { %8369 = vst [vmem:[#allocation33_spill] sm:$0xff] %v5874_v34  ;;  %v1937_v10 = vcombine.low %v1848_v8, %v1856_v23  ;;  %v1938_v26 = vcombine.high %v1848_v8, %v1856_v23  ;;  %v8370_v6 = vcombine.high %v5614_v51, %v5572_v18  ;;  %v1533_v39 = vcombine.low %v1500_v49, %v1516_v58 }
 0x15c   : > { %v1518_v54 = vcombine.high %v5877_v9, %v5858_v43  ;;  %v8372_v8 = vcombine.low %v5614_v51, %v5572_v18  ;;  %v5904_v44 = vrot.slane %v784_v17, %v5721_v12  ;;  %v1534_v16 = vcombine.high %v1500_v49, %v1516_v58 }
 0x15d   : > { %4882 = vrot.lane.b32.xlu1 %v4881_v29, %s5245_s17  ;;  %v5890_v42 = vrot.slane %v8370_v6, %v5721_v12  ;;  %v8374_v50 = vcombine.high %v5510_v56, %v5564_v14  ;;  %v5915_v18 = vrot.slane %v622_v53, %v5721_v12  ;;  %v5918_v51 = vrot.slane %v1937_v10, %v5463_v36 }
 0x15e   : > { %4857 = vrot.lane.b32.xlu0 %v4856_v28, %s5244_s8  ;;  %v1860_v27 = vpop.permute.xlu1 %1859  ;;  %v1394_v60 = vpop.permute.xlu0 %1393  ;;  %v5899_v23 = vrot.slane %v8372_v8, %v5721_v12  ;;  %8373 = vst [vmem:[#allocation35_spill] sm:$0xff] %v5904_v44  ;;  %v1532_v49 = vrot.slane %v1518_v54, %v5721_v12  ;;  %v5935_v10 = vrot.slane %v1533_v39, %v5721_v12 }
 0x15f   : > { %8371 = vst [vmem:[#allocation34_spill] sm:$0xff] %v5890_v42  ;;  %v1953_v37 = vcombine.low %v1852_v21, %v1860_v27  ;;  %v1954_v29 = vcombine.high %v1852_v21, %v1860_v27  ;;  %v4891_v6 = vpack.i.bf16 %v5874_v34, %v5890_v42  ;;  %v5912_v46 = vrot.slane %v8374_v50, %v5721_v12 }
 0x160   : > { %v4861_v28 = vpack.i.bf16 %v5883_v35, %v5899_v23  ;;  %v1952_v21 = vrot.slane %v1938_v26, %v5463_v36  ;;  %v8376_v50 = vcombine.high %v5567_v15, %v5540_v3  ;;  %v5944_v3 = vrot.slane %v1534_v16, %v5721_v12 }
 0x161   : > { %8375 = vst [vmem:[#allocation36_spill] sm:$0xff] %v5912_v46  ;;  %v5922_v17 = vrot.slane %v1953_v37, %v5463_v36  ;;  %v1968_v58 = vrot.slane %v1954_v29, %v5463_v36  ;;  %4892 = vrot.lane.b32.xlu1 %v4891_v6, %s5245_s17  ;;  %v4906_v37 = vpack.i.bf16 %v5904_v44, %v5912_v46 }
 0x162   : > { %4862 = vrot.lane.b32.xlu0 %v4861_v28, %s5244_s8  ;;  %v1398_v56 = vpop.permute.xlu1 %1397  ;;  %v1402_v14 = vpop.permute.xlu0 %1401  ;;  %v5931_v53 = vrot.slane %v8376_v50, %v5721_v12  ;;  %v1700_v0 = vcombine.high %v5467_v38, %v5456_v33 }
 0x163   : > { %v1970_v26 = vcombine.high %v5918_v51, %v5922_v17  ;;  %v1985_v27 = vcombine.low %v1952_v21, %v1968_v58  ;;  %v1986_v8 = vcombine.high %v1952_v21, %v1968_v58  ;;  %v1417_v15 = vcombine.low %v1394_v60, %v1402_v14 }
 0x164   : > { %v4866_v29 = vpack.i.bf16 %v5931_v53, %v5915_v18  ;;  %v8377_v58 = vmov 0.0   ;;  %v1418_v44 = vcombine.high %v1394_v60, %v1402_v14 }
 0x165   : > { %4907 = vrot.lane.b32.xlu1 %v4906_v37, %s5245_s17  ;;  %v1984_v54 = vrot.slane %v1970_v26, %v5721_v12  ;;  %v5949_v39 = vrot.slane %v1985_v27, %v5721_v12  ;;  %v5952_v6 = vrot.slane %v1986_v8, %v5721_v12  ;;  %v5956_v50 = vcombine.high %v1532_v49, %v8377_v58 }
 0x166   : > { %4867 = vrot.lane.b32.xlu0 %v4866_v29, %s5245_s17  ;;  %v1406_v28 = vpop.permute.xlu1 %1405  ;;  %v1846_v21 = vpop.permute.xlu0 %1845  ;;  %v5960_v16 = vcombine.high %v5935_v10, %v8377_v58  ;;  %v5971_v29 = vcombine.high %v5944_v3, %v8377_v58  ;;  %v5978_v34 = vrot.slane %v1417_v15, %v5463_v36 }
 0x167   : > { %8378 = vst [vmem:[#allocation37_spill] sm:$0xff] %v5956_v50  ;;  %v1433_v37 = vcombine.low %v1398_v56, %v1406_v28  ;;  %v1434_v46 = vcombine.high %v1398_v56, %v1406_v28  ;;  %v4871_v26 = vpack.i.bf16 %v1984_v54, %v1532_v49  ;;  %v5963_v27 = vcombine.high %v1984_v54, %v8377_v58 }
 0x168   : > { %8379 = vst [vmem:[#allocation38_spill] sm:$0xff] %v5960_v16  ;;  %v5967_v8 = vcombine.high %v5949_v39, %v8377_v58  ;;  %8382 = vst [vmem:[#allocation41_spill] sm:$0xff] %v5971_v29  ;;  %v5975_v42 = vcombine.high %v5952_v6, %v8377_v58 }
 0x169   : > { %8380 = vst [vmem:[#allocation39_spill] sm:$0xff] %v5963_v27  ;;  %8384 = vst [vmem:[#allocation43_spill] sm:$0xff] %v5978_v34  ;;  %v5981_v56 = vrot.slane %v1433_v37, %v5463_v36  ;;  %v1448_v14 = vrot.slane %v1434_v46, %v5463_v36  ;;  %v1432_v37 = vrot.slane %v1418_v44, %v5463_v36 }
 0x16a   : > { %8381 = vst [vmem:[#allocation40_spill] sm:$0xff] %v5967_v8  ;;  %8383 = vst [vmem:[#allocation42_spill] sm:$0xff] %v5975_v42  ;;  %4872 = vrot.lane.b32.xlu0 %v4871_v26, %s5243_s7  ;;  %v1850_v49 = vpop.permute.xlu1 %1849  ;;  %v1854_v54 = vpop.permute.xlu0 %1853  ;;  %v1716_v46 = vcombine.high %v5489_v47, %v5491_v48 }
 0x16b   : > { %8385 = vst [vmem:[#allocation44_spill] sm:$0xff] %v5981_v56  ;;  %v1869_v41 = vcombine.low %v1846_v21, %v1854_v54  ;;  %v1870_v52 = vcombine.high %v1846_v21, %v1854_v54  ;;  %v1450_v26 = vcombine.high %v5978_v34, %v5981_v56  ;;  %v1465_v60 = vcombine.low %v1432_v37, %v1448_v14 }
 0x16c   : > { %v1466_v29 = vcombine.high %v1432_v37, %v1448_v14  ;;  %v6009_v48 = vrot.slane %v1716_v46, %v5463_v36 }
 0x16d   : > { %v6001_v15 = vrot.slane %v1869_v41, %v5463_v36  ;;  %v1884_v44 = vrot.slane %v1870_v52, %v5463_v36  ;;  %v6013_v33 = vrot.slane %v1465_v60, %v5721_v12 }
 0x16e   : > { %v1858_v50 = vpop.permute.xlu1 %1857  ;;  %v1166_v27 = vpop.permute.xlu0 %1165 }
 0x16f   : > { %v1885_v28 = vcombine.low %v1850_v49, %v1858_v50  ;;  %v1886_v16 = vcombine.high %v1850_v49, %v1858_v50  ;;  %8386 = vst [vmem:[#allocation45_spill] sm:$0xff] %v6001_v15  ;;  %v1464_v50 = vrot.slane %v1450_v26, %v5721_v12 }
 0x171   : > { %v6005_v21 = vrot.slane %v1885_v28, %v5463_v36  ;;  %v1900_v47 = vrot.slane %v1886_v16, %v5463_v36  ;;  %v6020_v16 = vrot.slane %v1700_v0, %v5463_v36  ;;  %v6023_v28 = vrot.slane %v1466_v29, %v5721_v12 }
 0x172   : > { %v1170_v54 = vpop.permute.xlu1 %1169  ;;  %v1174_v42 = vpop.permute.xlu0 %1173  ;;  %v1732_v0 = vcombine.high %v5526_v62, %v5529_v63  ;;  %v6039_v29 = vcombine.high %v6013_v33, %v8377_v58 }
 0x173   : > { %8387 = vst [vmem:[#allocation46_spill] sm:$0xff] %v6005_v21  ;;  %v1902_v52 = vcombine.high %v6001_v15, %v6005_v21  ;;  %v1917_v41 = vcombine.low %v1884_v44, %v1900_v47  ;;  %v1918_v14 = vcombine.high %v1884_v44, %v1900_v47  ;;  %v1255_v49 = vcombine.low %v1166_v27, %v1174_v42 }
 0x174   : > { %v1256_v37 = vcombine.high %v1166_v27, %v1174_v42  ;;  %v6033_v44 = vcombine.high %v1464_v50, %v8377_v58  ;;  %8389 = vst [vmem:[#allocation48_spill] sm:$0xff] %v6039_v29  ;;  %v1748_v42 = vcombine.high %v6020_v16, %v6009_v48  ;;  %v6055_v63 = vcombine.high %v6023_v28, %v8377_v58 }
 0x175   : > { %v1916_v46 = vrot.slane %v1902_v52, %v5721_v12  ;;  %v6027_v60 = vrot.slane %v1917_v41, %v5721_v12  ;;  %v6030_v26 = vrot.slane %v1918_v14, %v5721_v12  ;;  %v6047_v14 = vrot.slane %v1255_v49, %v5463_v36 }
 0x176   : > { %v1178_v38 = vpop.permute.xlu1 %1177  ;;  %v1164_v8 = vpop.permute.xlu0 %1163  ;;  %8388 = vst [vmem:[#allocation47_spill] sm:$0xff] %v6033_v44  ;;  %8393 = vst [vmem:[#allocation52_spill] sm:$0xff] %v6055_v63  ;;  %v1746_v15 = vrot.slane %v1732_v0, %v5721_v12  ;;  %v6089_v0 = vrot.slane %v1748_v42, %v5721_v12 }
 0x177   : > { %v1271_v27 = vcombine.low %v1170_v54, %v1178_v38  ;;  %v1272_v47 = vcombine.high %v1170_v54, %v1178_v38  ;;  %v4886_v52 = vpack.i.bf16 %v1916_v46, %v1464_v50  ;;  %v6044_v41 = vcombine.high %v1916_v46, %v8377_v58  ;;  %8391 = vst [vmem:[#allocation50_spill] sm:$0xff] %v6047_v14 }
 0x178   : > { %v6051_v56 = vcombine.high %v6027_v60, %v8377_v58  ;;  %v6059_v62 = vcombine.high %v6030_v26, %v8377_v58  ;;  %v6062_v54 = vrot.slane %v1256_v37, %v5463_v36  ;;  %v1648_v46 = vcombine.high %v5556_v11, %v5533_v2 }
 0x179   : > { %8390 = vst [vmem:[#allocation49_spill] sm:$0xff] %v6044_v41  ;;  %v6065_v50 = vrot.slane %v1271_v27, %v5463_v36  ;;  %v6068_v38 = vrot.slane %v1272_v47, %v5463_v36  ;;  %4887 = vrot.lane.b32.xlu0 %v4886_v52, %s5243_s7  ;;  %v1632_v2 = vcombine.high %v5548_v7, %v5517_v59 }
 0x17a   : > { %8392 = vst [vmem:[#allocation51_spill] sm:$0xff] %v6051_v56  ;;  %8394 = vst [vmem:[#allocation53_spill] sm:$0xff] %v6059_v62  ;;  %v1168_v34 = vpop.permute.xlu1 %1167  ;;  %v1172_v21 = vpop.permute.xlu0 %1171  ;;  %v6096_v47 = vrot.slane %v1648_v46, %v5463_v36  ;;  %v6099_v62 = vcombine.high %v1746_v15, %v8377_v58  ;;  %v1664_v59 = vcombine.high %v5588_v30, %v5591_v31 }
 0x17b   : > { %8395 = vst [vmem:[#allocation54_spill] sm:$0xff] %v6065_v50  ;;  %v1288_v52 = vcombine.high %v6047_v14, %v6065_v50  ;;  %v1304_v49 = vcombine.high %v6062_v54, %v6068_v38  ;;  %v1187_v11 = vcombine.low %v1164_v8, %v1172_v21  ;;  %v1188_v37 = vcombine.high %v1164_v8, %v1172_v21 }
 0x17c   : > { %v6107_v21 = vrot.slane %v1632_v2, %v5463_v36  ;;  %v6114_v46 = vcombine.high %v6089_v0, %v8377_v58  ;;  %v1678_v56 = vrot.slane %v1664_v59, %v5721_v12 }
 0x17d   : > { %v1302_v44 = vrot.slane %v1288_v52, %v5721_v12  ;;  %v6093_v27 = vrot.slane %v1304_v49, %v5721_v12  ;;  %v6110_v49 = vrot.slane %v1187_v11, %v5463_v36 }
 0x17e   : > { %v1176_v41 = vpop.permute.xlu1 %1175  ;;  %v2078_v63 = vpop.permute.xlu0 %2077  ;;  %8397 = vst [vmem:[#allocation56_spill] sm:$0xff] %v6114_v46  ;;  %v1679_v31 = vcombine.low %v6107_v21, %v6096_v47 }
 0x17f   : > { %v1203_v7 = vcombine.low %v1168_v34, %v1176_v41  ;;  %v1204_v42 = vcombine.high %v1168_v34, %v1176_v41  ;;  %v4896_v29 = vpack.i.bf16 %v1746_v15, %v1302_v44  ;;  %v6104_v8 = vcombine.high %v1302_v44, %v8377_v58  ;;  %8396 = vst [vmem:[#allocation55_spill] sm:$0xff] %v6110_v49 }
 0x180   : > { %v6118_v52 = vcombine.high %v6093_v27, %v8377_v58  ;;  %v6121_v34 = vrot.slane %v1188_v37, %v5463_v36  ;;  %v4901_v41 = vpack.i.bf16 %v5949_v39, %v5935_v10  ;;  %v6156_v46 = vrot.slane %v1679_v31, %v5721_v12 }
 0x181   : > { %v6124_v15 = vrot.slane %v1203_v7, %v5463_v36  ;;  %v6127_v44 = vrot.slane %v1204_v42, %v5463_v36  ;;  %4897 = vrot.lane.b32.xlu0 %v4896_v29, %s5243_s7  ;;  %v6153_v7 = vcombine.high %v1678_v56, %v8377_v58  ;;  %v1303_v10 = vcombine.low %v6062_v54, %v6068_v38 }
 0x182   : > { %8398 = vst [vmem:[#allocation57_spill] sm:$0xff] %v6118_v52  ;;  %v2082_v2 = vpop.permute.xlu1 %2081  ;;  %v2086_v11 = vpop.permute.xlu0 %2085  ;;  %v1747_v31 = vcombine.low %v6020_v16, %v6009_v48  ;;  %v4936_v48 = vpack.i.bf16 %v6030_v26, %v6023_v28 }
 0x183   : > { %8399 = vst [vmem:[#allocation58_spill] sm:$0xff] %v6124_v15  ;;  %v1220_v42 = vcombine.high %v6110_v49, %v6124_v15  ;;  %v1235_v29 = vcombine.low %v6121_v34, %v6127_v44  ;;  %v2167_v30 = vcombine.low %v2078_v63, %v2086_v11  ;;  %v2168_v54 = vcombine.high %v2078_v63, %v2086_v11 }
 0x184   : > { %v6192_v11 = vrot.slane %v1747_v31, %v5721_v12  ;;  %v1236_v31 = vcombine.high %v6121_v34, %v6127_v44  ;;  %v1680_v34 = vcombine.high %v6107_v21, %v6096_v47  ;;  %v8402_v21 = vcombine.low %v5802_v32, %v5808_v5 }
 0x185   : > { %4902 = vrot.lane.b32.xlu0 %v4901_v41, %s5244_s8  ;;  %v1234_v59 = vrot.slane %v1220_v42, %v5721_v12  ;;  %v6148_v50 = vrot.slane %v1235_v29, %v5721_v12  ;;  %v6166_v49 = vrot.slane %v2167_v30, %v5463_v36 }
 0x186   : > { %v2090_v37 = vpop.permute.xlu1 %2089  ;;  %v6150_v52 = vpop.permute.xlu0 %2075 }
 0x187   : > { %v2183_v39 = vcombine.low %v2082_v2, %v2090_v37  ;;  %v4911_v15 = vpack.i.bf16 %v1678_v56, %v1234_v59  ;;  %v6161_v41 = vcombine.high %v1234_v59, %v8377_v58  ;;  %v2184_v42 = vcombine.high %v2082_v2, %v2090_v37 }
 0x188   : > { %v4931_v29 = vpack.i.bf16 %v6156_v46, %v6148_v50  ;;  %v4916_v37 = vpack.i.bf16 %v6027_v60, %v6013_v33  ;;  %v6182_v59 = vrot.slane %v1303_v10, %v5721_v12  ;;  %v2182_v33 = vrot.slane %v2168_v54, %v5463_v36 }
 0x189   : > { %v6169_v14 = vrot.slane %v2183_v39, %v5463_v36  ;;  %4912 = vrot.lane.b32.xlu1 %v4911_v15, %s5243_s7  ;;  %v5071_v56 = vpack.i.bf16 %v6153_v7, %v6161_v41  ;;  %v2198_v15 = vrot.slane %v2184_v42, %v5463_v36  ;;  %v1697_v41 = vcombine.high %v6156_v46, %v8377_v58 }
 0x18a   : > { %4932 = vrot.lane.b32.xlu0 %v4931_v29, %s5244_s8  ;;  %v2080_v38 = vpop.permute.xlu1 %2079  ;;  %v2084_v2 = vpop.permute.xlu0 %2083  ;;  %v4921_v39 = vpack.i.bf16 %v6192_v11, %v6182_v59 }
 0x18b   : > { %v2199_v30 = vcombine.low %v6166_v49, %v6169_v14  ;;  %v2200_v63 = vcombine.high %v6166_v49, %v6169_v14  ;;  %v2099_v16 = vcombine.low %v6150_v52, %v2084_v2  ;;  %v2215_v26 = vcombine.low %v2182_v33, %v2198_v15 }
 0x18c   : > { %v1321_v14 = vcombine.high %v6182_v59, %v8377_v58 }
 0x18d   : > { %4917 = vrot.lane.b32.xlu1 %v4916_v37, %s5244_s8  ;;  %v6199_v28 = vrot.slane %v2200_v63, %v5721_v12  ;;  %v6202_v42 = vrot.slane %v2099_v16, %v5463_v36  ;;  %v4926_v37 = vpack.i.bf16 %v5952_v6, %v5944_v3  ;;  %v2216_v63 = vcombine.high %v2182_v33, %v2198_v15 }
 0x18e   : > { %4937 = vrot.lane.b32.xlu0 %v4936_v48, %s5245_s17  ;;  %v2088_v60 = vpop.permute.xlu1 %2087  ;;  %v6217_v48 = vrot.slane %v2215_v26, %v5721_v12  ;;  %v8400_v16 = vcombine.low %v5715_v1, %v5718_v4  ;;  %v8401_v3 = vcombine.low %v5513_v57, %v5523_v61  ;;  %v4941_v1 = vpack.i.bf16 %v6089_v0, %v6093_v27 }
 0x18f   : > { %v2115_v10 = vcombine.low %v2080_v38, %v2088_v60  ;;  %v2116_v44 = vcombine.high %v2080_v38, %v2088_v60  ;;  %v6239_v4 = vrot.slane %v1236_v31, %v5721_v12  ;;  %v6242_v15 = vrot.slane %v2216_v63, %v5721_v12 }
 0x190   : > { %v6234_v6 = vrot.slane %v8401_v3, %v5721_v12  ;;  %v6250_v57 = vrot.slane %v8402_v21, %v5721_v12  ;;  %v2100_v61 = vcombine.high %v6150_v52, %v2084_v2  ;;  %v6255_v27 = vrot.slane %v1680_v34, %v5721_v12 }
 0x191   : > { %v6205_v29 = vrot.slane %v2115_v10, %v5463_v36  ;;  %4922 = vrot.lane.b32.xlu1 %v4921_v39, %s5244_s8  ;;  %v6223_v10 = vrot.slane %v8400_v16, %v5721_v12  ;;  %v8403_v38 = vcombine.low %v5507_v55, %v5561_v13  ;;  %v2130_v5 = vrot.slane %v2116_v44, %v5463_v36 }
 0x192   : > { %2268 = vrot.lane.b32.xlu0 %v6199_v28, %s5243_s7  ;;  %v1081_v0 = vcombine.high %v6234_v6, %v8377_v58  ;;  %v4946_v52 = vpack.i.bf16 %v6255_v27, %v6239_v4  ;;  %v1969_v33 = vcombine.low %v5918_v51, %v5922_v17  ;;  %v799_v39 = vcombine.high %v6250_v57, %v8377_v58 }
 0x193   : > { %v2131_v54 = vcombine.low %v6202_v42, %v6205_v29  ;;  %v637_v47 = vcombine.high %v6223_v10, %v8377_v58  ;;  %v6265_v32 = vrot.slane %v8403_v38, %v5721_v12  ;;  %v2132_v2 = vcombine.high %v6202_v42, %v6205_v29  ;;  %v2339_v42 = vld [vmem:[%s8246_s2] sm:$0xff] }
 0x194   : > { %v2114_v26 = vrot.slane %v2100_v61, %v5463_v36  ;;  %v1517_v55 = vcombine.low %v5877_v9, %v5858_v43  ;;  %v6289_v63 = vrot.slane %v1969_v33, %v5721_v12  ;;  %v1014_v43 = vcombine.high %v5756_v24, %v8377_v58  ;;  %v8406_v61 = vld [vmem:[#allocation20_spill] sm:$0xff] }
 0x195   : > { %4927 = vrot.lane.b32.xlu1 %v4926_v37, %s5245_s17  ;;  %v4951_v60 = vpack.i.bf16 %v1081_v0, %v637_v47  ;;  %v324_v13 = vcombine.high %v6265_v32, %v8377_v58  ;;  %v6284_v31 = vrot.slane %v2132_v2, %v5721_v12  ;;  %v570_v37 = vcombine.high %v5750_v45, %v8377_v58  ;;  %v8407_v0 = vld [vmem:[#allocation21_spill] sm:$0xff]  ;;  %v8409_v2 = vld [vmem:[#allocation11_spill] sm:$0xff]  ;;  %v8410_v33 = vld [vmem:[#allocation12_spill] sm:$0xff] }
 0x196   : > { %2276 = vrot.lane.b32.xlu0 %v6217_v48, %s5244_s8  ;;  %v2147_v51 = vcombine.low %v2114_v26, %v2130_v5  ;;  %v6297_v9 = vrot.slane %v1517_v55, %v5721_v12  ;;  %v2148_v34 = vcombine.high %v2114_v26, %v2130_v5  ;;  %v8404_v45 = vcombine.low %v5739_v25, %v5742_v20 }
 0x197   : > { %v4971_v17 = vpack.i.bf16 %v799_v39, %v324_v13  ;;  %v4976_v44 = vpack.i.bf16 %v1014_v43, %v570_v37  ;;  %v8405_v24 = vcombine.low %v5575_v19, %v5578_v22  ;;  %v8408_v38 = vcombine.low %v8406_v61, %v8407_v0  ;;  %v8412_v43 = vld [vmem:[#allocation18_spill] sm:$0xff]  ;;  %v8416_v0 = vld [vmem:[#allocation29_spill] sm:$0xff] }
 0x198   : > { %v6300_v16 = vrot.slane %v2147_v51, %v5721_v12  ;;  %v6306_v3 = vrot.slane %v8404_v45, %v5721_v12  ;;  %v1549_v20 = vcombine.high %v6297_v9, %v8377_v58  ;;  %v6322_v25 = vrot.slane %v2148_v34, %v5721_v12 }
 0x199   : > { %4942 = vrot.lane.b32.xlu1 %v4941_v1, %s5245_s17  ;;  %v2001_v1 = vcombine.high %v6289_v63, %v8377_v58  ;;  %v6316_v47 = vrot.slane %v8405_v24, %v5721_v12  ;;  %v6330_v5 = vrot.slane %v8408_v38, %v5721_v12  ;;  %v869_v22 = vcombine.high %v5883_v35, %v8377_v58  ;;  %v8414_v24 = vld [vmem:[#allocation26_spill] sm:$0xff] }
 0x19a   : > { %2284 = vrot.lane.b32.xlu0 %v6242_v15, %s5245_s17  ;;  %v569_v21 = vcombine.high %v6306_v3, %v8377_v58  ;;  %v394_v26 = vcombine.high %v5899_v23, %v8377_v58  ;;  %v640_v51 = vcombine.high %v5915_v18, %v8377_v58  ;;  %v1084_v37 = vcombine.high %v5931_v53, %v8377_v58  ;;  %v8413_v18 = vld [vmem:[#allocation19_spill] sm:$0xff] }
 0x19b   : > { %v4991_v19 = vpack.i.bf16 %v2001_v1, %v1549_v20  ;;  %v867_v35 = vcombine.high %v6330_v5, %v8377_v58  ;;  %v638_v34 = vcombine.high %v8412_v43, %v8377_v58  ;;  %v801_v45 = vcombine.high %v5829_v40, %v8377_v58 }
 0x19c   : > { %v5011_v13 = vpack.i.bf16 %v869_v22, %v394_v26  ;;  %v1082_v1 = vcombine.high %v8413_v18, %v8377_v58  ;;  %v326_v20 = vcombine.high %v8414_v24, %v8377_v58  ;;  %v572_v38 = vcombine.high %v8416_v0, %v8377_v58  ;;  %v8424_v18 = vld [vmem:[#allocation28_spill] sm:$0xff]  ;;  %v8425_v24 = vld [vmem:[#allocation30_spill] sm:$0xff] }
 0x19d   : > { %4947 = vrot.lane.b32.xlu1 %v4946_v52, %s5245_s17  ;;  %v1013_v52 = vcombine.high %v6316_v47, %v8377_v58  ;;  %v1254_v59 = vcombine.high %v6239_v4, %v8377_v58  ;;  %v2234_v4 = vcombine.high %v6242_v15, %v8377_v58  ;;  %v2164_v29 = vcombine.high %v6284_v31, %v8377_v58 }
 0x19e   : > { %4952 = vrot.lane.b32.xlu0 %v4951_v60, %s5246_s19  ;;  %v8411_v60 = vcombine.low %v8409_v2, %v8410_v33  ;;  %v4966_v53 = vpack.i.bf16 %v1082_v1, %v638_v34  ;;  %v5031_v40 = vpack.i.bf16 %v801_v45, %v326_v20  ;;  %v8423_v34 = vld [vmem:[#allocation27_spill] sm:$0xff]  ;;  %v325_v1 = vcombine.high %v8424_v18, %v8377_v58 }
 0x19f   : > { %v4956_v55 = vpack.i.bf16 %v1013_v52, %v569_v21  ;;  %v8415_v21 = vld [vmem:[#allocation23_spill] sm:$0xff]  ;;  %v800_v45 = vcombine.high %v8423_v34, %v8377_v58  ;;  %v571_v20 = vcombine.high %v8425_v24, %v8377_v58  ;;  %v8440_v34 = vld [vmem:[#allocation40_spill] sm:$0xff]  ;;  %v5250_v15 = vmov 0  }
 0x1a0   : > { %v6342_v39 = vrot.slane %v8411_v60, %v5721_v12  ;;  %v868_v61 = vcombine.high %v8415_v21, %v8377_v58  ;;  %v8418_v52 = vld [vmem:[#allocation31_spill] sm:$0xff]  ;;  %v8419_v60 = vld [vmem:[#allocation24_spill] sm:$0xff]  ;;  %v8427_v21 = vld [vmem:[#allocation46_spill] sm:$0xff]  ;;  %5111 = vset.pattern.permute.xlu0 %v5250_v15 }
 0x1a1   : > { %2240 = vrot.lane.b32.xlu1 %v6284_v31, %s5243_s7  ;;  %v1016_v2 = vcombine.high %v8418_v52, %v8377_v58  ;;  %v639_v26 = vcombine.high %v8419_v60, %v8377_v58  ;;  %v8431_v52 = vld [vmem:[#allocation44_spill] sm:$0xff]  ;;  %v8433_v60 = vpack.i.bf16 %v6099_v62, %v6104_v8 }
 0x1a2   : > { %4972 = vrot.lane.b32.xlu0 %v4971_v17, %s5246_s19  ;;  %v392_v17 = vcombine.high %v6342_v39, %v8377_v58 }
 0x1a4   : > { %v4961_v23 = vpack.i.bf16 %v867_v35, %v392_v17 }
 0x1a5   : > { %2248 = vrot.lane.b32.xlu1 %v6300_v16, %s5244_s8 }
 0x1a6   : > { %4977 = vrot.lane.b32.xlu0 %v4976_v44, %s5247_s20  ;;  %v5016_v44 = vpack.i.bf16 %v1084_v37, %v640_v51  ;;  %v8421_v51 = vld [vmem:[#allocation25_spill] sm:$0xff]  ;;  %v8422_v37 = vld [vmem:[#allocation34_spill] sm:$0xff] }
 0x1a7   : > { %v1083_v17 = vcombine.high %v8421_v51, %v8377_v58 }
 0x1a9   : > { %2256 = vrot.lane.b32.xlu1 %v6322_v25, %s5245_s17  ;;  %v4986_v43 = vpack.i.bf16 %v1083_v17, %v639_v26  ;;  %v8434_v26 = vld [vmem:[#allocation50_spill] sm:$0xff] }
 0x1aa   : > { %4992 = vrot.lane.b32.xlu0 %v4991_v19, %s5246_s19  ;;  %v8417_v19 = vld [vmem:[#allocation22_spill] sm:$0xff] }
 0x1ab   : > { %v393_v22 = vcombine.high %v8417_v19, %v8377_v58 }
 0x1ad   : > { %4957 = vrot.lane.b32.xlu1 %v4956_v55, %s5246_s19  ;;  %v4981_v33 = vpack.i.bf16 %v868_v61, %v393_v22  ;;  %v8420_v55 = vld [vmem:[#allocation33_spill] sm:$0xff]  ;;  %v8430_v22 = vld [vmem:[#allocation43_spill] sm:$0xff] }
 0x1ae   : > { %5012 = vrot.lane.b32.xlu0 %v5011_v13, %s5248_s22  ;;  %v870_v35 = vcombine.high %v8420_v55, %v8377_v58  ;;  %v5036_v13 = vpack.i.bf16 %v1016_v2, %v572_v38  ;;  %v4996_v38 = vpack.i.bf16 %v800_v45, %v325_v1  ;;  %v8432_v2 = vcombine.low %v8430_v22, %v8431_v52  ;;  %v8435_v55 = vld [vmem:[#allocation54_spill] sm:$0xff]  ;;  %v8446_v22 = vld [vmem:[#allocation15_spill] sm:$0xff]  ;;  %v8447_v52 = vld [vmem:[#allocation16_spill] sm:$0xff] }
 0x1af   : > { %v8441_v45 = vld [vmem:[#allocation38_spill] sm:$0xff] }
 0x1b1   : > { %4962 = vrot.lane.b32.xlu1 %v4961_v23, %s5246_s19  ;;  %v395_v23 = vcombine.high %v8422_v37, %v8377_v58 }
 0x1b2   : > { %5017 = vrot.lane.b32.xlu0 %v5016_v44, %s5249_s26 }
 0x1b3   : > { %v5051_v44 = vpack.i.bf16 %v870_v35, %v395_v23  ;;  %v8436_v35 = vcombine.low %v8434_v26, %v8435_v55  ;;  %v8437_v23 = vld [vmem:[#allocation13_spill] sm:$0xff] }
 0x1b5   : > { %4967 = vrot.lane.b32.xlu1 %v4966_v53, %s5247_s20  ;;  %v8426_v53 = vld [vmem:[#allocation45_spill] sm:$0xff] }
 0x1b6   : > { %5032 = vrot.lane.b32.xlu0 %v5031_v40, %s5248_s22  ;;  %v8428_v61 = vcombine.low %v8426_v53, %v8427_v21  ;;  %v8429_v40 = vld [vmem:[#allocation32_spill] sm:$0xff]  ;;  %v8444_v53 = vld [vmem:[#allocation58_spill] sm:$0xff] }
 0x1b7   : > { %v1015_v19 = vcombine.high %v8429_v40, %v8377_v58 }
 0x1b8   : > { %v6399_v0 = vrot.slane %v8428_v61, %v5721_v12 }
 0x1b9   : > { %4982 = vrot.lane.b32.xlu1 %v4981_v33, %s5247_s20  ;;  %v6407_v33 = vrot.slane %v8432_v2, %v5721_v12  ;;  %v5001_v51 = vpack.i.bf16 %v1015_v19, %v571_v20  ;;  %v8443_v20 = vld [vmem:[#allocation55_spill] sm:$0xff]  ;;  %v1253_v19 = vcombine.high %v6148_v50, %v8377_v58  ;;  %v8448_v2 = vcombine.low %v8446_v22, %v8447_v52  ;;  %v8465_v52 = vld [vmem:[#allocation56_spill] sm:$0xff] }
 0x1ba   : > { %5037 = vrot.lane.b32.xlu0 %v5036_v13, %s5249_s26  ;;  %v6418_v13 = vrot.slane %v8436_v35, %v5721_v12  ;;  %v1933_v17 = vcombine.high %v6399_v0, %v8377_v58  ;;  %v8445_v21 = vcombine.low %v8443_v20, %v8444_v53 }
 0x1bb   : > { %v1481_v37 = vcombine.high %v6407_v33, %v8377_v58  ;;  %v6459_v7 = vrot.slane %v8448_v2, %v5721_v12  ;;  %v5091_v35 = vpack.i.bf16 %v1697_v41, %v1253_v19  ;;  %v8463_v19 = vld [vmem:[#allocation47_spill] sm:$0xff]  ;;  %v8466_v2 = vld [vmem:[#allocation57_spill] sm:$0xff] }
 0x1bc   : > { %v1319_v1 = vcombine.high %v6418_v13, %v8377_v58  ;;  %v6448_v61 = vrot.slane %v8445_v21, %v5721_v12  ;;  %v8467_v41 = vpack.i.bf16 %v8465_v52, %v8466_v2 }
 0x1bd   : > { %4987 = vrot.lane.b32.xlu1 %v4986_v43, %s5248_s22  ;;  %v8438_v43 = vld [vmem:[#allocation14_spill] sm:$0xff]  ;;  %v5006_v18 = vpack.i.bf16 %v1933_v17, %v1481_v37  ;;  %8449 = vst [vmem:[#allocation20_spill] sm:$0xff] %v6459_v7  ;;  %v8454_v17 = vld [vmem:[#allocation37_spill] sm:$0xff] }
 0x1be   : > { %5052 = vrot.lane.b32.xlu0 %v5051_v44, %s5249_s26  ;;  %v8439_v62 = vcombine.low %v8437_v23, %v8438_v43  ;;  %v8442_v44 = vpack.i.bf16 %v8440_v34, %v8441_v45  ;;  %v1251_v50 = vcombine.high %v6448_v61, %v8377_v58  ;;  %v1695_v23 = vcombine.high %v6459_v7, %v8377_v58  ;;  %v8457_v34 = vld [vmem:[#allocation52_spill] sm:$0xff] }
 0x1c0   : > { %v6429_v8 = vrot.slane %v8439_v62, %v5721_v12  ;;  %v5041_v43 = vpack.i.bf16 %v1695_v23, %v1251_v50  ;;  %v8456_v62 = vld [vmem:[#allocation53_spill] sm:$0xff]  ;;  %v8468_v23 = vld [vmem:[#allocation42_spill] sm:$0xff] }
 0x1c1   : > { %4997 = vrot.lane.b32.xlu1 %v4996_v38, %s5247_s20  ;;  %v6450_v38 = vpop.permute.xlu0 %4832  ;;  %v8458_v45 = vpack.i.bf16 %v8456_v62, %v8457_v34 }
 0x1c2   : > { %5057 = vrot.lane.b32.xlu0 %v8433_v60, %s5247_s20  ;;  %v1763_v24 = vcombine.high %v6429_v8, %v8377_v58  ;;  %v8451_v60 = vld [vmem:[#allocation48_spill] sm:$0xff] }
 0x1c3   : > { %v6495_v53 = vpop.permute.xlu1 %4842 }
 0x1c4   : > { %v5021_v40 = vpack.i.bf16 %v1763_v24, %v1319_v1  ;;  %v6491_v1 = vrot.slane %v2199_v30, %v5721_v12  ;;  %v8461_v24 = vld [vmem:[#allocation36_spill] sm:$0xff]  ;;  %v4844_v15 = vunpack.i.l.bf16 %v6495_v53 }
 0x1c5   : > { %5002 = vrot.lane.b32.xlu1 %v5001_v51, %s5248_s22  ;;  %v6467_v55 = vpop.permute.xlu0 %4837  ;;  %v8453_v51 = vld [vmem:[#allocation39_spill] sm:$0xff]  ;;  %v327_v20 = vcombine.high %v8461_v24, %v8377_v58 }
 0x1c6   : > { %5062 = vrot.lane.b32.xlu0 %v8442_v44, %s5248_s22  ;;  %v8455_v37 = vpack.i.bf16 %v8453_v51, %v8454_v17  ;;  %v8459_v44 = vld [vmem:[#allocation35_spill] sm:$0xff]  ;;  %8460 = vst [vmem:[#allocation21_spill] sm:$0xff] %v6491_v1  ;;  %v2231_v30 = vcombine.high %v6491_v1, %v8377_v58  ;;  %v1698_v51 = vcombine.high %v6255_v27, %v8377_v58 }
 0x1c8   : > { %v5106_v62 = vpack.i.bf16 %v1698_v51, %v1254_v59 }
 0x1c9   : > { %5007 = vrot.lane.b32.xlu1 %v5006_v18, %s5246_s19  ;;  %v802_v18 = vcombine.high %v8459_v44, %v8377_v58 }
 0x1ca   : > { %5072 = vrot.lane.b32.xlu0 %v5071_v56, %s5247_s20  ;;  %v8450_v56 = vld [vmem:[#allocation51_spill] sm:$0xff] }
 0x1cb   : > { %v8452_v26 = vpack.i.bf16 %v8450_v56, %v8451_v60  ;;  %v5066_v49 = vpack.i.bf16 %v802_v18, %v327_v20  ;;  %v1765_v56 = vcombine.high %v6192_v11, %v8377_v58  ;;  %v6515_v60 = vpop.permute.xlu1 %4847  ;;  %v2233_v11 = vcombine.high %v6217_v48, %v8377_v58 }
 0x1cc   : > { %v6478_v46 = vpop.permute.xlu0 %4852  ;;  %v6542_v48 = vrot.slane %v2131_v54, %v5721_v12  ;;  %v2165_v18 = vcombine.high %v6300_v16, %v8377_v58  ;;  %v2166_v20 = vcombine.high %v6322_v25, %v8377_v58 }
 0x1cd   : > { %5022 = vrot.lane.b32.xlu1 %v5021_v40, %s5246_s19  ;;  %v8462_v40 = vld [vmem:[#allocation49_spill] sm:$0xff]  ;;  %v5081_v50 = vpack.i.bf16 %v1765_v56, %v1321_v14 }
 0x1ce   : > { %5077 = vrot.lane.b32.xlu0 %v8452_v26, %s5248_s22  ;;  %v8464_v22 = vpack.i.bf16 %v8462_v40, %v8463_v19  ;;  %8471 = vst [vmem:[#allocation11_spill] sm:$0xff] %v6542_v48 }
 0x1cf   : > { %v6529_v17 = vpop.permute.xlu1 %4877 }
 0x1d0   : > { %v6497_v21 = vpop.permute.xlu0 %4857 }
 0x1d1   : > { %5027 = vrot.lane.b32.xlu1 %v8455_v37, %s5247_s20 }
 0x1d2   : > { %5092 = vrot.lane.b32.xlu0 %v5091_v35, %s5248_s22  ;;  %v2232_v35 = vcombine.high %v6199_v28, %v8377_v58  ;;  %v8469_v28 = vld [vmem:[#allocation41_spill] sm:$0xff] }
 0x1d3   : > { %v6548_v27 = vpop.permute.xlu1 %4882 }
 0x1d4   : > { %v6517_v26 = vpop.permute.xlu0 %4862 }
 0x1d5   : > { %5042 = vrot.lane.b32.xlu1 %v5041_v43, %s5246_s19  ;;  %v8470_v43 = vpack.i.bf16 %v8468_v23, %v8469_v28 }
 0x1d6   : > { %5097 = vrot.lane.b32.xlu0 %v8458_v45, %s5249_s26  ;;  %v2163_v45 = vcombine.high %v6542_v48, %v8377_v58 }
 0x1d7   : > { %v6562_v44 = vpop.permute.xlu1 %4892 }
 0x1d8   : > { %v6531_v37 = vpop.permute.xlu0 %4867 }
 0x1d9   : > { %5047 = vrot.lane.b32.xlu1 %v8464_v22, %s5247_s20 }
 0x1da   : > { %5102 = vrot.lane.b32.xlu0 %v8467_v41, %s5249_s26 }
 0x1db   : > { %v6572_v31 = vpop.permute.xlu1 %4907 }
 0x1dc   : > { %v6550_v34 = vpop.permute.xlu0 %4872 }
 0x1dd   : > { %5067 = vrot.lane.b32.xlu1 %v5066_v49, %s5249_s26 }
 0x1de   : > { %2264 = vrot.lane.b32.xlu0 %v2231_v30, %s5246_s19 }
 0x1e1   : > { %5082 = vrot.lane.b32.xlu1 %v5081_v50, %s5248_s22 }
 0x1e2   : > { %2272 = vrot.lane.b32.xlu0 %v2232_v35, %s5247_s20 }
 0x1e5   : > { %5087 = vrot.lane.b32.xlu1 %v8470_v43, %s5249_s26 }
 0x1e6   : > { %2280 = vrot.lane.b32.xlu0 %v2233_v11, %s5248_s22 }
 0x1e9   : > { %5107 = vrot.lane.b32.xlu1 %v5106_v62, %s5249_s26  ;;  %v4835_v62 = vunpack.i.h.bf16 %v6450_v38 }
 0x1ea   : > { %2288 = vrot.lane.b32.xlu0 %v2234_v4, %s5249_s26  ;;  %v4834_v4 = vunpack.i.l.bf16 %v6450_v38 }
 0x1eb   : > { %v6560_v54 = vpop.permute.xlu0 %4887 }
 0x1ec   : > { %8472 = vst [vmem:[#allocation12_spill] sm:$0xff] %v6560_v54 }
 0x1ed   : > { %2236 = vrot.lane.b32.xlu1 %v2163_v45, %s5246_s19  ;;  %v4865_v45 = vunpack.i.h.bf16 %v6517_v26 }
 0x1ee   : > { %2342 = vperm.xlu0 %5111, %v2339_v42   ;;  %v4864_v42 = vunpack.i.l.bf16 %v6517_v26 }
 0x1f1   : > { %2244 = vrot.lane.b32.xlu1 %v2164_v29, %s5247_s20  ;;  %v4845_v29 = vunpack.i.h.bf16 %v6495_v53 }
 0x1f3   : > { %v6567_v24 = vpop.permute.xlu0 %4897 }
 0x1f5   : > { %2252 = vrot.lane.b32.xlu1 %v2165_v18, %s5248_s22  ;;  %s5259_s22 = smov 24  }
 0x1f7   : > { %v6574_v40 = vpop.permute.xlu0 %4902 }
 0x1f9   : > { %2260 = vrot.lane.b32.xlu1 %v2166_v20, %s5249_s26 }
 0x1fb   : > { %v6577_v19 = vpop.permute.xlu1 %4912 }
 0x1fc   : > { %v6579_v22 = vpop.permute.xlu0 %4932 }
 0x1ff   : > { %v6581_v52 = vpop.permute.xlu1 %4917 }
 0x200   : > { %v6583_v16 = vpop.permute.xlu0 %4937 }
 0x203   : > { %v6585_v2 = vpop.permute.xlu1 %4922 }
 0x204   : > { %v6587_v41 = vpop.permute.xlu0 %2268 }
 0x205   : > { %8473 = vst [vmem:[#allocation18_spill] sm:$0xff] %v6587_v41 }
 0x207   : > { %v6589_v14 = vpop.permute.xlu1 %4927 }
 0x208   : > { %v6591_v58 = vpop.permute.xlu0 %2276 }
 0x209   : > { %8474 = vst [vmem:[#allocation19_spill] sm:$0xff] %v6591_v58  ;;  %v4869_v58 = vunpack.i.l.bf16 %v6531_v37 }
 0x20b   : > { %v6593_v25 = vpop.permute.xlu1 %4942 }
 0x20c   : > { %v6595_v49 = vpop.permute.xlu0 %2284 }
 0x20d   : > { %8475 = vst [vmem:[#allocation26_spill] sm:$0xff] %v6595_v49 }
 0x20f   : > { %v6597_v30 = vpop.permute.xlu1 %4947 }
 0x210   : > { %v4953_v56 = vpop.permute.xlu0 %4952 }
 0x211   : > { %v4955_v20 = vunpack.i.h.bf16 %v4953_v56  ;;  %v4954_v49 = vunpack.i.l.bf16 %v4953_v56  ;;  %v4870_v56 = vunpack.i.h.bf16 %v6531_v37 }
 0x213   : > { %v6599_v50 = vpop.permute.xlu1 %2240  ;;  %v1148_v48 = vsel %vm452_vm3, %v6234_v6, %v4955_v20  ;;  %v704_v53 = vsel %vm452_vm3, %v6223_v10, %v4954_v49 }
 0x214   : > { %8476 = vst [vmem:[#allocation23_spill] sm:$0xff] %v6599_v50  ;;  %v6601_v35 = vpop.permute.xlu0 %4972  ;;  %v705_v10 = vsel %vm454_vm4, %v704_v53, %v4834_v4  ;;  %v1149_v49 = vsel %vm454_vm4, %v1148_v48, %v4835_v62 }
 0x217   : > { %v6603_v59 = vpop.permute.xlu1 %2248 }
 0x218   : > { %8477 = vst [vmem:[#allocation29_spill] sm:$0xff] %v6603_v59  ;;  %v6605_v11 = vpop.permute.xlu0 %4977 }
 0x21b   : > { %v6607_v51 = vpop.permute.xlu1 %2256 }
 0x21c   : > { %8478 = vst [vmem:[#allocation22_spill] sm:$0xff] %v6607_v51  ;;  %v6609_v23 = vpop.permute.xlu0 %4992 }
 0x21f   : > { %v6611_v28 = vpop.permute.xlu1 %4957 }
 0x220   : > { %v6613_v43 = vpop.permute.xlu0 %5012  ;;  %v4960_v62 = vunpack.i.h.bf16 %v6611_v28  ;;  %v4959_v53 = vunpack.i.l.bf16 %v6611_v28 }
 0x223   : > { %v4963_v51 = vpop.permute.xlu1 %4962 }
 0x224   : > { %v6629_v50 = vpop.permute.xlu0 %5017  ;;  %v4965_v38 = vunpack.i.h.bf16 %v4963_v51  ;;  %v4964_v59 = vunpack.i.l.bf16 %v4963_v51 }
 0x226   : > { %v934_v37 = vsel %vm452_vm3, %v6330_v5, %v4965_v38  ;;  %v466_v12 = vsel %vm452_vm3, %v6342_v39, %v4964_v59  ;;  %v5015_v39 = vunpack.i.h.bf16 %v6613_v43  ;;  %v5014_v59 = vunpack.i.l.bf16 %v6613_v43 }
 0x227   : > { %v4968_v18 = vpop.permute.xlu1 %4967  ;;  %v935_v26 = vsel %vm454_vm4, %v934_v37, %v4845_v29  ;;  %v5020_v37 = vunpack.i.h.bf16 %v6629_v50 }
 0x228   : > { %v6643_v41 = vpop.permute.xlu0 %5032  ;;  %v4970_v36 = vunpack.i.h.bf16 %v4968_v18  ;;  %v4969_v1 = vunpack.i.l.bf16 %v4968_v18  ;;  %v467_v18 = vsel %vm454_vm4, %v466_v12, %v4844_v15 }
 0x22a   : > { %v706_v54 = vsel %vm456_vm5, %v705_v10, %v4969_v1  ;;  %v1150_v51 = vsel %vm456_vm5, %v1149_v49, %v4970_v36  ;;  %v8479_v10 = vunpack.i.l.bf16 %v6515_v60  ;;  %v8480_v49 = vunpack.i.h.bf16 %v6515_v60 }
 0x22b   : > { %v4983_v6 = vpop.permute.xlu1 %4982 }
 0x22c   : > { %v4985_v5 = vunpack.i.h.bf16 %v4983_v6  ;;  %v4984_v20 = vunpack.i.l.bf16 %v4983_v6  ;;  %v6661_v38 = vpop.permute.xlu0 %5037  ;;  %v707_v28 = vsel %vm458_vm7, %v706_v54, %v8479_v10 }
 0x22e   : > { %v468_v4 = vsel %vm456_vm5, %v467_v18, %v4984_v20  ;;  %v936_v48 = vsel %vm456_vm5, %v935_v26, %v4985_v5  ;;  %v5019_v26 = vunpack.i.l.bf16 %v6629_v50 }
 0x22f   : > { %v4988_v6 = vpop.permute.xlu1 %4987  ;;  %v469_v7 = vsel %vm458_vm7, %v468_v4, %v4864_v42  ;;  %v937_v43 = vsel %vm458_vm7, %v936_v48, %v4865_v45  ;;  %v1151_v42 = vsel %vm458_vm7, %v1150_v51, %v8480_v49  ;;  %v8482_v4 = vunpack.i.h.bf16 %v6562_v44 }
 0x230   : > { %v4990_v12 = vunpack.i.h.bf16 %v4988_v6  ;;  %v4989_v15 = vunpack.i.l.bf16 %v4988_v6  ;;  %v5053_v29 = vpop.permute.xlu0 %5052  ;;  %v470_v1 = vsel %vm460_vm6, %v469_v7, %v5014_v59  ;;  %v938_v36 = vsel %vm460_vm6, %v937_v43, %v5015_v39 }
 0x231   : > { %v5055_v20 = vunpack.i.h.bf16 %v5053_v29  ;;  %v5054_v7 = vunpack.i.l.bf16 %v5053_v29  ;;  %v8481_v39 = vunpack.i.l.bf16 %v6562_v44  ;;  %v939_v54 = vsel %vm462_vm8, %v938_v36, %v8482_v4 }
 0x232   : > { %v708_v45 = vsel %vm460_vm6, %v707_v28, %v4989_v15  ;;  %v1152_v5 = vsel %vm460_vm6, %v1151_v42, %v4990_v12  ;;  %v4915_v51 = vunpack.i.h.bf16 %v6577_v19  ;;  %v4974_v48 = vunpack.i.l.bf16 %v6601_v35 }
 0x233   : > { %v4998_v59 = vpop.permute.xlu1 %4997  ;;  %v471_v18 = vsel %vm462_vm8, %v470_v1, %v8481_v39  ;;  %v709_v50 = vsel %vm462_vm8, %v708_v45, %v4869_v58  ;;  %v1153_v60 = vsel %vm462_vm8, %v1152_v5, %v4870_v56  ;;  %v4914_v15 = vunpack.i.l.bf16 %v6577_v19 }
 0x234   : > { %v6697_v6 = vpop.permute.xlu0 %5057  ;;  %v710_v43 = vsel %vm464_vm9, %v709_v50, %v5019_v26  ;;  %v1154_v12 = vsel %vm464_vm9, %v1153_v60, %v5020_v37  ;;  %v697_v58 = vsel %vm452_vm3, %v6306_v3, %v4959_v53  ;;  %v4935_v1 = vunpack.i.h.bf16 %v6579_v22 }
 0x235   : > { %v2308_v44 = vrot.slane %v710_v43, 4  ;;  %v2314_v29 = vrot.slane %v1154_v12, 4  ;;  %v1141_v56 = vsel %vm452_vm3, %v6316_v47, %v4960_v62  ;;  %v472_v36 = vsel %vm464_vm9, %v471_v18, %v5054_v7 }
 0x236   : > { %v940_v10 = vsel %vm464_vm9, %v939_v54, %v5055_v20  ;;  %v4934_v26 = vunpack.i.l.bf16 %v6579_v22  ;;  %v4975_v37 = vunpack.i.h.bf16 %v6601_v35  ;;  %v453_v53 = vsel %vm452_vm3, %v6265_v32, %v4974_v48 }
 0x237   : > { %v5003_v28 = vpop.permute.xlu1 %5002  ;;  %v2331_v49 = vsel %vm2329_vm10, %v472_v36, %v2308_v44  ;;  %v2333_v3 = vsel %vm2329_vm10, %v940_v10, %v2314_v29  ;;  %v8483_v42 = vunpack.i.l.bf16 %v6467_v55  ;;  %v4999_v62 = vunpack.i.l.bf16 %v4998_v59 }
 0x238   : > { %v6718_v45 = vpop.permute.xlu0 %5062  ;;  %v4751_v5 = vpack.c.bf16 %v2333_v3, %v2331_v49  ;;  %v4920_v20 = vunpack.i.h.bf16 %v6581_v52  ;;  %v4919_v35 = vunpack.i.l.bf16 %v6581_v52  ;;  %v4979_v7 = vunpack.i.l.bf16 %v6605_v11 }
 0x239   : > { %v698_v47 = vsel %vm454_vm4, %v697_v58, %v8483_v42  ;;  %v8484_v39 = vunpack.i.h.bf16 %v6467_v55  ;;  %v4940_v32 = vunpack.i.h.bf16 %v6583_v16  ;;  %v4980_v50 = vunpack.i.h.bf16 %v6605_v11 }
 0x23a   : > { %v4995_v4 = vunpack.i.h.bf16 %v6609_v23  ;;  %v4994_v54 = vunpack.i.l.bf16 %v6609_v23  ;;  %4752 = vmatprep.subr.bf16.mxu0 %v4751_v5  ;;  %v927_v60 = vsel %vm452_vm3, %v6250_v57, %v4975_v37  ;;  %v5000_v48 = vunpack.i.h.bf16 %v4998_v59 }
 0x23b   : > { %v1142_v18 = vsel %vm454_vm4, %v1141_v56, %v8484_v39  ;;  %v8485_v43 = vunpack.i.l.bf16 %v6478_v46  ;;  %v699_v55 = vsel %vm456_vm5, %v698_v47, %v4979_v7  ;;  %v5008_v58 = vpop.permute.xlu1 %5007  ;;  %v5005_v29 = vunpack.i.h.bf16 %v5003_v28 }
 0x23c   : > { %v5004_v11 = vunpack.i.l.bf16 %v5003_v28  ;;  %v1143_v56 = vsel %vm456_vm5, %v1142_v18, %v4980_v50  ;;  %v6738_v36 = vpop.permute.xlu0 %5072  ;;  %v4939_v23 = vunpack.i.l.bf16 %v6583_v16  ;;  %v4925_v57 = vunpack.i.h.bf16 %v6585_v2 }
 0x23d   : > { %v455_v12 = vsel %vm454_vm4, %v453_v53, %v8485_v43  ;;  %v4924_v59 = vunpack.i.l.bf16 %v6585_v2  ;;  %v4930_v10 = vunpack.i.h.bf16 %v6589_v14  ;;  %v4929_v37 = vunpack.i.l.bf16 %v6589_v14 }
 0x23e   : > { %v457_v44 = vsel %vm456_vm5, %v455_v12, %v4999_v62  ;;  %v2068_v49 = vsel %vm452_vm3, %v6289_v63, %v4995_v4  ;;  %v1616_v28 = vsel %vm452_vm3, %v6297_v9, %v4994_v54  ;;  %v8486_v3 = vunpack.i.h.bf16 %v6478_v46 }
 0x23f   : > { %v8487_v42 = vunpack.i.l.bf16 %v6529_v17  ;;  %v8488_v5 = vunpack.i.l.bf16 %v6497_v21  ;;  %v8489_v39 = vunpack.i.h.bf16 %v6497_v21  ;;  %v5023_v18 = vpop.permute.xlu1 %5022  ;;  %v4945_v9 = vunpack.i.h.bf16 %v6593_v25 }
 0x240   : > { %v928_v53 = vsel %vm454_vm4, %v927_v60, %v8486_v3  ;;  %v5034_v46 = vunpack.i.l.bf16 %v6643_v41  ;;  %v6766_v54 = vpop.permute.xlu0 %5077  ;;  %v4944_v60 = vunpack.i.l.bf16 %v6593_v25  ;;  %v4949_v43 = vunpack.i.l.bf16 %v6597_v30 }
 0x241   : > { %v459_v47 = vsel %vm458_vm7, %v457_v44, %v8487_v42  ;;  %v929_v62 = vsel %vm456_vm5, %v928_v53, %v5000_v48  ;;  %v700_v7 = vsel %vm458_vm7, %v699_v55, %v8488_v5  ;;  %v1144_v63 = vsel %vm458_vm7, %v1143_v56, %v8489_v39 }
 0x242   : > { %v701_v50 = vsel %vm460_vm6, %v700_v7, %v5004_v11  ;;  %v1145_v4 = vsel %vm460_vm6, %v1144_v63, %v5005_v29  ;;  %v4950_v48 = vunpack.i.h.bf16 %v6597_v30  ;;  %v8490_v21 = vunpack.i.l.bf16 %v6550_v34 }
 0x243   : > { %v5035_v55 = vunpack.i.h.bf16 %v6643_v41  ;;  %v8491_v44 = vunpack.i.h.bf16 %v6529_v17  ;;  %v8492_v29 = vunpack.i.h.bf16 %v6550_v34  ;;  %v461_v3 = vsel %vm460_vm6, %v459_v47, %v5034_v46  ;;  %v5028_v5 = vpop.permute.xlu1 %5027 }
 0x244   : > { %v1617_v12 = vsel %vm454_vm4, %v1616_v28, %v8490_v21  ;;  %v5025_v53 = vunpack.i.h.bf16 %v5023_v18  ;;  %v5024_v42 = vunpack.i.l.bf16 %v5023_v18  ;;  %v8493_v7 = vunpack.i.l.bf16 %v6548_v27 }
 0x245   : > { %v930_v11 = vsel %vm458_vm7, %v929_v62, %v8491_v44  ;;  %v2069_v56 = vsel %vm454_vm4, %v2068_v49, %v8492_v29  ;;  %v8494_v28 = vunpack.i.h.bf16 %v6548_v27  ;;  %v5040_v17 = vunpack.i.h.bf16 %v6661_v38  ;;  %v6790_v49 = vpop.permute.xlu0 %5092 }
 0x246   : > { %v702_v39 = vsel %vm462_vm8, %v701_v50, %v8493_v7  ;;  %v5039_v62 = vunpack.i.l.bf16 %v6661_v38  ;;  %v5010_v34 = vunpack.i.h.bf16 %v5008_v58  ;;  %v5009_v63 = vunpack.i.l.bf16 %v5008_v58 }
 0x247   : > { %v1146_v41 = vsel %vm462_vm8, %v1145_v4, %v8494_v28  ;;  %v5060_v47 = vunpack.i.h.bf16 %v6697_v6  ;;  %v5059_v18 = vunpack.i.l.bf16 %v6697_v6  ;;  %v5065_v46 = vunpack.i.h.bf16 %v6718_v45  ;;  %v5043_v28 = vpop.permute.xlu1 %5042 }
 0x248   : > { %v5064_v50 = vunpack.i.l.bf16 %v6718_v45  ;;  %v8495_v27 = vunpack.i.l.bf16 %v6572_v31  ;;  %v703_v21 = vsel %vm464_vm9, %v702_v39, %v5039_v62  ;;  %v931_v38 = vsel %vm460_vm6, %v930_v11, %v5035_v55 }
 0x249   : > { %v1147_v58 = vsel %vm464_vm9, %v1146_v41, %v5040_v17  ;;  %v1830_v44 = vsel %vm452_vm3, %v6429_v8, %v5025_v53  ;;  %v1386_v6 = vsel %vm452_vm3, %v6418_v13, %v5024_v42  ;;  %v5030_v29 = vunpack.i.h.bf16 %v5028_v5  ;;  %v6810_v55 = vpop.permute.xlu0 %5097 }
 0x24a   : > { %v463_v4 = vsel %vm462_vm8, %v461_v3, %v8495_v27  ;;  %v5029_v7 = vunpack.i.l.bf16 %v5028_v5  ;;  %v2061_v45 = vsel %vm452_vm3, %v6399_v0, %v5010_v34  ;;  %v1609_v3 = vsel %vm452_vm3, %v6407_v33, %v5009_v63  ;;  %v8499_v27 = vld [vmem:[#allocation12_spill] sm:$0xff] }
 0x24b   : > { %v5045_v39 = vunpack.i.h.bf16 %v5043_v28  ;;  %v5044_v62 = vunpack.i.l.bf16 %v5043_v28  ;;  %v5075_v11 = vunpack.i.h.bf16 %v6738_v36  ;;  %v5074_v8 = vunpack.i.l.bf16 %v6738_v36 }
 0x24c   : > { %v8496_v53 = vunpack.i.h.bf16 %v6572_v31  ;;  %v2307_v42 = vrot.slane %v703_v21, 4  ;;  %v8497_v5 = vunpack.i.h.bf16 %v6567_v24  ;;  %v8498_v41 = vunpack.i.l.bf16 %v6567_v24  ;;  %v5048_v31 = vpop.permute.xlu1 %5047 }
 0x24d   : > { %v1379_v17 = vsel %vm452_vm3, %v6448_v61, %v5044_v62  ;;  %v2313_v34 = vrot.slane %v1147_v58, 4  ;;  %v1618_v63 = vsel %vm456_vm5, %v1617_v12, %v5029_v7  ;;  %v2070_v36 = vsel %vm456_vm5, %v2069_v56, %v5030_v29  ;;  %v6836_v62 = vpop.permute.xlu0 %5102 }
 0x24e   : > { %v932_v13 = vsel %vm462_vm8, %v931_v38, %v8496_v53  ;;  %v1831_v0 = vsel %vm454_vm4, %v1830_v44, %v8497_v5  ;;  %v1387_v33 = vsel %vm454_vm4, %v1386_v6, %v8498_v41  ;;  %v8500_v38 = vunpack.i.l.bf16 %v8499_v27  ;;  %v8502_v6 = vld [vmem:[#allocation20_spill] sm:$0xff] }
 0x24f   : > { %v8501_v28 = vunpack.i.h.bf16 %v8499_v27  ;;  %v5080_v24 = vunpack.i.h.bf16 %v6766_v54  ;;  %v1823_v53 = vsel %vm452_vm3, %v8502_v6, %v5045_v39  ;;  %v5050_v61 = vunpack.i.h.bf16 %v5048_v31 }
 0x250   : > { %v1610_v21 = vsel %vm454_vm4, %v1609_v3, %v8500_v38  ;;  %v5049_v58 = vunpack.i.l.bf16 %v5048_v31  ;;  %v5079_v12 = vunpack.i.l.bf16 %v6766_v54  ;;  %v1380_v56 = vsel %vm454_vm4, %v1379_v17, %v4914_v15 }
 0x251   : > { %v2062_v44 = vsel %vm454_vm4, %v2061_v45, %v8501_v28  ;;  %v1388_v29 = vsel %vm456_vm5, %v1387_v33, %v5059_v18  ;;  %v1832_v7 = vsel %vm456_vm5, %v1831_v0, %v5060_v47  ;;  %v8503_v45 = vunpack.i.l.bf16 %v6574_v40  ;;  %v5068_v0 = vpop.permute.xlu1 %5067 }
 0x252   : > { %v8504_v39 = vunpack.i.h.bf16 %v6574_v40  ;;  %v1611_v41 = vsel %vm456_vm5, %v1610_v21, %v5049_v58  ;;  %v2063_v54 = vsel %vm456_vm5, %v2062_v44, %v5050_v61  ;;  %v5095_v31 = vunpack.i.h.bf16 %v6790_v49 }
 0x253   : > { %v1619_v3 = vsel %vm458_vm7, %v1618_v63, %v8503_v45  ;;  %v5094_v15 = vunpack.i.l.bf16 %v6790_v49  ;;  %v1824_v47 = vsel %vm454_vm4, %v1823_v53, %v4915_v51  ;;  %v1612_v18 = vsel %vm458_vm7, %v1611_v41, %v4919_v35  ;;  %v2265_v63 = vpop.permute.xlu0 %2264 }
 0x254   : > { %v2071_v5 = vsel %vm458_vm7, %v2070_v36, %v8504_v39  ;;  %v1381_v40 = vsel %vm456_vm5, %v1380_v56, %v5074_v8  ;;  %v5070_v33 = vunpack.i.h.bf16 %v5068_v0  ;;  %v5069_v17 = vunpack.i.l.bf16 %v5068_v0 }
 0x255   : > { %v1389_v36 = vsel %vm458_vm7, %v1388_v29, %v4924_v59  ;;  %v2064_v19 = vsel %vm458_vm7, %v2063_v54, %v4920_v20  ;;  %v1833_v51 = vsel %vm458_vm7, %v1832_v7, %v4925_v57  ;;  %v1620_v35 = vsel %vm460_vm6, %v1619_v3, %v5064_v50  ;;  %v5083_v21 = vpop.permute.xlu1 %5082  ;;  %v8506_v7 = vld [vmem:[#allocation18_spill] sm:$0xff] }
 0x256   : > { %v2072_v49 = vsel %vm460_vm6, %v2071_v5, %v5065_v46  ;;  %v1825_v8 = vsel %vm456_vm5, %v1824_v47, %v5075_v11  ;;  %v1613_v27 = vsel %vm460_vm6, %v1612_v18, %v5079_v12  ;;  %v465_v38 = vsel %vm464_vm9, %v463_v4, %v5069_v17  ;;  %v8507_v18 = vld [vmem:[#allocation19_spill] sm:$0xff] }
 0x257   : > { %v933_v59 = vsel %vm464_vm9, %v932_v13, %v5070_v33  ;;  %v5100_v52 = vunpack.i.h.bf16 %v6810_v55  ;;  %v2330_v20 = vsel %vm2329_vm10, %v465_v38, %v2307_v42  ;;  %v1382_v57 = vsel %vm458_vm7, %v1381_v40, %v4934_v26  ;;  %v2273_v28 = vpop.permute.xlu0 %2272 }
 0x258   : > { %v2332_v2 = vsel %vm2329_vm10, %v933_v59, %v2313_v34  ;;  %v2065_v46 = vsel %vm460_vm6, %v2064_v19, %v5080_v24  ;;  %v5085_v50 = vunpack.i.h.bf16 %v5083_v21  ;;  %v5084_v11 = vunpack.i.l.bf16 %v5083_v21  ;;  %v8505_v34 = vld [vmem:[#allocation21_spill] sm:$0xff]  ;;  %v8509_v59 = vld [vmem:[#allocation26_spill] sm:$0xff] }
 0x259   : > { %v4753_v44 = vpack.c.bf16 %v2332_v2, %v2330_v20  ;;  %v5099_v4 = vunpack.i.l.bf16 %v6810_v55  ;;  %v1621_v13 = vsel %vm462_vm8, %v1620_v35, %v4929_v37  ;;  %v1614_v42 = vsel %vm462_vm8, %v1613_v27, %v4939_v23  ;;  %v5088_v58 = vpop.permute.xlu1 %5087  ;;  %v8510_v20 = vld [vmem:[#allocation23_spill] sm:$0xff] }
 0x25a   : > { %v1826_v26 = vsel %vm458_vm7, %v1825_v8, %v4935_v1  ;;  %v2298_v24 = vsel %vm452_vm3, %v8505_v34, %v2265_v63  ;;  %v1390_v6 = vsel %vm460_vm6, %v1389_v36, %v5084_v11  ;;  %v1834_v53 = vsel %vm460_vm6, %v1833_v51, %v5085_v50  ;;  %v8508_v8 = vld [vmem:[#allocation11_spill] sm:$0xff]  ;;  %v8511_v50 = vld [vmem:[#allocation29_spill] sm:$0xff] }
 0x25b   : > { %4754 = vmatpush1.bf16.msra.mxu0 %v4753_v44  ;;  %v1383_v55 = vsel %vm460_vm6, %v1382_v57, %v5094_v15  ;;  %v5105_v37 = vunpack.i.h.bf16 %v6836_v62  ;;  %v5104_v61 = vunpack.i.l.bf16 %v6836_v62  ;;  %v2073_v22 = vsel %vm462_vm8, %v2072_v49, %v4930_v10  ;;  %v2281_v3 = vpop.permute.xlu0 %2280 }
 0x25c   : > { %v2066_v1 = vsel %vm462_vm8, %v2065_v46, %v4940_v32  ;;  %v5090_v23 = vunpack.i.h.bf16 %v5088_v58  ;;  %v5089_v12 = vunpack.i.l.bf16 %v5088_v58  ;;  %v1615_v56 = vsel %vm464_vm9, %v1614_v42, %v5099_v4  ;;  %v8512_v4 = vld [vmem:[#allocation22_spill] sm:$0xff] }
 0x25d   : > { %v1827_v29 = vsel %vm460_vm6, %v1826_v26, %v5095_v31  ;;  %v2299_v45 = vsel %vm454_vm4, %v2298_v24, %v8506_v7  ;;  %v1391_v14 = vsel %vm462_vm8, %v1390_v6, %v4944_v60  ;;  %v1835_v16 = vsel %vm462_vm8, %v1834_v53, %v4945_v9  ;;  %v5108_v31 = vpop.permute.xlu1 %5107  ;;  %v2338_v26 = vld [vmem:[%s8245_s1] sm:$0xff] }
 0x25e   : > { %v1384_v32 = vsel %vm462_vm8, %v1383_v55, %v4949_v43  ;;  %v2300_v10 = vsel %vm456_vm5, %v2299_v45, %v2273_v28  ;;  %v1622_v62 = vsel %vm464_vm9, %v1621_v13, %v5089_v12  ;;  %v2074_v39 = vsel %vm464_vm9, %v2073_v22, %v5090_v23 }
 0x25f   : > { %v2067_v5 = vsel %vm464_vm9, %v2066_v1, %v5100_v52  ;;  %v2320_v41 = vrot.slane %v1622_v62, 4  ;;  %v2326_v54 = vrot.slane %v2074_v39, 4  ;;  %v1828_v25 = vsel %vm462_vm8, %v1827_v29, %v4950_v48  ;;  %v2289_v19 = vpop.permute.xlu0 %2288 }
 0x260   : > { %v2319_v9 = vrot.slane %v1615_v56, 4  ;;  %v5110_v60 = vunpack.i.h.bf16 %v5108_v31  ;;  %v5109_v15 = vunpack.i.l.bf16 %v5108_v31  ;;  %v1392_v43 = vsel %vm464_vm9, %v1391_v14, %v5104_v61 }
 0x261   : > { %v1836_v47 = vsel %vm464_vm9, %v1835_v16, %v5105_v37  ;;  %v2301_v0 = vsel %vm458_vm7, %v2300_v10, %v8507_v18  ;;  %v2335_v40 = vsel %vm2329_vm10, %v1392_v43, %v2320_v41  ;;  %v2325_v17 = vrot.slane %v2067_v5, 4  ;;  %v2237_v51 = vpop.permute.xlu1 %2236 }
 0x262   : > { %v2337_v33 = vsel %vm2329_vm10, %v1836_v47, %v2326_v54  ;;  %v2302_v63 = vsel %vm460_vm6, %v2301_v0, %v2281_v3  ;;  %v1385_v48 = vsel %vm464_vm9, %v1384_v32, %v5109_v15  ;;  %v1829_v36 = vsel %vm464_vm9, %v1828_v25, %v5110_v60  ;;  %v8513_v3 = vld [vmem:[#allocation10_spill] sm:$0xff]  ;;  %v8514_v0 = vld [vmem:[#allocation17_spill] sm:$0xff] }
 0x263   : > { %v4755_v30 = vpack.c.bf16 %v2337_v33, %v2335_v40  ;;  %v2334_v35 = vsel %vm2329_vm10, %v1385_v48, %v2319_v9  ;;  %v2336_v49 = vsel %vm2329_vm10, %v1829_v36, %v2325_v17  ;;  %v2291_v27 = vsel %vm452_vm3, %v8508_v8, %v2237_v51 }
 0x264   : > { %v4757_v38 = vpack.c.bf16 %v2336_v49, %v2334_v35  ;;  %v2303_v52 = vsel %vm462_vm8, %v2302_v63, %v8509_v59  ;;  %v2292_v2 = vsel %vm454_vm4, %v2291_v27, %v8510_v20 }
 0x265   : > { %4756 = vmatprep.subr.bf16.mxu0 %v4755_v30  ;;  %v2304_v21 = vsel %vm464_vm9, %v2303_v52, %v2289_v19  ;;  %v2245_v57 = vpop.permute.xlu1 %2244 }
 0x266   : > { %4758 = vmatpush1.bf16.msra.mxu0 %v4757_v38  ;;  %v2293_v46 = vsel %vm456_vm5, %v2292_v2, %v2245_v57 }
 0x267   : > { %4743 = vmatprep.subr.msk.mxu0 %vm2329_vm10, %v2304_v21  ;;  %v2294_v11 = vsel %vm458_vm7, %v2293_v46, %v8511_v50 }
 0x269   : > { %v2253_v28 = vpop.permute.xlu1 %2252 }
 0x26a   : > { %v2295_v44 = vsel %vm460_vm6, %v2294_v11, %v2253_v28  ;;  %vm4415_vm6 = vcmask 1047559  }
 0x26b   : > { %v2296_v13 = vsel %vm462_vm8, %v2295_v44, %v8512_v4  ;;  %vm4638_vm8 = vcmask 64512  }
 0x26d   : > { %v2261_v42 = vpop.permute.xlu1 %2260  ;;  %v2343_v24 = vpop.permute.xlu0 %2342 }
 0x26e   : > { %v2297_v34 = vsel %vm464_vm9, %v2296_v13, %v2261_v42  ;;  %vm4641_vm9 = vcmask 195584  }
 0x26f   : > { %4744 = vmatpush1.msk.msra.mxu0 %vm2329_vm10, %v2297_v34  ;;  %vm4644_vm10 = vcmask 326656  }
 0x270   : > { %4745 = vmatmul.mubr.msk.f32.vlgmr.msra.gmra.mrb[0].mxu0 %vm2345_vm11, %v2338_v26  ;;  %vm4647_vm11 = vcmask 457728  }
 0x343   : > { %v2421_v6 = vpop.f32.mrb[0].mxu0 }
 0x344   : > { %v2422_v53 = vadd.f32 %v2421_v6, %v2343_v24  ;;  %v2423_v55 = vpop.f32.mrb[1].mxu0 }
 0x345   : > { %v2424_v61 = vadd.f32 %v2423_v55, %v2343_v24 }
 0x346   : > { %v2426_v37 = vmax.f32 %v2422_v53, 0.0 }
 0x347   : > { %v2427_v58 = vmax.f32 %v2424_v61, 0.0 }
 0x348   : > { %2435 = vrot.lane.b32.xlu0 %v2426_v37, %s5243_s7  ;;  %2429 = vrot.lane.b32.xlu1 %v2426_v37, %s5245_s17 }
 0x34c   : > { %2442 = vrot.lane.b32.xlu0 %v2427_v58, %s5244_s8  ;;  %2432 = vrot.lane.b32.xlu1 %v2426_v37, %s5244_s8  ;;  %s5257_s8 = smov 8  }
 0x350   : > { %2439 = vrot.lane.b32.xlu1 %v2427_v58, %s5245_s17  ;;  %s5258_s17 = smov 40  }
 0x354   : > { %2445 = vrot.lane.b32.xlu1 %v2427_v58, %s5243_s7 }
 0x3ba   : > { %v2430_v22 = vpop.permute.xlu1 %2429  ;;  %v2436_v1 = vpop.permute.xlu0 %2435 }
 0x3bb   : > { %v2464_v7 = vcombine.low %v2430_v22, %v2436_v1  ;;  %v2465_v25 = vcombine.high %v2430_v22, %v2436_v1 }
 0x3bd   : > { %v2472_v32 = vrot.slane %v2464_v7, %v8513_v3  ;;  %v2479_v17 = vrot.slane %v2465_v25, %v8513_v3 }
 0x3be   : > { %v2433_v23 = vpop.permute.xlu1 %2432  ;;  %v2443_v56 = vpop.permute.xlu0 %2442 }
 0x3bf   : > { %v2448_v12 = vcombine.low %v2426_v37, %v2433_v23  ;;  %v2480_v45 = vcombine.low %v2427_v58, %v2443_v56  ;;  %v2481_v39 = vcombine.high %v2427_v58, %v2443_v56  ;;  %v2449_v41 = vcombine.high %v2426_v37, %v2433_v23 }
 0x3c1   : > { %v2456_v14 = vrot.slane %v2448_v12, %v8513_v3  ;;  %v2488_v5 = vrot.slane %v2480_v45, %v8513_v3  ;;  %v2495_v43 = vrot.slane %v2481_v39, %v8513_v3  ;;  %v2463_v47 = vrot.slane %v2449_v41, %v8513_v3 }
 0x3c2   : > { %v2440_v29 = vpop.permute.xlu1 %2439 }
 0x3c3   : > { %v2512_v54 = vcombine.low %v2456_v14, %v2472_v32  ;;  %v2513_v18 = vcombine.high %v2456_v14, %v2472_v32  ;;  %v2528_v19 = vcombine.low %v2463_v47, %v2479_v17  ;;  %v2529_v38 = vcombine.high %v2463_v47, %v2479_v17 }
 0x3c5   : > { %v2520_v40 = vrot.slane %v2512_v54, %v8514_v0  ;;  %v2527_v51 = vrot.slane %v2513_v18, %v8514_v0  ;;  %v2536_v59 = vrot.slane %v2528_v19, %v8514_v0  ;;  %v2543_v2 = vrot.slane %v2529_v38, %v8514_v0 }
 0x3c6   : > { %v2446_v16 = vpop.permute.xlu1 %2445 }
 0x3c7   : > { %v2496_v10 = vcombine.low %v2440_v29, %v2446_v16  ;;  %v2497_v62 = vcombine.high %v2440_v29, %v2446_v16 }
 0x3c9   : > { %v2504_v31 = vrot.slane %v2496_v10, %v8513_v3  ;;  %v2511_v9 = vrot.slane %v2497_v62, %v8513_v3 }
 0x3cb   : > { %v2544_v60 = vcombine.low %v2488_v5, %v2504_v31  ;;  %v2545_v15 = vcombine.high %v2488_v5, %v2504_v31  ;;  %v2560_v63 = vcombine.low %v2495_v43, %v2511_v9  ;;  %v2561_v35 = vcombine.high %v2495_v43, %v2511_v9 }
 0x3cd   : > { %v2552_v33 = vrot.slane %v2544_v60, %v8514_v0  ;;  %v2559_v36 = vrot.slane %v2545_v15, %v8514_v0  ;;  %v2568_v27 = vrot.slane %v2560_v63, %v8514_v0  ;;  %v2575_v20 = vrot.slane %v2561_v35, %v8514_v0 }
 0x3cf   : > { %v2577_v30 = vcombine.high %v2520_v40, %v2552_v33  ;;  %v2576_v48 = vcombine.low %v2520_v40, %v2552_v33  ;;  %v2579_v49 = vcombine.high %v2527_v51, %v2559_v36  ;;  %v2578_v8 = vcombine.low %v2527_v51, %v2559_v36 }
 0x3d0   : > { %v2581_v52 = vcombine.high %v2536_v59, %v2568_v27  ;;  %v2580_v21 = vcombine.low %v2536_v59, %v2568_v27  ;;  %v2583_v57 = vcombine.high %v2543_v2, %v2575_v20  ;;  %v2582_v46 = vcombine.low %v2543_v2, %v2575_v20 }
 0x3d1   : > { %2594 = vrot.lane.b32.xlu1 %v2577_v30, %s5249_s26  ;;  %2592 = vrot.lane.b32.xlu0 %v2576_v48, %s5249_s26 }
 0x3d5   : > { %2598 = vrot.lane.b32.xlu1 %v2579_v49, %s5249_s26  ;;  %2596 = vrot.lane.b32.xlu0 %v2578_v8, %s5249_s26 }
 0x3d9   : > { %2602 = vrot.lane.b32.xlu1 %v2581_v52, %s5249_s26  ;;  %2600 = vrot.lane.b32.xlu0 %v2580_v21, %s5249_s26 }
 0x3dd   : > { %2606 = vrot.lane.b32.xlu1 %v2583_v57, %s5249_s26  ;;  %2604 = vrot.lane.b32.xlu0 %v2582_v46, %s5249_s26  ;;  %s5260_s26 = smov 56  }
 0x443   : > { %v2595_v50 = vpop.permute.xlu1 %2594  ;;  %v2593_v11 = vpop.permute.xlu0 %2592 }
 0x444   : > { %v6986_v28 = vmax.f32 %v2577_v30, %v2595_v50  ;;  %v6988_v44 = vmax.f32 %v2576_v48, %v2593_v11 }
 0x446   : > { %2634 = vrot.lane.b32.xlu1 %v6986_v28, %s5241_s6  ;;  %2632 = vrot.lane.b32.xlu0 %v6988_v44, %s5241_s6 }
 0x447   : > { %v2599_v4 = vpop.permute.xlu1 %2598  ;;  %v2597_v13 = vpop.permute.xlu0 %2596 }
 0x448   : > { %v6994_v42 = vmax.f32 %v2579_v49, %v2599_v4  ;;  %v6996_v26 = vmax.f32 %v2578_v8, %v2597_v13 }
 0x44a   : > { %2638 = vrot.lane.b32.xlu1 %v6994_v42, %s5241_s6  ;;  %2636 = vrot.lane.b32.xlu0 %v6996_v26, %s5241_s6 }
 0x44b   : > { %v2603_v34 = vpop.permute.xlu1 %2602  ;;  %v2601_v24 = vpop.permute.xlu0 %2600 }
 0x44c   : > { %v7002_v6 = vmax.f32 %v2581_v52, %v2603_v34  ;;  %v7004_v53 = vmax.f32 %v2580_v21, %v2601_v24 }
 0x44e   : > { %2642 = vrot.lane.b32.xlu1 %v7002_v6, %s5241_s6  ;;  %2640 = vrot.lane.b32.xlu0 %v7004_v53, %s5241_s6 }
 0x44f   : > { %v2607_v55 = vpop.permute.xlu1 %2606  ;;  %v2605_v37 = vpop.permute.xlu0 %2604 }
 0x450   : > { %v7010_v61 = vmax.f32 %v2583_v57, %v2607_v55  ;;  %v7012_v58 = vmax.f32 %v2582_v46, %v2605_v37 }
 0x452   : > { %2646 = vrot.lane.b32.xlu1 %v7010_v61, %s5241_s6  ;;  %2644 = vrot.lane.b32.xlu0 %v7012_v58, %s5241_s6  ;;  %s5256_s6 = smov 114  }
 0x456   : > { %2658 = vrot.lane.b32.xlu1 %v6986_v28, %s5251_s9  ;;  %2656 = vrot.lane.b32.xlu0 %v6988_v44, %s5251_s9 }
 0x45a   : > { %2662 = vrot.lane.b32.xlu1 %v6994_v42, %s5251_s9  ;;  %2660 = vrot.lane.b32.xlu0 %v6996_v26, %s5251_s9 }
 0x45e   : > { %2666 = vrot.lane.b32.xlu1 %v7002_v6, %s5251_s9  ;;  %2664 = vrot.lane.b32.xlu0 %v7004_v53, %s5251_s9 }
 0x462   : > { %2670 = vrot.lane.b32.xlu1 %v7010_v61, %s5251_s9  ;;  %2668 = vrot.lane.b32.xlu0 %v7012_v58, %s5251_s9 }
 0x466   : > { %2682 = vrot.lane.b32.xlu1 %v6986_v28, %s5252_s10  ;;  %2680 = vrot.lane.b32.xlu0 %v6988_v44, %s5252_s10 }
 0x46a   : > { %2686 = vrot.lane.b32.xlu1 %v6994_v42, %s5252_s10  ;;  %2684 = vrot.lane.b32.xlu0 %v6996_v26, %s5252_s10 }
 0x46e   : > { %2690 = vrot.lane.b32.xlu1 %v7002_v6, %s5252_s10  ;;  %2688 = vrot.lane.b32.xlu0 %v7004_v53, %s5252_s10 }
 0x472   : > { %2694 = vrot.lane.b32.xlu1 %v7010_v61, %s5252_s10  ;;  %2692 = vrot.lane.b32.xlu0 %v7012_v58, %s5252_s10  ;;  %s5261_s10 = smov [#allocation6]  }
 0x476   : > { %2706 = vrot.lane.b32.xlu1 %v6986_v28, %s5253_s11  ;;  %2704 = vrot.lane.b32.xlu0 %v6988_v44, %s5253_s11 }
 0x47a   : > { %2710 = vrot.lane.b32.xlu1 %v6994_v42, %s5253_s11  ;;  %2708 = vrot.lane.b32.xlu0 %v6996_v26, %s5253_s11 }
 0x47e   : > { %2714 = vrot.lane.b32.xlu1 %v7002_v6, %s5253_s11  ;;  %2712 = vrot.lane.b32.xlu0 %v7004_v53, %s5253_s11 }
 0x482   : > { %2718 = vrot.lane.b32.xlu1 %v7010_v61, %s5253_s11  ;;  %2716 = vrot.lane.b32.xlu0 %v7012_v58, %s5253_s11  ;;  %s5170_s11 = sshll.u32 %s5261_s10, 4  ;;  %s5171_s11 = int_to_ptr.vmem [resolvable:$false] %s5170_s11 }
 0x486   : > { %2730 = vrot.lane.b32.xlu1 %v6986_v28, %s5254_s23  ;;  %2728 = vrot.lane.b32.xlu0 %v6988_v44, %s5254_s23 }
 0x48a   : > { %2734 = vrot.lane.b32.xlu1 %v6994_v42, %s5254_s23  ;;  %2732 = vrot.lane.b32.xlu0 %v6996_v26, %s5254_s23 }
 0x48e   : > { %2738 = vrot.lane.b32.xlu1 %v7002_v6, %s5254_s23  ;;  %2736 = vrot.lane.b32.xlu0 %v7004_v53, %s5254_s23 }
 0x492   : > { %2742 = vrot.lane.b32.xlu1 %v7010_v61, %s5254_s23  ;;  %2740 = vrot.lane.b32.xlu0 %v7012_v58, %s5254_s23  ;;  %s5172_s23 = scalar_lea.vmem %s5171_s11, 256 }
 0x496   : > { %2754 = vrot.lane.b32.xlu1 %v6986_v28, %s5255_s4  ;;  %2752 = vrot.lane.b32.xlu0 %v6988_v44, %s5255_s4 }
 0x49a   : > { %2758 = vrot.lane.b32.xlu1 %v6994_v42, %s5255_s4  ;;  %2756 = vrot.lane.b32.xlu0 %v6996_v26, %s5255_s4 }
 0x49e   : > { %2762 = vrot.lane.b32.xlu1 %v7002_v6, %s5255_s4  ;;  %2760 = vrot.lane.b32.xlu0 %v7004_v53, %s5255_s4 }
 0x4a2   : > { %2766 = vrot.lane.b32.xlu1 %v7010_v61, %s5255_s4  ;;  %2764 = vrot.lane.b32.xlu0 %v7012_v58, %s5255_s4 }
 0x4a6   : > { %2778 = vrot.lane.b32.xlu1 %v6986_v28, %s5256_s6  ;;  %2776 = vrot.lane.b32.xlu0 %v6988_v44, %s5256_s6 }
 0x4aa   : > { %2782 = vrot.lane.b32.xlu1 %v6994_v42, %s5256_s6  ;;  %2780 = vrot.lane.b32.xlu0 %v6996_v26, %s5256_s6 }
 0x4ae   : > { %2786 = vrot.lane.b32.xlu1 %v7002_v6, %s5256_s6  ;;  %2784 = vrot.lane.b32.xlu0 %v7004_v53, %s5256_s6 }
 0x4b2   : > { %2790 = vrot.lane.b32.xlu1 %v7010_v61, %s5256_s6  ;;  %2788 = vrot.lane.b32.xlu0 %v7012_v58, %s5256_s6 }
 0x4b8   : > { %v7066_v22 = vpop.permute.xlu1 %2634  ;;  %v7068_v1 = vpop.permute.xlu0 %2632 }
 0x4bc   : > { %v7070_v23 = vpop.permute.xlu1 %2638  ;;  %v7072_v12 = vpop.permute.xlu0 %2636 }
 0x4c0   : > { %v7074_v56 = vpop.permute.xlu1 %2642  ;;  %v7076_v29 = vpop.permute.xlu0 %2640 }
 0x4c4   : > { %v7078_v7 = vpop.permute.xlu1 %2646  ;;  %v7080_v45 = vpop.permute.xlu0 %2644 }
 0x4c8   : > { %v2659_v14 = vpop.permute.xlu1 %2658  ;;  %v2657_v16 = vpop.permute.xlu0 %2656 }
 0x4c9   : > { %v2936_v48 = vcombine.low %v6986_v28, %v2659_v14  ;;  %v2937_v51 = vcombine.high %v6986_v28, %v2659_v14  ;;  %v2800_v35 = vcombine.low %v6988_v44, %v2657_v16  ;;  %v2801_v49 = vcombine.high %v6988_v44, %v2657_v16 }
 0x4cb   : > { %v7119_v8 = vrot.slane %v2936_v48, %v8513_v3  ;;  %v7127_v52 = vrot.slane %v2937_v51, %v8513_v3  ;;  %v7130_v21 = vrot.slane %v2800_v35, %v8513_v3  ;;  %v7133_v20 = vrot.slane %v2801_v49, %v8513_v3 }
 0x4cc   : > { %v2663_v32 = vpop.permute.xlu1 %2662  ;;  %v2661_v10 = vpop.permute.xlu0 %2660 }
 0x4cd   : > { %v3208_v27 = vcombine.low %v6994_v42, %v2663_v32  ;;  %v3209_v57 = vcombine.high %v6994_v42, %v2663_v32  ;;  %v3072_v46 = vcombine.low %v6996_v26, %v2661_v10  ;;  %v3073_v28 = vcombine.high %v6996_v26, %v2661_v10 }
 0x4cf   : > { %v7145_v34 = vrot.slane %v3208_v27, %v8513_v3  ;;  %v7163_v16 = vrot.slane %v3209_v57, %v8513_v3 }
 0x4d0   : > { %v2667_v62 = vpop.permute.xlu1 %2666  ;;  %v2665_v39 = vpop.permute.xlu0 %2664 }
 0x4d1   : > { %v3480_v44 = vcombine.low %v7002_v6, %v2667_v62  ;;  %v3481_v4 = vcombine.high %v7002_v6, %v2667_v62  ;;  %v3344_v13 = vcombine.low %v7004_v53, %v2665_v39  ;;  %v3345_v24 = vcombine.high %v7004_v53, %v2665_v39 }
 0x4d3   : > { %v7176_v62 = vrot.slane %v3480_v44, %v8513_v3  ;;  %v7182_v39 = vrot.slane %v3344_v13, %v8513_v3 }
 0x4d4   : > { %v7082_v5 = vpop.permute.xlu1 %2670  ;;  %v7084_v41 = vpop.permute.xlu0 %2668 }
 0x4d5   : > { %v3752_v42 = vcombine.low %v7010_v61, %v7082_v5  ;;  %v3753_v26 = vcombine.high %v7010_v61, %v7082_v5  ;;  %v3616_v6 = vcombine.low %v7012_v58, %v7084_v41  ;;  %v3617_v14 = vcombine.high %v7012_v58, %v7084_v41 }
 0x4d6   : > { %v7173_v61 = vrot.slane %v3073_v28, %v8513_v3  ;;  %v7179_v58 = vrot.slane %v3481_v4, %v8513_v3  ;;  %v7185_v5 = vrot.slane %v3345_v24, %v8513_v3 }
 0x4d7   : > { %v7188_v41 = vrot.slane %v3752_v42, %v8513_v3  ;;  %v7200_v35 = vrot.slane %v3753_v26, %v8513_v3  ;;  %v7203_v49 = vrot.slane %v3616_v6, %v8513_v3  ;;  %v7206_v27 = vrot.slane %v3617_v14, %v8513_v3 }
 0x4d8   : > { %v2683_v54 = vpop.permute.xlu1 %2682  ;;  %v2681_v31 = vpop.permute.xlu0 %2680 }
 0x4d9   : > { %v2816_v2 = vcombine.low %v7068_v1, %v2681_v31  ;;  %v2952_v50 = vcombine.low %v7066_v22, %v2683_v54  ;;  %v2953_v11 = vcombine.high %v7066_v22, %v2683_v54  ;;  %v2817_v55 = vcombine.high %v7068_v1, %v2681_v31  ;;  %8515 = vst [vmem:[#allocation31_spill] sm:$0xff] %v7188_v41 }
 0x4da   : > { %v7166_v1 = vrot.slane %v3072_v46, %v8513_v3 }
 0x4db   : > { %v2824_v53 = vrot.slane %v2816_v2, %v8513_v3  ;;  %v2960_v32 = vrot.slane %v2952_v50, %v8513_v3  ;;  %v7170_v10 = vrot.slane %v2953_v11, %v8513_v3  ;;  %v7191_v54 = vrot.slane %v2817_v55, %v8513_v3 }
 0x4dc   : > { %v7086_v25 = vpop.permute.xlu1 %2686  ;;  %v7088_v9 = vpop.permute.xlu0 %2684 }
 0x4dd   : > { %v3224_v31 = vcombine.low %v7070_v23, %v7086_v25  ;;  %v2864_v2 = vcombine.low %v7130_v21, %v2824_v53  ;;  %v3000_v57 = vcombine.low %v7119_v8, %v2960_v32  ;;  %v3001_v46 = vcombine.high %v7119_v8, %v2960_v32 }
 0x4de   : > { %v3225_v11 = vcombine.high %v7070_v23, %v7086_v25  ;;  %v2865_v28 = vcombine.high %v7130_v21, %v2824_v53  ;;  %v3088_v44 = vcombine.low %v7072_v12, %v7088_v9  ;;  %v3089_v4 = vcombine.high %v7072_v12, %v7088_v9 }
 0x4df   : > { %v7227_v42 = vrot.slane %v3224_v31, %v8513_v3  ;;  %v7242_v26 = vrot.slane %v2864_v2, %v8514_v0  ;;  %v7252_v32 = vrot.slane %v3000_v57, %v8514_v0 }
 0x4e0   : > { %v7090_v60 = vpop.permute.xlu1 %2690  ;;  %v7092_v15 = vpop.permute.xlu0 %2688  ;;  %v7245_v6 = vrot.slane %v3225_v11, %v8513_v3  ;;  %v7260_v2 = vrot.slane %v2865_v28, %v8514_v0 }
 0x4e1   : > { %v3360_v13 = vcombine.low %v7076_v29, %v7092_v15  ;;  %v3496_v23 = vcombine.low %v7074_v56, %v7090_v60  ;;  %v3497_v9 = vcombine.high %v7074_v56, %v7090_v60  ;;  %v3361_v14 = vcombine.high %v7076_v29, %v7092_v15 }
 0x4e2   : > { %v3096_v56 = vrot.slane %v3088_v44, %v8513_v3  ;;  %v7256_v60 = vrot.slane %v3089_v4, %v8513_v3  ;;  %8516 = vst [vmem:[#allocation24_spill] sm:$0xff] %v7260_v2  ;;  %v3272_v11 = vcombine.low %v7145_v34, %v7227_v42  ;;  %v7272_v44 = vrot.slane %v3001_v46, %v8514_v0 }
 0x4e3   : > { %v3368_v31 = vrot.slane %v3360_v13, %v8513_v3  ;;  %v3504_v29 = vrot.slane %v3496_v23, %v8513_v3  ;;  %v3273_v4 = vcombine.high %v7145_v34, %v7227_v42  ;;  %v7277_v28 = vrot.slane %v3497_v9, %v8513_v3 }
 0x4e4   : > { %v7094_v43 = vpop.permute.xlu1 %2694  ;;  %v7096_v47 = vpop.permute.xlu0 %2692  ;;  %8517 = vst [vmem:[#allocation33_spill] sm:$0xff] %v7272_v44  ;;  %v3375_v46 = vrot.slane %v3361_v14, %v8513_v3  ;;  %v3136_v34 = vcombine.low %v7166_v1, %v3096_v56  ;;  %v3137_v42 = vcombine.high %v7166_v1, %v3096_v56  ;;  %v3152_v9 = vcombine.low %v7173_v61, %v7256_v60 }
 0x4e5   : > { %v3768_v55 = vcombine.low %v7078_v7, %v7094_v43  ;;  %v3632_v53 = vcombine.low %v7080_v45, %v7096_v47  ;;  %v3769_v15 = vcombine.high %v7078_v7, %v7094_v43  ;;  %8518 = vst [vmem:[#allocation25_spill] sm:$0xff] %v7277_v28  ;;  %v3633_v23 = vcombine.high %v7080_v45, %v7096_v47 }
 0x4e6   : > { %v3288_v7 = vcombine.low %v7163_v16, %v7245_v6  ;;  %v3153_v45 = vcombine.high %v7173_v61, %v7256_v60  ;;  %v3544_v47 = vcombine.low %v7176_v62, %v3504_v29  ;;  %v3545_v43 = vcombine.high %v7176_v62, %v3504_v29 }
 0x4e7   : > { %v7280_v13 = vrot.slane %v3768_v55, %v8513_v3  ;;  %v3640_v12 = vrot.slane %v3632_v53, %v8513_v3  ;;  %v3408_v55 = vcombine.low %v7182_v39, %v3368_v31  ;;  %v7300_v14 = vrot.slane %v3769_v15, %v8513_v3 }
 0x4e8   : > { %v7098_v18 = vpop.permute.xlu1 %2706  ;;  %v7100_v40 = vpop.permute.xlu0 %2704  ;;  %v3560_v1 = vcombine.low %v7179_v58, %v7277_v28  ;;  %v7313_v60 = vrot.slane %v3633_v23, %v8513_v3  ;;  %v3409_v62 = vcombine.high %v7182_v39, %v3368_v31  ;;  %v3424_v29 = vcombine.low %v7185_v5, %v3375_v46 }
 0x4e9   : > { %8519 = vst [vmem:[#allocation34_spill] sm:$0xff] %v7280_v13  ;;  %v3816_v61 = vcombine.low %v7188_v41, %v7280_v13  ;;  %v3425_v15 = vcombine.high %v7185_v5, %v3375_v46  ;;  %v3680_v24 = vcombine.low %v7203_v49, %v3640_v12  ;;  %v3681_v44 = vcombine.high %v7203_v49, %v3640_v12 }
 0x4ea   : > { %v7321_v2 = vrot.slane %v3136_v34, %v8514_v0  ;;  %v7324_v56 = vrot.slane %v3272_v11, %v8514_v0  ;;  %v7327_v28 = vrot.slane %v3408_v55, %v8514_v0  ;;  %v3832_v31 = vcombine.low %v7200_v35, %v7300_v14 }
 0x4eb   : > { %v7340_v12 = vrot.slane %v3544_v47, %v8514_v0  ;;  %v3696_v11 = vcombine.low %v7206_v27, %v7313_v60  ;;  %v7349_v55 = vrot.slane %v3816_v61, %v8514_v0  ;;  %v7352_v39 = vrot.slane %v3680_v24, %v8514_v0 }
 0x4ec   : > { %v7102_v33 = vpop.permute.xlu1 %2710  ;;  %v7104_v17 = vpop.permute.xlu0 %2708  ;;  %v7355_v5 = vrot.slane %v3137_v42, %v8514_v0  ;;  %v7358_v47 = vrot.slane %v3409_v62, %v8514_v0  ;;  %v7361_v13 = vrot.slane %v3273_v4, %v8514_v0  ;;  %v7364_v46 = vrot.slane %v3681_v44, %v8514_v0 }
 0x4ed   : > { %v7367_v34 = vrot.slane %v3545_v43, %v8514_v0  ;;  %v8524_v24 = vcombine.low %v7133_v20, %v7191_v54  ;;  %v7376_v42 = vrot.slane %v3152_v9, %v8514_v0  ;;  %v8527_v44 = vcombine.low %v7127_v52, %v7170_v10 }
 0x4ee   : > { %8520 = vst [vmem:[#allocation27_spill] sm:$0xff] %v7358_v47  ;;  %8521 = vst [vmem:[#allocation28_spill] sm:$0xff] %v7361_v13  ;;  %v7413_v9 = vrot.slane %v3832_v31, %v8514_v0 }
 0x4ef   : > { %8522 = vst [vmem:[#allocation30_spill] sm:$0xff] %v7364_v46  ;;  %8523 = vst [vmem:[#allocation45_spill] sm:$0xff] %v7367_v34  ;;  %v7373_v61 = vrot.slane %v8524_v24, %v8514_v0  ;;  %v7388_v43 = vrot.slane %v8527_v44, %v8514_v0  ;;  %v7391_v34 = vrot.slane %v3424_v29, %v8514_v0 }
 0x4f0   : > { %v7106_v63 = vpop.permute.xlu1 %2714  ;;  %v7108_v30 = vpop.permute.xlu0 %2712  ;;  %8526 = vst [vmem:[#allocation32_spill] sm:$0xff] %v7376_v42  ;;  %v7394_v24 = vrot.slane %v3288_v7, %v8514_v0  ;;  %v7404_v46 = vrot.slane %v3560_v1, %v8514_v0  ;;  %8532 = vst [vmem:[#allocation13_spill] sm:$0xff] %v7413_v9  ;;  %v7422_v1 = vrot.slane %v3153_v45, %v8514_v0 }
 0x4f1   : > { %8525 = vst [vmem:[#allocation46_spill] sm:$0xff] %v7373_v61  ;;  %8528 = vst [vmem:[#allocation43_spill] sm:$0xff] %v7391_v34  ;;  %v7401_v61 = vrot.slane %v3696_v11, %v8514_v0  ;;  %v8533_v11 = vcombine.high %v7133_v20, %v7191_v54 }
 0x4f2   : > { %8529 = vst [vmem:[#allocation44_spill] sm:$0xff] %v7394_v24  ;;  %8531 = vst [vmem:[#allocation54_spill] sm:$0xff] %v7404_v46 }
 0x4f3   : > { %8530 = vst [vmem:[#allocation50_spill] sm:$0xff] %v7401_v61  ;;  %v7419_v42 = vrot.slane %v8533_v11, %v8514_v0  ;;  %8535 = vst [vmem:[#allocation40_spill] sm:$0xff] %v7422_v1 }
 0x4f4   : > { %v7111_v36 = vpop.permute.xlu1 %2718  ;;  %v7113_v19 = vpop.permute.xlu0 %2716 }
 0x4f5   : > { %8534 = vst [vmem:[#allocation14_spill] sm:$0xff] %v7419_v42 }
 0x4f8   : > { %v7122_v38 = vpop.permute.xlu1 %2730  ;;  %v7124_v59 = vpop.permute.xlu0 %2728 }
 0x4fc   : > { %v7151_v37 = vpop.permute.xlu1 %2734  ;;  %v7153_v22 = vpop.permute.xlu0 %2732 }
 0x500   : > { %v7195_v48 = vpop.permute.xlu1 %2738  ;;  %v7197_v51 = vpop.permute.xlu0 %2736 }
 0x504   : > { %v7231_v25 = vpop.permute.xlu1 %2742  ;;  %v7233_v21 = vpop.permute.xlu0 %2740 }
 0x508   : > { %v7267_v57 = vpop.permute.xlu1 %2754  ;;  %v7269_v8 = vpop.permute.xlu0 %2752 }
 0x509   : > { %v2968_v62 = vcombine.low %v7098_v18, %v7267_v57  ;;  %v2969_v44 = vcombine.high %v7098_v18, %v7267_v57  ;;  %v2832_v29 = vcombine.low %v7100_v40, %v7269_v8  ;;  %v2833_v7 = vcombine.high %v7100_v40, %v7269_v8 }
 0x50a   : > { %v8536_v18 = vcombine.high %v7127_v52, %v7170_v10  ;;  %v7431_v40 = vrot.slane %v3425_v15, %v8514_v0  ;;  %v8539_v52 = vcombine.high %v7163_v16, %v7245_v6 }
 0x50b   : > { %v7434_v8 = vrot.slane %v2968_v62, %v8513_v3 }
 0x50c   : > { %v7302_v53 = vpop.permute.xlu1 %2758  ;;  %v7304_v50 = vpop.permute.xlu0 %2756  ;;  %v7428_v57 = vrot.slane %v8536_v18, %v8514_v0  ;;  %8538 = vst [vmem:[#allocation55_spill] sm:$0xff] %v7431_v40  ;;  %v7444_v10 = vrot.slane %v8539_v52, %v8514_v0  ;;  %v7452_v40 = vrot.slane %v2969_v44, %v8513_v3 }
 0x50d   : > { %v3240_v20 = vcombine.low %v7102_v33, %v7302_v53  ;;  %v3241_v54 = vcombine.high %v7102_v33, %v7302_v53  ;;  %v3104_v15 = vcombine.low %v7104_v17, %v7304_v50  ;;  %v7455_v33 = vrot.slane %v2832_v29, %v8513_v3 }
 0x50e   : > { %8537 = vst [vmem:[#allocation38_spill] sm:$0xff] %v7428_v57  ;;  %8540 = vst [vmem:[#allocation58_spill] sm:$0xff] %v7444_v10  ;;  %v7458_v53 = vrot.slane %v2833_v7, %v8513_v3  ;;  %v3105_v6 = vcombine.high %v7104_v17, %v7304_v50 }
 0x50f   : > { %v7473_v44 = vrot.slane %v3240_v20, %v8513_v3  ;;  %v7476_v29 = vrot.slane %v3241_v54, %v8513_v3 }
 0x510   : > { %v7335_v23 = vpop.permute.xlu1 %2762  ;;  %v7337_v49 = vpop.permute.xlu0 %2760 }
 0x511   : > { %v3376_v17 = vcombine.low %v7108_v30, %v7337_v49 }
 0x514   : > { %v7380_v4 = vpop.permute.xlu1 %2766  ;;  %v7382_v41 = vpop.permute.xlu0 %2764 }
 0x515   : > { %v3648_v9 = vcombine.low %v7113_v19, %v7382_v41 }
 0x518   : > { %v2779_v45 = vpop.permute.xlu1 %2778  ;;  %v2777_v31 = vpop.permute.xlu0 %2776 }
 0x519   : > { %v2985_v62 = vcombine.high %v7122_v38, %v2779_v45  ;;  %v2848_v11 = vcombine.low %v7124_v59, %v2777_v31  ;;  %v2849_v18 = vcombine.high %v7124_v59, %v2777_v31  ;;  %v2984_v16 = vcombine.low %v7122_v38, %v2779_v45 }
 0x51a   : > { %v3512_v38 = vcombine.low %v7106_v63, %v7335_v23  ;;  %v7483_v45 = vrot.slane %v3104_v15, %v8513_v3  ;;  %v3377_v31 = vcombine.high %v7108_v30, %v7337_v49  ;;  %v7501_v30 = vrot.slane %v3105_v6, %v8513_v3 }
 0x51b   : > { %v7464_v52 = vrot.slane %v2985_v62, %v8513_v3  ;;  %v7467_v10 = vrot.slane %v2848_v11, %v8513_v3  ;;  %v7470_v59 = vrot.slane %v2849_v18, %v8513_v3  ;;  %v7492_v62 = vrot.slane %v2984_v16, %v8513_v3 }
 0x51c   : > { %v2783_v50 = vpop.permute.xlu1 %2782  ;;  %v2781_v7 = vpop.permute.xlu0 %2780  ;;  %v7507_v20 = vrot.slane %v3512_v38, %v8513_v3  ;;  %v8541_v18 = vcombine.high %v7106_v63, %v7335_v23  ;;  %v7516_v15 = vrot.slane %v3376_v17, %v8513_v3  ;;  %v3784_v38 = vcombine.low %v7111_v36, %v7380_v4 }
 0x51d   : > { %v2896_v11 = vcombine.low %v7455_v33, %v7467_v10  ;;  %v3256_v49 = vcombine.low %v7151_v37, %v2783_v50  ;;  %v3257_v54 = vcombine.high %v7151_v37, %v2783_v50  ;;  %v3121_v16 = vcombine.high %v7153_v22, %v2781_v7 }
 0x51e   : > { %v7513_v57 = vrot.slane %v8541_v18, %v8513_v3  ;;  %v3120_v6 = vcombine.low %v7153_v22, %v2781_v7  ;;  %v7520_v37 = vrot.slane %v3377_v31, %v8513_v3  ;;  %v3032_v23 = vcombine.low %v7434_v8, %v7492_v62 }
 0x51f   : > { %v7525_v50 = vrot.slane %v3257_v54, %v8513_v3  ;;  %v7528_v63 = vrot.slane %v3121_v16, %v8513_v3  ;;  %v2904_v7 = vrot.slane %v2896_v11, %v8514_v0  ;;  %v7536_v31 = vrot.slane %v3256_v49, %v8513_v3 }
 0x520   : > { %v2787_v1 = vpop.permute.xlu1 %2786  ;;  %v2785_v42 = vpop.permute.xlu0 %2784  ;;  %v7546_v46 = vrot.slane %v3120_v6, %v8513_v3  ;;  %v8542_v18 = vcombine.high %v7111_v36, %v7380_v4  ;;  %v3040_v34 = vrot.slane %v3032_v23, %v8514_v0 }
 0x521   : > { %v3529_v17 = vcombine.high %v7195_v48, %v2787_v1  ;;  %v3393_v22 = vcombine.high %v7197_v51, %v2785_v42  ;;  %v3392_v16 = vcombine.low %v7197_v51, %v2785_v42  ;;  %v3528_v51 = vcombine.low %v7195_v48, %v2787_v1 }
 0x522   : > { %v7556_v54 = vrot.slane %v8542_v18, %v8513_v3  ;;  %v2929_v24 = vcombine.high %v7242_v26, %v2904_v7  ;;  %v2928_v49 = vcombine.low %v7242_v26, %v2904_v7  ;;  %v3304_v36 = vcombine.low %v7473_v44, %v7536_v31 }
 0x523   : > { %v7560_v42 = vrot.slane %v3529_v17, %v8513_v3  ;;  %v7563_v6 = vrot.slane %v3393_v22, %v8513_v3  ;;  %v7576_v1 = vrot.slane %v3392_v16, %v8513_v3  ;;  %v3168_v22 = vcombine.low %v7483_v45, %v7546_v46 }
 0x524   : > { %v2791_v61 = vpop.permute.xlu1 %2790  ;;  %v2789_v17 = vpop.permute.xlu0 %2788  ;;  %v7586_v18 = vrot.slane %v3528_v51, %v8513_v3  ;;  %v3892_v16 = vsel %vm3888_vm12, %v2929_v24, -inf  ;;  %v3889_v48 = vsel %vm3888_vm12, %v2928_v49, -inf  ;;  %v3064_v23 = vcombine.low %v7252_v32, %v3040_v34 }
 0x525   : > { %8543 = vst [vmem:[#allocation15_spill] sm:$0xff] %v7560_v42  ;;  %v3801_v11 = vcombine.high %v7231_v25, %v2791_v61  ;;  %v3800_v7 = vcombine.low %v7231_v25, %v2791_v61  ;;  %3893 = vmax.xlane.f32.xlu1 %v3892_v16  ;;  %3890 = vmax.xlane.f32.xlu0 %v3889_v48 }
 0x526   : > { %v3664_v42 = vcombine.low %v7233_v21, %v2789_v17  ;;  %v3665_v26 = vcombine.high %v7233_v21, %v2789_v17  ;;  %v8544_v25 = vcombine.high %v7113_v19, %v7382_v41  ;;  %v3176_v19 = vrot.slane %v3168_v22, %v8514_v0 }
 0x527   : > { %v7589_v4 = vrot.slane %v3801_v11, %v8513_v3  ;;  %v3440_v11 = vcombine.low %v7516_v15, %v7576_v1  ;;  %v7609_v51 = vrot.slane %v3800_v7, %v8513_v3  ;;  %v3656_v41 = vrot.slane %v3648_v9, %v8513_v3 }
 0x528   : > { %v7600_v61 = vrot.slane %v8544_v25, %v8513_v3  ;;  %v7612_v21 = vrot.slane %v3664_v42, %v8513_v3  ;;  %v7615_v48 = vrot.slane %v3665_v26, %v8513_v3  ;;  %v3913_v17 = vsel %vm3888_vm12, %v3064_v23, -inf }
 0x529   : > { %v3065_v16 = vcombine.high %v7252_v32, %v3040_v34  ;;  %v3312_v25 = vrot.slane %v3304_v36, %v8514_v0  ;;  %v7623_v49 = vrot.slane %v3784_v38, %v8513_v3  ;;  %v3576_v42 = vcombine.low %v7507_v20, %v7586_v18  ;;  %3914 = vmax.xlane.f32.xlu0 %v3913_v17 }
 0x52a   : > { %v3728_v26 = vcombine.low %v7600_v61, %v7615_v48  ;;  %v3712_v9 = vcombine.low %v3656_v41, %v7612_v21  ;;  %v3200_v23 = vcombine.low %v7321_v2, %v3176_v19  ;;  %v3448_v32 = vrot.slane %v3440_v11, %v8514_v0 }
 0x52b   : > { %v8545_v34 = vcombine.high %v7206_v27, %v7313_v60  ;;  %v3033_v36 = vcombine.high %v7434_v8, %v7492_v62  ;;  %v2897_v7 = vcombine.high %v7455_v33, %v7467_v10  ;;  %v3169_v17 = vcombine.high %v7483_v45, %v7546_v46  ;;  %v8546_v46 = vld [vmem:[#allocation25_spill] sm:$0xff] }
 0x52c   : > { %v3848_v22 = vcombine.low %v7623_v49, %v7609_v51  ;;  %v3937_v11 = vsel %vm3888_vm12, %v3200_v23, -inf  ;;  %v3916_v24 = vsel %vm3888_vm12, %v3065_v16, -inf  ;;  %v3336_v27 = vcombine.low %v7324_v56, %v3312_v25 }
 0x52d   : > { %v7638_v38 = vrot.slane %v8545_v34, %v8514_v0  ;;  %v3201_v60 = vcombine.high %v7321_v2, %v3176_v19  ;;  %v3441_v8 = vcombine.high %v7516_v15, %v7576_v1  ;;  %3938 = vmax.xlane.f32.xlu1 %v3937_v11  ;;  %3917 = vmax.xlane.f32.xlu0 %v3916_v24 }
 0x52e   : > { %v3584_v10 = vrot.slane %v3576_v42, %v8514_v0  ;;  %v8547_v33 = vcombine.high %v7179_v58, %v8546_v46  ;;  %v3472_v62 = vcombine.low %v7327_v28, %v3448_v32  ;;  %v3337_v16 = vcombine.high %v7324_v56, %v3312_v25 }
 0x52f   : > { %v3720_v23 = vrot.slane %v3712_v9, %v8514_v0  ;;  %v8548_v2 = vcombine.high %v7200_v35, %v7300_v14  ;;  %v3305_v1 = vcombine.high %v7473_v44, %v7536_v31  ;;  %v3577_v58 = vcombine.high %v7507_v20, %v7586_v18 }
 0x530   : > { %v7659_v45 = vrot.slane %v8547_v33, %v8514_v0  ;;  %v7675_v24 = vrot.slane %v2897_v7, %v8514_v0  ;;  %v7678_v19 = vrot.slane %v3033_v36, %v8514_v0  ;;  %v3961_v56 = vsel %vm3888_vm12, %v3336_v27, -inf }
 0x531   : > { %v7668_v15 = vrot.slane %v8548_v2, %v8514_v0  ;;  %v3940_v25 = vsel %vm3888_vm12, %v3201_v60, -inf  ;;  %v3856_v35 = vrot.slane %v3848_v22, %v8514_v0  ;;  %v7684_v14 = vrot.slane %v3169_v17, %v8514_v0  ;;  %3962 = vmax.xlane.f32.xlu1 %v3961_v56  ;;  %v8553_v56 = vld [vmem:[#allocation30_spill] sm:$0xff] }
 0x532   : > { %v3713_v44 = vcombine.high %v3656_v41, %v7612_v21  ;;  %3941 = vmax.xlane.f32.xlu0 %v3940_v25  ;;  %v3608_v20 = vcombine.low %v7340_v12, %v3584_v10  ;;  %v7689_v31 = vrot.slane %v3441_v8, %v8514_v0  ;;  %v3985_v18 = vsel %vm3888_vm12, %v3472_v62, -inf  ;;  %v8550_v21 = vld [vmem:[#allocation24_spill] sm:$0xff] }
 0x533   : > { %v3964_v42 = vsel %vm3888_vm12, %v3337_v16, -inf  ;;  %v3473_v9 = vcombine.high %v7327_v28, %v3448_v32  ;;  %v3744_v22 = vcombine.low %v7352_v39, %v3720_v23  ;;  %v3609_v34 = vcombine.high %v7340_v12, %v3584_v10  ;;  %v8552_v28 = vld [vmem:[#allocation33_spill] sm:$0xff] }
 0x534   : > { %8549 = vst [vmem:[#allocation16_spill] sm:$0xff] %v7689_v31  ;;  %v3745_v36 = vcombine.high %v7352_v39, %v3720_v23  ;;  %v2930_v41 = vcombine.low %v8550_v21, %v7675_v24  ;;  %v7700_v7 = vrot.slane %v3305_v1, %v8514_v0  ;;  %v3880_v17 = vcombine.low %v7349_v55, %v3856_v35 }
 0x535   : > { %v3881_v11 = vcombine.high %v7349_v55, %v3856_v35  ;;  %v3202_v27 = vcombine.low %v7355_v5, %v7684_v14  ;;  %v3066_v32 = vcombine.low %v8552_v28, %v7678_v19  ;;  %v3849_v12 = vcombine.high %v7623_v49, %v7609_v51  ;;  %3986 = vmax.xlane.f32.xlu1 %v3985_v18  ;;  %v8568_v28 = vld [vmem:[#allocation50_spill] sm:$0xff] }
 0x536   : > { %8551 = vst [vmem:[#allocation51_spill] sm:$0xff] %v7700_v7  ;;  %3965 = vmax.xlane.f32.xlu0 %v3964_v42  ;;  %v3474_v39 = vcombine.low %v7358_v47, %v7689_v31  ;;  %v7713_v60 = vrot.slane %v3713_v44, %v8514_v0  ;;  %v4009_v8 = vsel %vm3888_vm12, %v3608_v20, -inf  ;;  %v3988_v55 = vsel %vm3888_vm12, %v3473_v9, -inf  ;;  %v8556_v42 = vld [vmem:[#allocation45_spill] sm:$0xff] }
 0x537   : > { %v4033_v10 = vsel %vm3888_vm12, %v3744_v22, -inf  ;;  %v7719_v46 = vrot.slane %v3577_v58, %v8514_v0  ;;  %v4012_v33 = vsel %vm3888_vm12, %v3609_v34, -inf  ;;  %v4036_v49 = vsel %vm3888_vm12, %v3745_v36, -inf }
 0x538   : > { %v3895_v51 = vsel %vm3888_vm12, %v2930_v41, -inf  ;;  %v3338_v62 = vcombine.low %v7361_v13, %v7700_v7  ;;  %v4057_v16 = vsel %vm3888_vm12, %v3880_v17, -inf  ;;  %v4060_v23 = vsel %vm3888_vm12, %v3881_v11, -inf  ;;  %v8565_v13 = vld [vmem:[#allocation44_spill] sm:$0xff] }
 0x539   : > { %v7729_v2 = vsel %vm3888_vm12, %v3202_v27, -inf  ;;  %v7732_v1 = vsel %vm3888_vm12, %v3066_v32, -inf  ;;  %4010 = vmax.xlane.f32.xlu1 %v4009_v8  ;;  %v7735_v58 = vsel %vm3888_vm12, %v3474_v39, -inf  ;;  %v8554_v35 = vcombine.low %v7458_v53, %v7470_v59  ;;  %v8559_v27 = vld [vmem:[#allocation46_spill] sm:$0xff]  ;;  %v8560_v39 = vld [vmem:[#allocation32_spill] sm:$0xff] }
 0x53a   : > { %3989 = vmax.xlane.f32.xlu0 %v3988_v55  ;;  %v8555_v20 = vcombine.low %v7501_v30, %v7528_v63  ;;  %v7750_v22 = vrot.slane %v3849_v12, %v8514_v0  ;;  %v8557_v34 = vcombine.low %v7452_v40, %v7464_v52  ;;  %v8558_v41 = vcombine.low %v7520_v37, %v7563_v6 }
 0x53b   : > { %v2920_v44 = vrot.slane %v8554_v35, %v8514_v0  ;;  %v7761_v11 = vsel %vm3888_vm12, %v3338_v62, -inf  ;;  %v8561_v12 = vcombine.low %v7476_v29, %v7525_v50  ;;  %v8563_v62 = vld [vmem:[#allocation15_spill] sm:$0xff] }
 0x53c   : > { %v3192_v18 = vrot.slane %v8555_v20, %v8514_v0  ;;  %v3056_v36 = vrot.slane %v8557_v34, %v8514_v0  ;;  %v3464_v17 = vrot.slane %v8558_v41, %v8514_v0  ;;  %v8562_v20 = vld [vmem:[#allocation43_spill] sm:$0xff]  ;;  %v3736_v41 = vrot.slane %v3728_v26, %v8514_v0 }
 0x53d   : > { %v2932_v32 = vcombine.low %v8559_v27, %v2920_v44  ;;  %v3328_v55 = vrot.slane %v8561_v12, %v8514_v0  ;;  %v8564_v9 = vcombine.low %v7513_v57, %v8563_v62  ;;  %4034 = vmax.xlane.f32.xlu1 %v4033_v10  ;;  %v2933_v47 = vcombine.high %v8559_v27, %v2920_v44  ;;  %v8569_v10 = vld [vmem:[#allocation54_spill] sm:$0xff] }
 0x53e   : > { %v3204_v8 = vcombine.low %v8560_v39, %v3192_v18  ;;  %v3068_v35 = vcombine.low %v7388_v43, %v3056_v36  ;;  %v3476_v34 = vcombine.low %v8562_v20, %v3464_v17  ;;  %4013 = vmax.xlane.f32.xlu0 %v4012_v33  ;;  %v8572_v44 = vcombine.low %v7556_v54, %v7589_v4 }
 0x53f   : > { %v3600_v25 = vrot.slane %v8564_v9, %v8514_v0  ;;  %v7780_v3 = vsel %vm3888_vm12, %v2932_v32, -inf  ;;  %v3340_v7 = vcombine.low %v8565_v13, %v3328_v55  ;;  %v3748_v9 = vcombine.low %v8568_v28, %v3736_v41 }
 0x540   : > { %v7783_v12 = vsel %vm3888_vm12, %v3204_v8, -inf  ;;  %v7788_v31 = vsel %vm3888_vm12, %v3068_v35, -inf  ;;  %v7791_v26 = vsel %vm3888_vm12, %v3476_v34, -inf  ;;  %v7799_v8 = vsel %vm3888_vm12, %v2933_v47, -inf  ;;  %v8573_v47 = vld [vmem:[#allocation13_spill] sm:$0xff] }
 0x541   : > { %8566 = vst [vmem:[#allocation48_spill] sm:$0xff] %v7788_v31  ;;  %8567 = vst [vmem:[#allocation39_spill] sm:$0xff] %v7791_v26  ;;  %v3612_v33 = vcombine.low %v8569_v10, %v3600_v25  ;;  %v7796_v32 = vsel %vm3888_vm12, %v3340_v7, -inf  ;;  %v3872_v27 = vrot.slane %v8572_v44, %v8514_v0  ;;  %v3205_v35 = vcombine.high %v8560_v39, %v3192_v18 }
 0x542   : > { %8570 = vst [vmem:[#allocation37_spill] sm:$0xff] %v7796_v32  ;;  %8571 = vst [vmem:[#allocation53_spill] sm:$0xff] %v7799_v8  ;;  %v7807_v34 = vsel %vm3888_vm12, %v3748_v9, -inf  ;;  %v3069_v31 = vcombine.high %v7388_v43, %v3056_v36  ;;  %v3477_v7 = vcombine.high %v8562_v20, %v3464_v17  ;;  %4058 = vmax.xlane.f32.xlu1 %v4057_v16  ;;  %4037 = vmax.xlane.f32.xlu0 %v4036_v49 }
 0x543   : > { %v7810_v26 = vsel %vm3888_vm12, %v3612_v33, -inf  ;;  %v3884_v8 = vcombine.low %v8573_v47, %v3872_v27  ;;  %v7816_v32 = vsel %vm3888_vm12, %v3205_v35, -inf  ;;  %v3341_v44 = vcombine.high %v8565_v13, %v3328_v55  ;;  %v8582_v35 = vld [vmem:[#allocation38_spill] sm:$0xff] }
 0x544   : > { %v3749_v18 = vcombine.high %v8568_v28, %v3736_v41  ;;  %v7821_v39 = vsel %vm3888_vm12, %v3069_v31, -inf  ;;  %v7824_v9 = vsel %vm3888_vm12, %v3477_v7, -inf  ;;  %v3613_v43 = vcombine.high %v8569_v10, %v3600_v25  ;;  %v8575_v25 = vld [vmem:[#allocation14_spill] sm:$0xff] }
 0x545   : > { %v8574_v49 = vcombine.high %v7458_v53, %v7470_v59  ;;  %v7832_v36 = vsel %vm3888_vm12, %v3884_v8, -inf  ;;  %v7835_v13 = vsel %vm3888_vm12, %v3341_v44, -inf  ;;  %v3885_v31 = vcombine.high %v8573_v47, %v3872_v27  ;;  %v8584_v47 = vld [vmem:[#allocation55_spill] sm:$0xff] }
 0x546   : > { %v7838_v28 = vsel %vm3888_vm12, %v3749_v18, -inf  ;;  %v7842_v17 = vsel %vm3888_vm12, %v3613_v43, -inf  ;;  %v8576_v53 = vcombine.high %v7501_v30, %v7528_v63  ;;  %v8577_v20 = vcombine.high %v7452_v40, %v7464_v52  ;;  %3896 = vmax.xlane.f32.xlu1 %v3895_v51  ;;  %4061 = vmax.xlane.f32.xlu0 %v4060_v23  ;;  %v8581_v23 = vld [vmem:[#allocation40_spill] sm:$0xff] }
 0x547   : > { %v2927_v16 = vrot.slane %v8574_v49, %v8514_v0  ;;  %v7854_v10 = vsel %vm3888_vm12, %v3885_v31, -inf  ;;  %v8578_v33 = vcombine.high %v7520_v37, %v7563_v6  ;;  %v8579_v30 = vcombine.high %v7476_v29, %v7525_v50  ;;  %v8585_v50 = vld [vmem:[#allocation58_spill] sm:$0xff] }
 0x548   : > { %v3199_v59 = vrot.slane %v8576_v53, %v8514_v0  ;;  %v3063_v41 = vrot.slane %v8577_v20, %v8514_v0  ;;  %v8580_v40 = vcombine.high %v7600_v61, %v7615_v48  ;;  %v8583_v37 = vcombine.high %v7513_v57, %v8563_v62 }
 0x549   : > { %v2934_v55 = vcombine.low %v8575_v25, %v2927_v16  ;;  %v3471_v8 = vrot.slane %v8578_v33, %v8514_v0  ;;  %v3335_v63 = vrot.slane %v8579_v30, %v8514_v0  ;;  %v2935_v61 = vcombine.high %v8575_v25, %v2927_v16 }
 0x54a   : > { %v3743_v52 = vrot.slane %v8580_v40, %v8514_v0  ;;  %v3206_v27 = vcombine.low %v8581_v23, %v3199_v59  ;;  %v3070_v7 = vcombine.low %v8582_v35, %v3063_v41  ;;  %v3607_v6 = vrot.slane %v8583_v37, %v8514_v0  ;;  %3944 = vmax.xlane.f32.xlu1 %v7729_v2 }
 0x54b   : > { %v7869_v51 = vsel %vm3888_vm12, %v2934_v55, -inf  ;;  %v3478_v29 = vcombine.low %v8584_v47, %v3471_v8  ;;  %v3342_v44 = vcombine.low %v8585_v50, %v3335_v63  ;;  %v8586_v57 = vcombine.high %v7556_v54, %v7589_v4  ;;  %3920 = vmax.xlane.f32.xlu0 %v7732_v1 }
 0x54c   : > { %v3750_v18 = vcombine.low %v7638_v38, %v3743_v52  ;;  %v7882_v48 = vsel %vm3888_vm12, %v3206_v27, -inf  ;;  %v7885_v43 = vsel %vm3888_vm12, %v3070_v7, -inf  ;;  %v3614_v49 = vcombine.low %v7659_v45, %v3607_v6 }
 0x54d   : > { %v3879_v62 = vrot.slane %v8586_v57, %v8514_v0  ;;  %v7895_v31 = vsel %vm3888_vm12, %v3478_v29, -inf  ;;  %v7898_v16 = vsel %vm3888_vm12, %v3342_v44, -inf  ;;  %v7904_v55 = vsel %vm3888_vm12, %v2935_v61, -inf  ;;  %v8592_v61 = vld [vmem:[#allocation33_spill] sm:$0xff] }
 0x54e   : > { %v7901_v25 = vsel %vm3888_vm12, %v3750_v18, -inf  ;;  %v7907_v53 = vsel %vm3888_vm12, %v3614_v49, -inf  ;;  %v3207_v4 = vcombine.high %v8581_v23, %v3199_v59  ;;  %v3071_v2 = vcombine.high %v8582_v35, %v3063_v41  ;;  %3992 = vmax.xlane.f32.xlu1 %v7735_v58 }
 0x54f   : > { %v3886_v54 = vcombine.low %v7668_v15, %v3879_v62  ;;  %v3479_v1 = vcombine.high %v8584_v47, %v3471_v8  ;;  %v3343_v20 = vcombine.high %v8585_v50, %v3335_v63  ;;  %v3751_v33 = vcombine.high %v7638_v38, %v3743_v52  ;;  %3968 = vmax.xlane.f32.xlu0 %v7761_v11  ;;  %v8587_v63 = vld [vmem:[#allocation31_spill] sm:$0xff]  ;;  %v8588_v52 = vld [vmem:[#allocation34_spill] sm:$0xff] }
 0x550   : > { %v3615_v30 = vcombine.high %v7659_v45, %v3607_v6  ;;  %v7920_v27 = vsel %vm3888_vm12, %v3207_v4, -inf  ;;  %v7923_v7 = vsel %vm3888_vm12, %v3071_v2, -inf  ;;  %v3887_v59 = vcombine.high %v7668_v15, %v3879_v62  ;;  %v8594_v62 = vld [vmem:[#allocation27_spill] sm:$0xff]  ;;  %v8596_v2 = vld [vmem:[#allocation28_spill] sm:$0xff] }
 0x551   : > { %v7917_v40 = vsel %vm3888_vm12, %v3886_v54, -inf  ;;  %v7929_v41 = vsel %vm3888_vm12, %v3479_v1, -inf  ;;  %v7932_v38 = vsel %vm3888_vm12, %v3343_v20, -inf  ;;  %v7935_v45 = vsel %vm3888_vm12, %v3751_v33, -inf  ;;  %v8595_v4 = vld [vmem:[#allocation51_spill] sm:$0xff] }
 0x552   : > { %v7938_v8 = vsel %vm3888_vm12, %v3615_v30, -inf  ;;  %v8589_v15 = vcombine.high %v8587_v63, %v8588_v52  ;;  %v4078_v58 = vsel %vm3888_vm12, %v3887_v59, -inf  ;;  %v8590_v11 = vcombine.low %v8553_v56, %v7713_v60 }
 0x553   : > { %v8591_v37 = vcombine.low %v8556_v42, %v7719_v46  ;;  %v2931_v47 = vcombine.high %v8550_v21, %v7675_v24  ;;  %v3203_v18 = vcombine.high %v7355_v5, %v7684_v14  ;;  %v3067_v49 = vcombine.high %v8592_v61, %v7678_v19  ;;  %v8593_v21 = vld [vmem:[#allocation16_spill] sm:$0xff] }
 0x554   : > { %v3831_v23 = vrot.slane %v8589_v15, %v8514_v0  ;;  %v4039_v35 = vsel %vm3888_vm12, %v8590_v11, -inf  ;;  %v3475_v54 = vcombine.high %v8594_v62, %v8593_v21  ;;  %v3339_v1 = vcombine.high %v8596_v2, %v8595_v4 }
 0x555   : > { %v4015_v6 = vsel %vm3888_vm12, %v8591_v37, -inf  ;;  %4040 = vmax.xlane.f32.xlu1 %v4039_v35  ;;  %v3898_v50 = vsel %vm3888_vm12, %v2931_v47, -inf  ;;  %v3946_v57 = vsel %vm3888_vm12, %v3203_v18, -inf  ;;  %v3922_v24 = vsel %vm3888_vm12, %v3067_v49, -inf }
 0x556   : > { %v3882_v29 = vcombine.low %v3831_v23, %v7750_v22  ;;  %4016 = vmax.xlane.f32.xlu0 %v4015_v6  ;;  %v3994_v20 = vsel %vm3888_vm12, %v3475_v54, -inf  ;;  %v3970_v5 = vsel %vm3888_vm12, %v3339_v1, -inf  ;;  %v3747_v19 = vcombine.high %v8553_v56, %v7713_v60  ;;  %v8597_v60 = vld [vmem:[#allocation48_spill] sm:$0xff]  ;;  %v8599_v56 = vld [vmem:[#allocation37_spill] sm:$0xff] }
 0x557   : > { %v3611_v14 = vcombine.high %v8556_v42, %v7719_v46  ;;  %v3883_v59 = vcombine.high %v3831_v23, %v7750_v22  ;;  %v8598_v46 = vld [vmem:[#allocation39_spill] sm:$0xff]  ;;  %v8600_v42 = vld [vmem:[#allocation53_spill] sm:$0xff] }
 0x558   : > { %v4063_v44 = vsel %vm3888_vm12, %v3882_v29, -inf  ;;  %v4042_v33 = vsel %vm3888_vm12, %v3747_v19, -inf }
 0x559   : > { %3899 = vmax.xlane.f32.xlu1 %v3898_v50  ;;  %v4018_v30 = vsel %vm3888_vm12, %v3611_v14, -inf  ;;  %v4066_v63 = vsel %vm3888_vm12, %v3883_v59, -inf }
 0x55a   : > { %4064 = vmax.xlane.f32.xlu0 %v4063_v44 }
 0x55d   : > { %3947 = vmax.xlane.f32.xlu1 %v3946_v57 }
 0x55e   : > { %3923 = vmax.xlane.f32.xlu0 %v3922_v24 }
 0x561   : > { %3995 = vmax.xlane.f32.xlu1 %v3994_v20 }
 0x562   : > { %3971 = vmax.xlane.f32.xlu0 %v3970_v5 }
 0x565   : > { %4043 = vmax.xlane.f32.xlu1 %v4042_v33 }
 0x566   : > { %4019 = vmax.xlane.f32.xlu0 %v4018_v30 }
 0x569   : > { %3902 = vmax.xlane.f32.xlu1 %v7780_v3  ;;  %v8601_v3 = vlaneseq }
 0x56a   : > { %4067 = vmax.xlane.f32.xlu0 %v4066_v63 }
 0x56b   : > { %v4146_v22 = vand.u32 127, %v8601_v3 }
 0x56d   : > { %3950 = vmax.xlane.f32.xlu1 %v7783_v12  ;;  %v8602_v12 = vld [vmem:[#allocation9_spill] sm:$0xff] }
 0x56e   : > { %3926 = vmax.xlane.f32.xlu0 %v8597_v60 }
 0x571   : > { %3998 = vmax.xlane.f32.xlu1 %v8598_v46 }
 0x572   : > { %3974 = vmax.xlane.f32.xlu0 %v8599_v56 }
 0x575   : > { %4046 = vmax.xlane.f32.xlu1 %v7807_v34 }
 0x576   : > { %4022 = vmax.xlane.f32.xlu0 %v7810_v26  ;;  %v8011_v26 = vsub.s32 %v4146_v22, %v8602_v12 }
 0x579   : > { %3905 = vmax.xlane.f32.xlu1 %v8600_v42 }
 0x57a   : > { %4070 = vmax.xlane.f32.xlu0 %v7832_v36 }
 0x57d   : > { %3953 = vmax.xlane.f32.xlu1 %v7816_v32 }
 0x57e   : > { %3929 = vmax.xlane.f32.xlu0 %v7821_v39 }
 0x581   : > { %4001 = vmax.xlane.f32.xlu1 %v7824_v9 }
 0x582   : > { %3977 = vmax.xlane.f32.xlu0 %v7835_v13 }
 0x585   : > { %4049 = vmax.xlane.f32.xlu1 %v7838_v28 }
 0x586   : > { %4025 = vmax.xlane.f32.xlu0 %v7842_v17 }
 0x589   : > { %3908 = vmax.xlane.f32.xlu1 %v7869_v51 }
 0x58a   : > { %4073 = vmax.xlane.f32.xlu0 %v7854_v10 }
 0x58d   : > { %3956 = vmax.xlane.f32.xlu1 %v7882_v48 }
 0x58e   : > { %3932 = vmax.xlane.f32.xlu0 %v7885_v43 }
 0x591   : > { %4004 = vmax.xlane.f32.xlu1 %v7895_v31 }
 0x592   : > { %3980 = vmax.xlane.f32.xlu0 %v7898_v16 }
 0x595   : > { %4052 = vmax.xlane.f32.xlu1 %v7901_v25 }
 0x596   : > { %4028 = vmax.xlane.f32.xlu0 %v7907_v53 }
 0x599   : > { %3911 = vmax.xlane.f32.xlu1 %v7904_v55 }
 0x59a   : > { %4076 = vmax.xlane.f32.xlu0 %v7917_v40 }
 0x59d   : > { %3959 = vmax.xlane.f32.xlu1 %v7920_v27 }
 0x59e   : > { %3935 = vmax.xlane.f32.xlu0 %v7923_v7 }
 0x5a1   : > { %4007 = vmax.xlane.f32.xlu1 %v7929_v41 }
 0x5a2   : > { %3983 = vmax.xlane.f32.xlu0 %v7932_v38 }
 0x5a5   : > { %4055 = vmax.xlane.f32.xlu1 %v7935_v45 }
 0x5a6   : > { %4031 = vmax.xlane.f32.xlu0 %v7938_v8 }
 0x5aa   : > { %4079 = vmax.xlane.f32.xlu0 %v4078_v58 }
 0x5b2   : > { %v3894_v32 = vpop.xlane.xlu1 %3893  ;;  %v3891_v34 = vpop.xlane.xlu0 %3890 }
 0x5b3   : > { %v4154_v39 = vrot.slane %v3894_v32, %v8011_v26  ;;  %v4150_v9 = vrot.slane %v3891_v34, %v8011_v26 }
 0x5b5   : > { %v4404_v36 = vsel %vm4403_vm13, %v4154_v39, %v4150_v9 }
 0x5b6   : > { %v3915_v13 = vpop.xlane.xlu0 %3914 }
 0x5b7   : > { %v4182_v10 = vrot.slane %v3915_v13, %v8011_v26 }
 0x5ba   : > { %v3939_v28 = vpop.xlane.xlu1 %3938  ;;  %v3918_v17 = vpop.xlane.xlu0 %3917 }
 0x5bb   : > { %v4186_v51 = vrot.slane %v3918_v17, %v8011_v26  ;;  %v4214_v16 = vrot.slane %v3939_v28, %v8011_v26 }
 0x5bd   : > { %v4417_v48 = vsel %vm4403_vm13, %v4186_v51, %v4182_v10 }
 0x5be   : > { %v3963_v43 = vpop.xlane.xlu1 %3962 }
 0x5bf   : > { %v3942_v31 = vpop.xlane.xlu0 %3941  ;;  %v4246_v27 = vrot.slane %v3963_v43, %v8011_v26 }
 0x5c0   : > { %v4218_v25 = vrot.slane %v3942_v31, %v8011_v26 }
 0x5c2   : > { %v4424_v55 = vsel %vm4403_vm13, %v4218_v25, %v4214_v16  ;;  %v3987_v53 = vpop.xlane.xlu1 %3986 }
 0x5c3   : > { %v3966_v40 = vpop.xlane.xlu0 %3965  ;;  %v4278_v8 = vrot.slane %v3987_v53, %v8011_v26 }
 0x5c4   : > { %v4250_v7 = vrot.slane %v3966_v40, %v8011_v26 }
 0x5c6   : > { %v4431_v41 = vsel %vm4403_vm13, %v4250_v7, %v4246_v27  ;;  %v4011_v38 = vpop.xlane.xlu1 %4010 }
 0x5c7   : > { %v3990_v45 = vpop.xlane.xlu0 %3989  ;;  %v4310_v11 = vrot.slane %v4011_v38, %v8011_v26 }
 0x5c8   : > { %v4282_v52 = vrot.slane %v3990_v45, %v8011_v26 }
 0x5ca   : > { %v4438_v15 = vsel %vm4403_vm13, %v4282_v52, %v4278_v8  ;;  %v4035_v23 = vpop.xlane.xlu1 %4034 }
 0x5cb   : > { %v4014_v58 = vpop.xlane.xlu0 %4013  ;;  %v4342_v29 = vrot.slane %v4035_v23, %v8011_v26 }
 0x5cc   : > { %v4314_v35 = vrot.slane %v4014_v58, %v8011_v26 }
 0x5ce   : > { %v4445_v37 = vsel %vm4403_vm13, %v4314_v35, %v4310_v11 }
 0x5cf   : > { %v4059_v6 = vpop.xlane.xlu1 %4058  ;;  %v4038_v47 = vpop.xlane.xlu0 %4037 }
 0x5d0   : > { %v4346_v50 = vrot.slane %v4038_v47, %v8011_v26  ;;  %v4374_v49 = vrot.slane %v4059_v6, %v8011_v26 }
 0x5d2   : > { %v4452_v44 = vsel %vm4403_vm13, %v4346_v50, %v4342_v29 }
 0x5d3   : > { %v3897_v18 = vpop.xlane.xlu1 %3896  ;;  %v4062_v61 = vpop.xlane.xlu0 %4061 }
 0x5d4   : > { %v4158_v57 = vrot.slane %v3897_v18, %v8011_v26  ;;  %v4378_v24 = vrot.slane %v4062_v61, %v8011_v26 }
 0x5d6   : > { %v4406_v21 = vsel %vm4405_vm14, %v4158_v57, %v4404_v36  ;;  %v4459_v62 = vsel %vm4403_vm13, %v4378_v24, %v4374_v49 }
 0x5d7   : > { %v3945_v54 = vpop.xlane.xlu1 %3944 }
 0x5d8   : > { %v3921_v4 = vpop.xlane.xlu0 %3920  ;;  %v4222_v2 = vrot.slane %v3945_v54, %v8011_v26 }
 0x5d9   : > { %v4190_v1 = vrot.slane %v3921_v4, %v8011_v26 }
 0x5da   : > { %v4425_v20 = vsel %vm4405_vm14, %v4222_v2, %v4424_v55 }
 0x5db   : > { %v4418_v5 = vsel %vm4405_vm14, %v4190_v1, %v4417_v48  ;;  %v3993_v19 = vpop.xlane.xlu1 %3992 }
 0x5dc   : > { %v3969_v14 = vpop.xlane.xlu0 %3968  ;;  %v4286_v33 = vrot.slane %v3993_v19, %v8011_v26 }
 0x5dd   : > { %v4254_v30 = vrot.slane %v3969_v14, %v8011_v26 }
 0x5de   : > { %v4439_v59 = vsel %vm4405_vm14, %v4286_v33, %v4438_v15 }
 0x5df   : > { %v4432_v63 = vsel %vm4405_vm14, %v4254_v30, %v4431_v41 }
 0x5e2   : > { %v4041_v60 = vpop.xlane.xlu1 %4040 }
 0x5e3   : > { %v4017_v46 = vpop.xlane.xlu0 %4016  ;;  %v4350_v56 = vrot.slane %v4041_v60, %v8011_v26 }
 0x5e4   : > { %v4318_v42 = vrot.slane %v4017_v46, %v8011_v26 }
 0x5e5   : > { %v8050_v3 = vsel %vm4405_vm14, %v4350_v56, %v4452_v44 }
 0x5e6   : > { %v4446_v22 = vsel %vm4405_vm14, %v4318_v42, %v4445_v37  ;;  %v3900_v12 = vpop.xlane.xlu1 %3899 }
 0x5e7   : > { %v4065_v32 = vpop.xlane.xlu0 %4064  ;;  %v4162_v34 = vrot.slane %v3900_v12, %v8011_v26 }
 0x5e8   : > { %v4382_v39 = vrot.slane %v4065_v32, %v8011_v26 }
 0x5e9   : > { %v4408_v9 = vsel %vm4407_vm15, %v4162_v34, %v4406_v21 }
 0x5ea   : > { %v4460_v36 = vsel %vm4405_vm14, %v4382_v39, %v4459_v62  ;;  %v3948_v13 = vpop.xlane.xlu1 %3947 }
 0x5eb   : > { %v3924_v28 = vpop.xlane.xlu0 %3923  ;;  %v4226_v17 = vrot.slane %v3948_v13, %v8011_v26 }
 0x5ec   : > { %v4194_v10 = vrot.slane %v3924_v28, %v8011_v26 }
 0x5ed   : > { %v4426_v51 = vsel %vm4407_vm15, %v4226_v17, %v4425_v20 }
 0x5ee   : > { %v4419_v48 = vsel %vm4407_vm15, %v4194_v10, %v4418_v5  ;;  %v3996_v43 = vpop.xlane.xlu1 %3995 }
 0x5ef   : > { %v3972_v31 = vpop.xlane.xlu0 %3971  ;;  %v4290_v16 = vrot.slane %v3996_v43, %v8011_v26 }
 0x5f0   : > { %v4258_v25 = vrot.slane %v3972_v31, %v8011_v26 }
 0x5f1   : > { %v4440_v55 = vsel %vm4407_vm15, %v4290_v16, %v4439_v59 }
 0x5f2   : > { %v4433_v53 = vsel %vm4407_vm15, %v4258_v25, %v4432_v63  ;;  %v4044_v40 = vpop.xlane.xlu1 %4043 }
 0x5f3   : > { %v4020_v27 = vpop.xlane.xlu0 %4019  ;;  %v4354_v2 = vrot.slane %v4044_v40, %v8011_v26 }
 0x5f4   : > { %v4322_v7 = vrot.slane %v4020_v27, %v8011_v26 }
 0x5f5   : > { %v4454_v56 = vsel %vm4407_vm15, %v4354_v2, %v8050_v3 }
 0x5f6   : > { %v4447_v41 = vsel %vm4407_vm15, %v4322_v7, %v4446_v22  ;;  %v3903_v38 = vpop.xlane.xlu1 %3902 }
 0x5f7   : > { %v4068_v45 = vpop.xlane.xlu0 %4067  ;;  %v4166_v1 = vrot.slane %v3903_v38, %v8011_v26 }
 0x5f8   : > { %v4386_v20 = vrot.slane %v4068_v45, %v8011_v26 }
 0x5f9   : > { %v4410_v42 = vsel %vm4409_vm0, %v4166_v1, %v4408_v9 }
 0x5fa   : > { %v3951_v8 = vpop.xlane.xlu1 %3950  ;;  %v4461_v22 = vsel %vm4407_vm15, %v4386_v20, %v4460_v36 }
 0x5fb   : > { %v3927_v52 = vpop.xlane.xlu0 %3926  ;;  %v4230_v5 = vrot.slane %v3951_v8, %v8011_v26 }
 0x5fc   : > { %v4198_v19 = vrot.slane %v3927_v52, %v8011_v26 }
 0x5fd   : > { %v4427_v32 = vsel %vm4409_vm0, %v4230_v5, %v4426_v51 }
 0x5fe   : > { %v3999_v15 = vpop.xlane.xlu1 %3998  ;;  %v4420_v34 = vsel %vm4409_vm0, %v4198_v19, %v4419_v48 }
 0x5ff   : > { %v3975_v23 = vpop.xlane.xlu0 %3974  ;;  %v4294_v14 = vrot.slane %v3999_v15, %v8011_v26 }
 0x600   : > { %v4262_v30 = vrot.slane %v3975_v23, %v8011_v26 }
 0x601   : > { %v4441_v28 = vsel %vm4409_vm0, %v4294_v14, %v4440_v55 }
 0x602   : > { %v4047_v58 = vpop.xlane.xlu1 %4046  ;;  %v4434_v3 = vsel %vm4409_vm0, %v4262_v30, %v4433_v53 }
 0x603   : > { %v4023_v11 = vpop.xlane.xlu0 %4022  ;;  %v4358_v33 = vrot.slane %v4047_v58, %v8011_v26 }
 0x604   : > { %v4326_v63 = vrot.slane %v4023_v11, %v8011_v26 }
 0x605   : > { %v4455_v17 = vsel %vm4409_vm0, %v4358_v33, %v4454_v56 }
 0x606   : > { %v3906_v35 = vpop.xlane.xlu1 %3905  ;;  %v4448_v10 = vsel %vm4409_vm0, %v4326_v63, %v4447_v41 }
 0x607   : > { %v8067_v37 = vpop.xlane.xlu0 %4070  ;;  %v4170_v59 = vrot.slane %v3906_v35, %v8011_v26 }
 0x608   : > { %v4390_v51 = vrot.slane %v8067_v37, %v8011_v26 }
 0x609   : > { %v4412_v36 = vsel %vm4411_vm1, %v4170_v59, %v4410_v42 }
 0x60a   : > { %v3954_v6 = vpop.xlane.xlu1 %3953 }
 0x60b   : > { %v3930_v47 = vpop.xlane.xlu0 %3929  ;;  %v4234_v12 = vrot.slane %v3954_v6, %v8011_v26 }
 0x60c   : > { %v4202_v48 = vrot.slane %v3930_v47, %v8011_v26 }
 0x60d   : > { %v4428_v16 = vsel %vm4411_vm1, %v4234_v12, %v4427_v32 }
 0x60e   : > { %v8069_v29 = vpop.xlane.xlu1 %4001  ;;  %v4421_v15 = vsel %vm4411_vm1, %v4202_v48, %v4420_v34 }
 0x60f   : > { %v8071_v50 = vpop.xlane.xlu0 %3977  ;;  %v4298_v25 = vrot.slane %v8069_v29, %v8011_v26 }
 0x610   : > { %v4266_v55 = vrot.slane %v8071_v50, %v8011_v26 }
 0x612   : > { %v8073_v44 = vpop.xlane.xlu1 %4049  ;;  %v4435_v6 = vsel %vm4411_vm1, %v4266_v55, %v4434_v3 }
 0x613   : > { %v8075_v18 = vpop.xlane.xlu0 %4025  ;;  %v4362_v38 = vrot.slane %v8073_v44, %v8011_v26  ;;  %v4462_v44 = vsel %vm4409_vm0, %v4390_v51, %v4461_v22 }
 0x614   : > { %v4330_v23 = vrot.slane %v8075_v18, %v8011_v26 }
 0x616   : > { %v3909_v61 = vpop.xlane.xlu1 %3908 }
 0x617   : > { %v8077_v49 = vpop.xlane.xlu0 %4073  ;;  %v4174_v39 = vrot.slane %v3909_v61, %v8011_v26  ;;  %v4442_v61 = vsel %vm4411_vm1, %v4298_v25, %v4441_v28 }
 0x618   : > { %v4394_v1 = vrot.slane %v8077_v49, %v8011_v26 }
 0x619   : > { %v4414_v40 = vsel %vm4413_vm2, %v4174_v39, %v4412_v36 }
 0x61a   : > { %v3957_v57 = vpop.xlane.xlu1 %3956 }
 0x61b   : > { %v8079_v24 = vpop.xlane.xlu0 %3932  ;;  %v4238_v13 = vrot.slane %v3957_v57, %v8011_v26 }
 0x61c   : > { %v4206_v7 = vrot.slane %v8079_v24, %v8011_v26  ;;  %v4456_v24 = vsel %vm4411_vm1, %v4362_v38, %v4455_v17 }
 0x61d   : > { %v4429_v27 = vsel %vm4413_vm2, %v4238_v13, %v4428_v16 }
 0x61e   : > { %v8081_v21 = vpop.xlane.xlu1 %4004  ;;  %v4422_v18 = vsel %vm4413_vm2, %v4206_v7, %v4421_v15 }
 0x61f   : > { %v8083_v62 = vpop.xlane.xlu0 %3980  ;;  %v4302_v47 = vrot.slane %v8081_v21, %v8011_v26 }
 0x620   : > { %v4270_v41 = vrot.slane %v8083_v62, %v8011_v26 }
 0x621   : > { %v4443_v33 = vsel %vm4413_vm2, %v4302_v47, %v4442_v61 }
 0x622   : > { %v8085_v54 = vpop.xlane.xlu1 %4052  ;;  %v4436_v57 = vsel %vm4413_vm2, %v4270_v41, %v4435_v6 }
 0x623   : > { %v8087_v4 = vpop.xlane.xlu0 %4028  ;;  %v4366_v29 = vrot.slane %v8085_v54, %v8011_v26  ;;  %v4449_v54 = vsel %vm4411_vm1, %v4330_v23, %v4448_v10 }
 0x624   : > { %v4334_v59 = vrot.slane %v8087_v4, %v8011_v26 }
 0x625   : > { %v4457_v30 = vsel %vm4413_vm2, %v4366_v29, %v4456_v24 }
 0x626   : > { %v3912_v60 = vpop.xlane.xlu1 %3911  ;;  %v4450_v51 = vsel %vm4413_vm2, %v4334_v59, %v4449_v54 }
 0x627   : > { %v8099_v46 = vpop.xlane.xlu0 %4076  ;;  %v4178_v9 = vrot.slane %v3912_v60, %v8011_v26  ;;  %v8603_v60 = vld [vmem:[#allocation10_spill] sm:$0xff] }
 0x628   : > { %v4398_v42 = vrot.slane %v8099_v46, %v8011_v26 }
 0x629   : > { %v4416_v45 = vsel %vm4415_vm6, %v4178_v9, %v4414_v40  ;;  %v4463_v9 = vsel %vm4411_vm1, %v4394_v1, %v4462_v44 }
 0x62a   : > { %v3960_v43 = vpop.xlane.xlu1 %3959  ;;  %v4464_v48 = vsel %vm4413_vm2, %v4398_v42, %v4463_v9 }
 0x62b   : > { %v3936_v31 = vpop.xlane.xlu0 %3935  ;;  %v4242_v53 = vrot.slane %v3960_v43, %v8011_v26 }
 0x62c   : > { %v4210_v52 = vrot.slane %v3936_v31, %v8011_v26 }
 0x62d   : > { %v4430_v8 = vsel %vm4415_vm6, %v4242_v53, %v4429_v27 }
 0x62e   : > { %v4474_v58 = vcombine.low %v4416_v45, %v4430_v8  ;;  %v4475_v11 = vcombine.high %v4416_v45, %v4430_v8  ;;  %v4008_v35 = vpop.xlane.xlu1 %4007  ;;  %v4423_v2 = vsel %vm4415_vm6, %v4210_v52, %v4422_v18 }
 0x62f   : > { %v3984_v37 = vpop.xlane.xlu0 %3983  ;;  %v4306_v62 = vrot.slane %v4008_v35, %v8011_v26 }
 0x630   : > { %v4274_v50 = vrot.slane %v3984_v37, %v8011_v26  ;;  %v4482_v56 = vrot.slane %v4474_v58, %v8603_v60  ;;  %v4489_v12 = vrot.slane %v4475_v11, %v8603_v60 }
 0x631   : > { %v4444_v32 = vsel %vm4415_vm6, %v4306_v62, %v4443_v33 }
 0x632   : > { %v4437_v21 = vsel %vm4415_vm6, %v4274_v50, %v4436_v57  ;;  %v4056_v20 = vpop.xlane.xlu1 %4055 }
 0x633   : > { %v4490_v5 = vcombine.low %v4423_v2, %v4437_v21  ;;  %v4491_v19 = vcombine.high %v4423_v2, %v4437_v21  ;;  %v4032_v14 = vpop.xlane.xlu0 %4031  ;;  %v4370_v63 = vrot.slane %v4056_v20, %v8011_v26 }
 0x634   : > { %v4338_v39 = vrot.slane %v4032_v14, %v8011_v26 }
 0x635   : > { %v4498_v49 = vrot.slane %v4490_v5, %v8603_v60  ;;  %v4505_v22 = vrot.slane %v4491_v19, %v8603_v60  ;;  %v4458_v34 = vsel %vm4415_vm6, %v4370_v63, %v4457_v30 }
 0x636   : > { %v4506_v4 = vcombine.low %v4444_v32, %v4458_v34  ;;  %v4507_v13 = vcombine.high %v4444_v32, %v4458_v34  ;;  %v4451_v43 = vsel %vm4415_vm6, %v4338_v39, %v4450_v51 }
 0x637   : > { %v4538_v28 = vcombine.low %v4482_v56, %v4498_v49  ;;  %v4539_v17 = vcombine.high %v4482_v56, %v4498_v49  ;;  %v4080_v3 = vpop.xlane.xlu0 %4079  ;;  %v4554_v46 = vcombine.low %v4489_v12, %v4505_v22  ;;  %v4555_v36 = vcombine.high %v4489_v12, %v4505_v22 }
 0x638   : > { %v4402_v10 = vrot.slane %v4080_v3, %v8011_v26  ;;  %v4514_v55 = vrot.slane %v4506_v4, %v8603_v60  ;;  %v4521_v53 = vrot.slane %v4507_v13, %v8603_v60 }
 0x639   : > { %v4553_v45 = vrot.slane %v4539_v17, %v8514_v0  ;;  %v4546_v8 = vrot.slane %v4538_v28, %v8514_v0  ;;  %v4562_v52 = vrot.slane %v4554_v46, %v8514_v0  ;;  %v4569_v35 = vrot.slane %v4555_v36, %v8514_v0 }
 0x63a   : > { %v4465_v31 = vsel %vm4415_vm6, %v4402_v10, %v4464_v48 }
 0x63b   : > { %v4522_v16 = vcombine.low %v4451_v43, %v4465_v31  ;;  %v4523_v25 = vcombine.high %v4451_v43, %v4465_v31 }
 0x63d   : > { %v4530_v40 = vrot.slane %v4522_v16, %v8603_v60  ;;  %v4537_v27 = vrot.slane %v4523_v25, %v8603_v60 }
 0x63f   : > { %v4570_v7 = vcombine.low %v4514_v55, %v4530_v40  ;;  %v4571_v26 = vcombine.high %v4514_v55, %v4530_v40  ;;  %v4586_v41 = vcombine.low %v4521_v53, %v4537_v27  ;;  %v4587_v38 = vcombine.high %v4521_v53, %v4537_v27 }
 0x641   : > { %v4585_v15 = vrot.slane %v4571_v26, %v8514_v0  ;;  %v4578_v23 = vrot.slane %v4570_v7, %v8514_v0  ;;  %v4594_v58 = vrot.slane %v4586_v41, %v8514_v0  ;;  %v4601_v11 = vrot.slane %v4587_v38, %v8514_v0 }
 0x643   : > { %v4604_v37 = vcombine.low %v4553_v45, %v4585_v15  ;;  %v4603_v6 = vcombine.high %v4546_v8, %v4578_v23  ;;  %v4607_v47 = vcombine.high %v4562_v52, %v4594_v58  ;;  %v4605_v29 = vcombine.high %v4553_v45, %v4585_v15 }
 0x644   : > { %v4609_v50 = vcombine.high %v4569_v35, %v4601_v11  ;;  %v4606_v44 = vcombine.low %v4562_v52, %v4594_v58  ;;  %v4608_v61 = vcombine.low %v4569_v35, %v4601_v11  ;;  %v4602_v18 = vcombine.low %v4546_v8, %v4578_v23 }
 0x645   : > { %4615 = vrot.lane.b32.xlu0 %v4604_v37, %s5246_s19  ;;  %4611 = vrot.lane.b32.xlu1 %v4603_v6, %s5257_s8  ;;  %s4742_s19 = sshll.u32 %s5386_s5, 3 }
 0x646   : > { %s188_s27 = scalar_lea.vmem [#allocation6], %s4742_s19 }
 0x649   : > { %4627 = vrot.lane.b32.xlu0 %v4607_v47, %s5258_s17  ;;  %4619 = vrot.lane.b32.xlu1 %v4605_v29, %s5259_s22 }
 0x64d   : > { %4635 = vrot.lane.b32.xlu0 %v4609_v50, %s5260_s26  ;;  %4623 = vrot.lane.b32.xlu1 %v4606_v44, %s5243_s7  ;;  %s4747_s7 = sshll.u32 %s5303_s16, 7  ;;  %s4651_s16 = scalar_lea.sflag [#allocation5], %s5386_s5 }
 0x64e   : > { %s8199_s30 = scalar_lea.hbm %s8247_s3, %s4747_s7 }
 0x651   : > { %4631 = vrot.lane.b32.xlu1 %v4608_v61, %s5247_s20  ;;  %s4664_s20 = sshll.u32 %s188_s27, 4  ;;  %s8201_s20 = int_to_ptr.vmem [resolvable:$true] %s4664_s20 }
 0x652   : > { %s5166_s9 = scalar_lea.vmem %s8201_s20, 128  ;;  %p5173_p8 = scmp.lt.s32.totalorder %s8201_s20, %s5171_s11 }
 0x653   : > { %p5167_p6 = scmp.ne.s32.totalorder %s8201_s20, %s5166_s9  ;;  %p5174_p10 = scmp.lt.s32.totalorder %s5172_s23, %s5166_s9 }
 0x655   : > { %p5168_p12 = pnand %p5167_p6, %p8604_p11  ;;  %p5175_p0 = por %p5174_p10, %p5173_p8 }
 0x657   : > { %p5169_p13 = pneg %p5168_p12 }
 0x659   : > { %p5176_p2 = pnand %p5175_p0, %p5169_p13 }
 0x6b7   : > { %v4612_v0 = vpop.permute.xlu1 %4611  ;;  %v4616_v57 = vpop.permute.xlu0 %4615 }
 0x6b8   : > { %v4639_v24 = vsel %vm4638_vm8, %v4602_v18, %v4612_v0 }
 0x6b9   : > { %v4640_v21 = vsel %vm452_vm3, %v4639_v24, %v4616_v57 }
 0x6bb   : > { %v4620_v62 = vpop.permute.xlu1 %4619  ;;  %v4628_v2 = vpop.permute.xlu0 %4627 }
 0x6bc   : > { %v4642_v54 = vsel %vm4641_vm9, %v4640_v21, %v4620_v62 }
 0x6bf   : > { %v4624_v1 = vpop.permute.xlu1 %4623  ;;  %v4636_v14 = vpop.permute.xlu0 %4635 }
 0x6c0   : > { %v4643_v20 = vsel %vm454_vm4, %v4642_v54, %v4624_v1 }
 0x6c1   : > { %v4645_v19 = vsel %vm4644_vm10, %v4643_v20, %v4628_v2 }
 0x6c3   : > { %v4632_v5 = vpop.permute.xlu1 %4631 }
 0x6c4   : > { %v4646_v33 = vsel %vm456_vm5, %v4645_v19, %v4632_v5 }
 0x6c5   : > { %v4648_v30 = vsel %vm4647_vm11, %v4646_v33, %v4636_v14 }
 0x6c6   : > { %4649 = vst.msk [vmem:[%s188_s27] sm:$0xff] %vm458_vm7, %v4648_v30 }
 0x6c7   : > { %5179 = shalt.err (!%p5176_p2)
}
 0x6c8   : > { %s5180_s5 = scalar_lea.hbm %s8199_s30, 128  ;;  %s5184_s8 = scalar_lea.hbm %s8247_s3, 256 }
 0x6c9   : > { %p5181_p4 = scmp.ne.s32.totalorder %s8199_s30, %s5180_s5  ;;  %p5185_p9 = scmp.lt.u32.totalorder %s8199_s30, %s8247_s3 }
 0x6ca   : > { %p5186_p1 = scmp.lt.u32.totalorder %s5184_s8, %s5180_s5  ;;  %p5188_p6 = scmp.lt.u32.totalorder %s5180_s5, %s8199_s30 }
 0x6cb   : > { %p5182_p5 = pnand %p5181_p4, %p8604_p11 }
 0x6cc   : > { %p5187_p3 = por %p5186_p1, %p5185_p9 }
 0x6cd   : > { %p5183_p7 = pneg %p5182_p5 }
 0x6ce   : > { %p5189_p12 = por %p5188_p6, %p5187_p3 }
 0x6d0   : > { %p5190_p13 = pnand %p5189_p12, %p5183_p7 }
 0x6d2   : > { %5193 = shalt.err (!%p5190_p13)
}
 0x6d3   : > { %4761 = dma.vmem_to_hbm [thread:$0]  (%p8604_p11), %s8201_s20, 128, %s8199_s30, %s4651_s16  }
 0x6d4 PF: > { %s4676_s26 = sand.u32 1, %s5220_s12   ;;  %p8605_p8 = scmp.ne.s32.totalorder %s8338_s25, 0 }
 0x6d5   : > { %p8606_p10 = scmp.ge.s32.totalorder %s5232_s15, 2  ;;  %s4677_s19 = scalar_lea.sflag [#allocation5], %s4676_s26 }
 0x6d7   : > { %p4768_p0 = pnand %p8606_p10, %p8605_p8 }
 0x6d9   : > { %5215 = dma.done.wait (!%p4768_p0), %s4677_s19, 128  }
 0x6da   : > { %5217 = vsyncadd (!%p4768_p0), %s4677_s19, 4294967168  ;;  %p16_p2 = scmp.ge.s32.totalorder %s5307_s18, 4   ;;  %s8607_s12 = smov %s5224_s13 }
 0x6db   : > { %s8608_s13 = smov %s5228_s14  ;;  %s8609_s14 = smov %s5319_s21 }
 0x6dc   : > { %s8610_s15 = smov %s5307_s18  ;;  %18 = sbr.rel (!%p16_p2) target bundleno = 5 (0x5), region = 77 }
 0x6e3   :  { %4682 = vsyncpa [#allocation4], 1 }
 0x6e4   :  { %4684 = vsyncpa [#allocation4 + $0x1], 1 }
 0x6e5   :  { %4685 = vsyncpa [#allocation5], 1 }
 0x6e6   :  { %4687 = vsyncpa [#allocation5 + $0x1], 1 }

</bundles_post_ra>
